<compile_context>
chip_gen: v7x
topology: tpu7x:2x2x1
jax: 0.10.0
libtpu: 0.0.40
codegen_flags: <defaults>
</compile_context>

<pallas_src>
import functools

import jax
import jax.numpy as jnp
from jax.experimental import pallas as pl
from jax.experimental.pallas import tpu as pltpu


def _round_up(x, m):
    return (x + m - 1) // m * m


def _pick_cout_pad(cout, lane=128):
    """Lane-pad Cout only when the inflation is modest (review guidance)."""
    if cout % lane == 0:
        return cout
    padded = _round_up(cout, lane)
    return padded if padded * 2 <= cout * 3 else cout   # pad iff <= 1.5x


def _pick_band(Hout, Wout, Wpad, Cin, cout_p, KH, PH, out_bytes,
               max_band=128, budget_bytes=24 << 20):
    """Largest divisor of Hout (>= PH, <= max_band) whose band-local VMEM use
    fits the budget (v7x has only 64 MiB physical VMEM)."""
    def cost(band):
        xpad = (band + KH - 1) * Wpad * Cin * 2           # bf16 halo scratch
        acc = band * Wout * cout_p * 4                    # f32 accumulator
        outb = 2 * band * Wout * cout_p * out_bytes       # double-buffered out
        taps = 2 * band * Wout * Cin * 2                  # live tap copies
        return xpad + acc + outb + taps
    for band in range(min(Hout, max_band), 0, -1):
        if Hout % band == 0 and band >= max(PH, 1) and cost(band) <= budget_bytes:
            return band
    return Hout


# --------------------------------------------------------------------------
# Kernel: one output row-band of one batch element
# --------------------------------------------------------------------------
def _cblr_kernel(x_ref, w_ref, b_ref, o_ref, xpad_ref, *,
                 H, W, KH, KW, PH, PW, Wout, BAND, Cin):
    """x_ref:    (H, W, Cin)                 full image (resident across bands)
       w_ref:    (KH*KW, Cin, Cout_pad) bf16 BN-folded weights, one slab / tap
       b_ref:    (1, Cout_pad) f32           BN-folded bias
       o_ref:    (BAND, Wout, Cout_pad)      output row band
       xpad_ref: (BAND+KH-1, W+2*PW, Cin)    band-local bf16 halo scratch"""
    cout_p = o_ref.shape[-1]
    cdt = xpad_ref.dtype
    band = pl.program_id(1)
    r0 = band * BAND                 # first output row of this band
    rows = BAND + KH - 1             # padded input rows this band needs
    core = rows - 2 * PH             # rows always readable from x (any band)

    # ---- fill band-local halo scratch; zero ONLY the border ----------------
    if PW > 0:                                            # left/right columns
        xpad_ref[:, :PW, :] = jnp.zeros((rows, PW, Cin), cdt)
        xpad_ref[:, PW + W:, :] = jnp.zeros((rows, PW, Cin), cdt)

    # interior rows: in-bounds for every band (r0 + core <= H)
    xpad_ref[PH:PH + core, PW:PW + W, :] = x_ref[pl.ds(r0, core)].astype(cdt)

    if PH > 0:
        is_first = band == 0
        is_last = band == pl.num_programs(1) - 1

        @pl.when(is_first)                                # top image border
        def _():
            xpad_ref[:PH, PW:PW + W, :] = jnp.zeros((PH, W, Cin), cdt)

        @pl.when(jnp.logical_not(is_first))               # top halo rows
        def _():
            xpad_ref[:PH, PW:PW + W, :] = x_ref[pl.ds(r0 - PH, PH)].astype(cdt)

        @pl.when(is_last)                                 # bottom image border
        def _():
            xpad_ref[PH + core:, PW:PW + W, :] = jnp.zeros((PH, W, Cin), cdt)

        @pl.when(jnp.logical_not(is_last))                # bottom halo rows
        def _():
            xpad_ref[PH + core:, PW:PW + W, :] = \
                x_ref[pl.ds(r0 + core, PH)].astype(cdt)

    # ---- conv as KH*KW accumulating dots (no im2col slab) ------------------
    acc = None
    for kh in range(KH):
        for kw in range(KW):
            tap = xpad_ref[kh:kh + BAND, kw:kw + Wout, :]
            tap = tap.reshape(BAND * Wout, Cin)
            d = jnp.dot(tap, w_ref[kh * KW + kw],
                        preferred_element_type=jnp.float32)
            acc = d if acc is None else acc + d

    acc = acc + b_ref[...]                                # folded BN shift
    acc = jnp.where(acc >= 0, acc, 0.2 * acc)             # LeakyReLU(0.2), f32
    o_ref[...] = acc.reshape(BAND, Wout, cout_p).astype(o_ref.dtype)


# --------------------------------------------------------------------------
# pallas_call wrapper (NHWC) — preferred entry point for NHWC networks
# --------------------------------------------------------------------------
def conv_bn_lrelu_nhwc(x_nhwc, w_folded, b_folded, *, kernel_size, padding,
                       out_dtype=None, band=None):
    KH, KW = kernel_size
    PH, PW = padding
    N, H, W, Cin = x_nhwc.shape
    Hout = H + 2 * PH - KH + 1
    Wout = W + 2 * PW - KW + 1
    cout_p = w_folded.shape[-1]
    out_dtype = x_nhwc.dtype if out_dtype is None else out_dtype
    in_bytes = x_nhwc.dtype.itemsize
    out_bytes = jnp.dtype(out_dtype).itemsize

    if band is None:
        band = _pick_band(Hout, Wout, W + 2 * PW, Cin, cout_p, KH, PH,
                          out_bytes)
    assert Hout % band == 0 and band >= max(PH, 1), (Hout, band, PH)
    nb = Hout // band

    kernel = functools.partial(
        _cblr_kernel, H=H, W=W, KH=KH, KW=KW, PH=PH, PW=PW,
        Wout=Wout, BAND=band, Cin=Cin)

    # Rough VMEM need (double-buffered blocks + scratch + accumulator).
    need = (2 * H * W * Cin * in_bytes
            + 2 * KH * KW * Cin * cout_p * 2
            + 2 * cout_p * 4
            + 2 * band * Wout * cout_p * out_bytes
            + (band + KH - 1) * (W + 2 * PW) * Cin * 2
            + band * Wout * cout_p * 4
            + 2 * band * Wout * Cin * 2)
    vmem_limit = int(min(max(2 * need + (8 << 20), 32 << 20), 64 << 20))

    cost = pl.CostEstimate(
        flops=2 * N * Hout * Wout * KH * KW * Cin * cout_p,
        transcendentals=0,
        bytes_accessed=(N * H * W * Cin * in_bytes
                        + KH * KW * Cin * cout_p * 2
                        + N * Hout * Wout * cout_p * out_bytes))

    return pl.pallas_call(
        kernel,
        out_shape=jax.ShapeDtypeStruct((N, Hout, Wout, cout_p), out_dtype),
        grid_spec=pltpu.PrefetchScalarGridSpec(
            num_scalar_prefetch=0,
            grid=(N, nb),
            in_specs=[
                # image stays resident across the band axis
                pl.BlockSpec((None, H, W, Cin), lambda n, b: (n, 0, 0, 0)),
                pl.BlockSpec((KH * KW, Cin, cout_p), lambda n, b: (0, 0, 0)),
                pl.BlockSpec((1, cout_p), lambda n, b: (0, 0)),
            ],
            out_specs=pl.BlockSpec((None, band, Wout, cout_p),
                                   lambda n, b: (n, b, 0, 0)),
            scratch_shapes=[
                pltpu.VMEM((band + KH - 1, W + 2 * PW, Cin), jnp.bfloat16),
            ],
        ),
        compiler_params=pltpu.CompilerParams(
            dimension_semantics=("parallel", "parallel"),
            vmem_limit_bytes=vmem_limit),
        cost_estimate=cost,
    )(x_nhwc, w_folded, b_folded)


# --------------------------------------------------------------------------
# Host-side BN folding (+ conditional lane padding) into bf16 per-tap weights
# --------------------------------------------------------------------------
def fold_bn_into_conv(w_oihw, gamma, beta, running_mean, running_var,
                      eps=1e-5):
    """Returns:
       w_folded: (KH*KW, Cin, Cout_pad) bf16, BN scale folded in
       b_folded: (1, Cout_pad) f32, BN shift"""
    cout, cin, kh, kw = w_oihw.shape
    scale = gamma / jnp.sqrt(running_var + eps)                  # (Cout,)
    w_hwio = jnp.transpose(w_oihw, (2, 3, 1, 0))                 # (KH,KW,Cin,Cout)
    w_fold = (w_hwio * scale).reshape(kh * kw, cin, cout)        # fold in f32
    b_fold = (beta - running_mean * scale).reshape(1, cout)

    cout_p = _pick_cout_pad(cout)
    if cout_p != cout:
        w_fold = jnp.pad(w_fold, ((0, 0), (0, 0), (0, cout_p - cout)))
        b_fold = jnp.pad(b_fold, ((0, 0), (0, cout_p - cout)))
    return w_fold.astype(jnp.bfloat16), b_fold.astype(jnp.float32)


# --------------------------------------------------------------------------
# Module: parameters + forward (NCHW interface, matching the PyTorch module)
# --------------------------------------------------------------------------
def init_cblr_params(key, in_channels, out_channels, kernel_size=(3, 3),
                     dtype=jnp.float32):
    kh, kw = kernel_size
    kw_, kg_, kb_, km_, kv_ = jax.random.split(key, 5)
    return {
        "w": jax.random.normal(kw_, (out_channels, in_channels, kh, kw),
                               dtype) * 0.1,
        "gamma": 1.0 + 0.1 * jax.random.normal(kg_, (out_channels,), dtype),
        "beta": 0.05 * jax.random.normal(kb_, (out_channels,), dtype),
        "running_mean": 0.1 * jax.random.normal(km_, (out_channels,), dtype),
        "running_var": 0.5 + jax.random.uniform(kv_, (out_channels,), dtype),
    }


def cblr_block(x_nchw, params, *, kernel_size=(3, 3), padding=(1, 1),
               eps=1e-5, band=None):
    """Forward of CBLR_block: conv(bias=False) -> BN(eval) -> LeakyReLU(0.2).
       x_nchw: (N, Cin, H, W).  The boundary transposes exist only to match
       the PyTorch NCHW interface; NHWC networks should call
       conv_bn_lrelu_nhwc directly."""
    w_fold, b_fold = fold_bn_into_conv(
        params["w"], params["gamma"], params["beta"],
        params["running_mean"], params["running_var"], eps=eps)
    # bf16 activation DMA into the kernel (cast fuses with the transpose).
    x = jnp.transpose(x_nchw, (0, 2, 3, 1)).astype(jnp.bfloat16)
    y = conv_bn_lrelu_nhwc(x, w_fold, b_fold,
                           kernel_size=kernel_size, padding=padding,
                           out_dtype=x_nchw.dtype, band=band)
    cout = params["w"].shape[0]
    return jnp.transpose(y[..., :cout], (0, 3, 1, 2))            # -> NCHW


# --------------------------------------------------------------------------
# Pure-JAX reference (unfused, f32) for the in-script sanity check
# --------------------------------------------------------------------------
def cblr_ref(x_nchw, params, *, padding=(1, 1), eps=1e-5):
    y = jax.lax.conv_general_dilated(
        x_nchw, params["w"], window_strides=(1, 1),
        padding=((padding[0], padding[0]), (padding[1], padding[1])),
        dimension_numbers=("NCHW", "OIHW", "NCHW"))
    scale = (params["gamma"] / jnp.sqrt(params["running_var"] + eps)
             ).reshape(1, -1, 1, 1)
    y = (y - params["running_mean"].reshape(1, -1, 1, 1)) * scale \
        + params["beta"].reshape(1, -1, 1, 1)
    return jnp.where(y >= 0, y, 0.2 * y)


# --------------------------------------------------------------------------
if __name__ == "__main__":
    N, CIN, COUT, H, W = 2, 4, 8, 16, 16

    key = jax.random.PRNGKey(0)
    key, kx = jax.random.split(key)
    x = jax.random.normal(kx, (N, CIN, H, W), jnp.float32)
    params = init_cblr_params(key, CIN, COUT)

    ref = jax.block_until_ready(cblr_ref(x, params))

    # band=None -> auto (single band here); band=4 exercises the
    # first / middle / last halo branches of the banded path.
    for band in (None, 4):
        out = jax.block_until_ready(cblr_block(x, params, band=band))
        assert out.shape == (N, COUT, H, W)
        # bf16 MXU inputs -> loose (relative-to-max) tolerance.
        rel_err = jnp.max(jnp.abs(out - ref)) / (jnp.max(jnp.abs(ref)) + 1e-6)
        assert rel_err < 5e-2, f"band={band} rel_err={rel_err}"

    print("KERNEL_OK")
</pallas_src>

<mosaic_0001>
module attributes {stable_mosaic.version = 11 : i64} {
  func.func @_cblr_kernel(%arg0: i32, %arg1: i32, %arg2: memref<1x16x16x4xbf16, #tpu.memory_space<vmem>>, %arg3: memref<9x4x8xbf16, #tpu.memory_space<vmem>>, %arg4: memref<1x8xf32, #tpu.memory_space<vmem>>, %arg5: memref<1x16x16x8xf32, #tpu.memory_space<vmem>>, %arg6: memref<18x18x4xbf16, #tpu.memory_space<vmem>>) attributes {dimension_semantics = [#tpu.dimension_semantics<parallel>, #tpu.dimension_semantics<parallel>], iteration_bounds = array<i64: 2, 1>, scalar_prefetch = 0 : i64, scratch_operands = 1 : i64, tpu.core_type = #tpu.core_type<tc>, window_params = [{transform_indices = @transform_0, window_bounds = array<i64: 1, 16, 16, 4>}, {pipeline_mode = #tpu.pipeline_mode<synchronous>, transform_indices = @transform_1, window_bounds = array<i64: 9, 4, 8>}, {pipeline_mode = #tpu.pipeline_mode<synchronous>, transform_indices = @transform_2, window_bounds = array<i64: 1, 8>}, {transform_indices = @transform_3, window_bounds = array<i64: 1, 16, 16, 8>}]} {
    %c16_i32 = arith.constant 16 : i32
    %0 = arith.muli %arg1, %c16_i32 : i32
    %cst = arith.constant 0.000000e+00 : bf16
    %1 = vector.broadcast %cst : bf16 to vector<18x1x4xbf16>
    %c0 = arith.constant 0 : index
    %c0_0 = arith.constant 0 : index
    %c0_1 = arith.constant 0 : index
    %2 = vector.load %arg6[%c0, %c0_0, %c0_1] : memref<18x18x4xbf16, #tpu.memory_space<vmem>>, vector<18x1x4xbf16>
    tpu.vector_store %arg6[%c0, %c0_0, %c0_1], %1 {strides = array<i32>} : memref<18x18x4xbf16, #tpu.memory_space<vmem>>, vector<18x1x4xbf16>,
    %cst_2 = arith.constant 0.000000e+00 : bf16
    %3 = vector.broadcast %cst_2 : bf16 to vector<18x1x4xbf16>
    %c0_3 = arith.constant 0 : index
    %c17 = arith.constant 17 : index
    %c0_4 = arith.constant 0 : index
    %4 = vector.load %arg6[%c0_3, %c17, %c0_4] : memref<18x18x4xbf16, #tpu.memory_space<vmem>>, vector<18x1x4xbf16>
    tpu.vector_store %arg6[%c0_3, %c17, %c0_4], %3 {strides = array<i32>} : memref<18x18x4xbf16, #tpu.memory_space<vmem>>, vector<18x1x4xbf16>,
    %c0_5 = arith.constant 0 : index
    %5 = arith.index_cast %0 : i32 to index
    %c0_6 = arith.constant 0 : index
    %c0_7 = arith.constant 0 : index
    %6 = vector.load %arg2[%c0_5, %5, %c0_6, %c0_7] : memref<1x16x16x4xbf16, #tpu.memory_space<vmem>>, vector<1x16x16x4xbf16>
    %7 = vector.shape_cast %6 : vector<1x16x16x4xbf16> to vector<16x16x4xbf16>
    %c1 = arith.constant 1 : index
    %c1_8 = arith.constant 1 : index
    %c0_9 = arith.constant 0 : index
    %8 = vector.load %arg6[%c1, %c1_8, %c0_9] : memref<18x18x4xbf16, #tpu.memory_space<vmem>>, vector<16x16x4xbf16>
    tpu.vector_store %arg6[%c1, %c1_8, %c0_9], %7 {strides = array<i32>} : memref<18x18x4xbf16, #tpu.memory_space<vmem>>, vector<16x16x4xbf16>,
    %c0_i32 = arith.constant 0 : i32
    %9 = arith.cmpi eq, %arg1, %c0_i32 : i32
    %c0_i32_10 = arith.constant 0 : i32
    %10 = arith.cmpi eq, %arg1, %c0_i32_10 : i32
    %11 = arith.extui %9 : i1 to i32
    %c0_i32_11 = arith.constant 0 : i32
    %12 = arith.cmpi ne, %11, %c0_i32_11 : i32
    scf.if %12 {
      %cst_80 = arith.constant 0.000000e+00 : bf16
      %86 = vector.broadcast %cst_80 : bf16 to vector<1x16x4xbf16>
      %c0_81 = arith.constant 0 : index
      %c1_82 = arith.constant 1 : index
      %c0_83 = arith.constant 0 : index
      %87 = vector.load %arg6[%c0_81, %c1_82, %c0_83] : memref<18x18x4xbf16, #tpu.memory_space<vmem>>, vector<1x16x4xbf16>
      tpu.vector_store %arg6[%c0_81, %c1_82, %c0_83], %86 {strides = array<i32>} : memref<18x18x4xbf16, #tpu.memory_space<vmem>>, vector<1x16x4xbf16>,
    } else {
    }
    %true = arith.constant true
    %13 = arith.xori %9, %true : i1
    %14 = arith.extui %13 : i1 to i32
    %c0_i32_12 = arith.constant 0 : i32
    %15 = arith.cmpi ne, %14, %c0_i32_12 : i32
    scf.if %15 {
      %c1_i32 = arith.constant 1 : i32
      %86 = arith.subi %0, %c1_i32 : i32
      %c0_80 = arith.constant 0 : index
      %87 = arith.index_cast %86 : i32 to index
      %c0_81 = arith.constant 0 : index
      %c0_82 = arith.constant 0 : index
      %88 = vector.load %arg2[%c0_80, %87, %c0_81, %c0_82] : memref<1x16x16x4xbf16, #tpu.memory_space<vmem>>, vector<1x1x16x4xbf16>
      %89 = vector.shape_cast %88 : vector<1x1x16x4xbf16> to vector<1x16x4xbf16>
      %c0_83 = arith.constant 0 : index
      %c1_84 = arith.constant 1 : index
      %c0_85 = arith.constant 0 : index
      %90 = vector.load %arg6[%c0_83, %c1_84, %c0_85] : memref<18x18x4xbf16, #tpu.memory_space<vmem>>, vector<1x16x4xbf16>
      tpu.vector_store %arg6[%c0_83, %c1_84, %c0_85], %89 {strides = array<i32>} : memref<18x18x4xbf16, #tpu.memory_space<vmem>>, vector<1x16x4xbf16>,
    } else {
    }
    %16 = arith.extui %10 : i1 to i32
    %c0_i32_13 = arith.constant 0 : i32
    %17 = arith.cmpi ne, %16, %c0_i32_13 : i32
    scf.if %17 {
      %cst_80 = arith.constant 0.000000e+00 : bf16
      %86 = vector.broadcast %cst_80 : bf16 to vector<1x16x4xbf16>
      %c17_81 = arith.constant 17 : index
      %c1_82 = arith.constant 1 : index
      %c0_83 = arith.constant 0 : index
      %87 = vector.load %arg6[%c17_81, %c1_82, %c0_83] : memref<18x18x4xbf16, #tpu.memory_space<vmem>>, vector<1x16x4xbf16>
      tpu.vector_store %arg6[%c17_81, %c1_82, %c0_83], %86 {strides = array<i32>} : memref<18x18x4xbf16, #tpu.memory_space<vmem>>, vector<1x16x4xbf16>,
    } else {
    }
    %true_14 = arith.constant true
    %18 = arith.xori %10, %true_14 : i1
    %19 = arith.extui %18 : i1 to i32
    %c0_i32_15 = arith.constant 0 : i32
    %20 = arith.cmpi ne, %19, %c0_i32_15 : i32
    scf.if %20 {
      %c16_i32_80 = arith.constant 16 : i32
      %86 = arith.addi %0, %c16_i32_80 : i32
      %c0_81 = arith.constant 0 : index
      %87 = arith.index_cast %86 : i32 to index
      %c0_82 = arith.constant 0 : index
      %c0_83 = arith.constant 0 : index
      %88 = vector.load %arg2[%c0_81, %87, %c0_82, %c0_83] : memref<1x16x16x4xbf16, #tpu.memory_space<vmem>>, vector<1x1x16x4xbf16>
      %89 = vector.shape_cast %88 : vector<1x1x16x4xbf16> to vector<1x16x4xbf16>
      %c17_84 = arith.constant 17 : index
      %c1_85 = arith.constant 1 : index
      %c0_86 = arith.constant 0 : index
      %90 = vector.load %arg6[%c17_84, %c1_85, %c0_86] : memref<18x18x4xbf16, #tpu.memory_space<vmem>>, vector<1x16x4xbf16>
      tpu.vector_store %arg6[%c17_84, %c1_85, %c0_86], %89 {strides = array<i32>} : memref<18x18x4xbf16, #tpu.memory_space<vmem>>, vector<1x16x4xbf16>,
    } else {
    }
    %c0_16 = arith.constant 0 : index
    %c0_17 = arith.constant 0 : index
    %c0_18 = arith.constant 0 : index
    %21 = vector.load %arg6[%c0_16, %c0_17, %c0_18] : memref<18x18x4xbf16, #tpu.memory_space<vmem>>, vector<16x16x4xbf16>
    %22 = vector.shape_cast %21 : vector<16x16x4xbf16> to vector<256x4xbf16>
    %c0_19 = arith.constant 0 : index
    %c0_20 = arith.constant 0 : index
    %c0_21 = arith.constant 0 : index
    %23 = vector.load %arg3[%c0_19, %c0_20, %c0_21] : memref<9x4x8xbf16, #tpu.memory_space<vmem>>, vector<1x4x8xbf16>
    %24 = vector.shape_cast %23 : vector<1x4x8xbf16> to vector<4x8xbf16>
    %cst_22 = arith.constant dense<0.000000e+00> : vector<256x8xf32>
    %25 = tpu.matmul %22, %24, %cst_22 {dimension_numbers = #tpu.dot_dimension_numbers<[1], [0], [0], [1], [0, 0, 1, 1], [], []>} : vector<256x4xbf16>, vector<4x8xbf16>, vector<256x8xf32> -> vector<256x8xf32>
    %c0_23 = arith.constant 0 : index
    %c1_24 = arith.constant 1 : index
    %c0_25 = arith.constant 0 : index
    %26 = vector.load %arg6[%c0_23, %c1_24, %c0_25] : memref<18x18x4xbf16, #tpu.memory_space<vmem>>, vector<16x16x4xbf16>
    %27 = vector.shape_cast %26 : vector<16x16x4xbf16> to vector<256x4xbf16>
    %c1_26 = arith.constant 1 : index
    %c0_27 = arith.constant 0 : index
    %c0_28 = arith.constant 0 : index
    %28 = vector.load %arg3[%c1_26, %c0_27, %c0_28] : memref<9x4x8xbf16, #tpu.memory_space<vmem>>, vector<1x4x8xbf16>
    %29 = vector.shape_cast %28 : vector<1x4x8xbf16> to vector<4x8xbf16>
    %cst_29 = arith.constant dense<0.000000e+00> : vector<256x8xf32>
    %30 = tpu.matmul %27, %29, %cst_29 {dimension_numbers = #tpu.dot_dimension_numbers<[1], [0], [0], [1], [0, 0, 1, 1], [], []>} : vector<256x4xbf16>, vector<4x8xbf16>, vector<256x8xf32> -> vector<256x8xf32>
    %31 = arith.addf %25, %30 : vector<256x8xf32>
    %c0_30 = arith.constant 0 : index
    %c2 = arith.constant 2 : index
    %c0_31 = arith.constant 0 : index
    %32 = vector.load %arg6[%c0_30, %c2, %c0_31] : memref<18x18x4xbf16, #tpu.memory_space<vmem>>, vector<16x16x4xbf16>
    %33 = vector.shape_cast %32 : vector<16x16x4xbf16> to vector<256x4xbf16>
    %c2_32 = arith.constant 2 : index
    %c0_33 = arith.constant 0 : index
    %c0_34 = arith.constant 0 : index
    %34 = vector.load %arg3[%c2_32, %c0_33, %c0_34] : memref<9x4x8xbf16, #tpu.memory_space<vmem>>, vector<1x4x8xbf16>
    %35 = vector.shape_cast %34 : vector<1x4x8xbf16> to vector<4x8xbf16>
    %cst_35 = arith.constant dense<0.000000e+00> : vector<256x8xf32>
    %36 = tpu.matmul %33, %35, %cst_35 {dimension_numbers = #tpu.dot_dimension_numbers<[1], [0], [0], [1], [0, 0, 1, 1], [], []>} : vector<256x4xbf16>, vector<4x8xbf16>, vector<256x8xf32> -> vector<256x8xf32>
    %37 = arith.addf %31, %36 : vector<256x8xf32>
    %c1_36 = arith.constant 1 : index
    %c0_37 = arith.constant 0 : index
    %c0_38 = arith.constant 0 : index
    %38 = vector.load %arg6[%c1_36, %c0_37, %c0_38] : memref<18x18x4xbf16, #tpu.memory_space<vmem>>, vector<16x16x4xbf16>
    %39 = vector.shape_cast %38 : vector<16x16x4xbf16> to vector<256x4xbf16>
    %c3 = arith.constant 3 : index
    %c0_39 = arith.constant 0 : index
    %c0_40 = arith.constant 0 : index
    %40 = vector.load %arg3[%c3, %c0_39, %c0_40] : memref<9x4x8xbf16, #tpu.memory_space<vmem>>, vector<1x4x8xbf16>
    %41 = vector.shape_cast %40 : vector<1x4x8xbf16> to vector<4x8xbf16>
    %cst_41 = arith.constant dense<0.000000e+00> : vector<256x8xf32>
    %42 = tpu.matmul %39, %41, %cst_41 {dimension_numbers = #tpu.dot_dimension_numbers<[1], [0], [0], [1], [0, 0, 1, 1], [], []>} : vector<256x4xbf16>, vector<4x8xbf16>, vector<256x8xf32> -> vector<256x8xf32>
    %43 = arith.addf %37, %42 : vector<256x8xf32>
    %c1_42 = arith.constant 1 : index
    %c1_43 = arith.constant 1 : index
    %c0_44 = arith.constant 0 : index
    %44 = vector.load %arg6[%c1_42, %c1_43, %c0_44] : memref<18x18x4xbf16, #tpu.memory_space<vmem>>, vector<16x16x4xbf16>
    %45 = vector.shape_cast %44 : vector<16x16x4xbf16> to vector<256x4xbf16>
    %c4 = arith.constant 4 : index
    %c0_45 = arith.constant 0 : index
    %c0_46 = arith.constant 0 : index
    %46 = vector.load %arg3[%c4, %c0_45, %c0_46] : memref<9x4x8xbf16, #tpu.memory_space<vmem>>, vector<1x4x8xbf16>
    %47 = vector.shape_cast %46 : vector<1x4x8xbf16> to vector<4x8xbf16>
    %cst_47 = arith.constant dense<0.000000e+00> : vector<256x8xf32>
    %48 = tpu.matmul %45, %47, %cst_47 {dimension_numbers = #tpu.dot_dimension_numbers<[1], [0], [0], [1], [0, 0, 1, 1], [], []>} : vector<256x4xbf16>, vector<4x8xbf16>, vector<256x8xf32> -> vector<256x8xf32>
    %49 = arith.addf %43, %48 : vector<256x8xf32>
    %c1_48 = arith.constant 1 : index
    %c2_49 = arith.constant 2 : index
    %c0_50 = arith.constant 0 : index
    %50 = vector.load %arg6[%c1_48, %c2_49, %c0_50] : memref<18x18x4xbf16, #tpu.memory_space<vmem>>, vector<16x16x4xbf16>
    %51 = vector.shape_cast %50 : vector<16x16x4xbf16> to vector<256x4xbf16>
    %c5 = arith.constant 5 : index
    %c0_51 = arith.constant 0 : index
    %c0_52 = arith.constant 0 : index
    %52 = vector.load %arg3[%c5, %c0_51, %c0_52] : memref<9x4x8xbf16, #tpu.memory_space<vmem>>, vector<1x4x8xbf16>
    %53 = vector.shape_cast %52 : vector<1x4x8xbf16> to vector<4x8xbf16>
    %cst_53 = arith.constant dense<0.000000e+00> : vector<256x8xf32>
    %54 = tpu.matmul %51, %53, %cst_53 {dimension_numbers = #tpu.dot_dimension_numbers<[1], [0], [0], [1], [0, 0, 1, 1], [], []>} : vector<256x4xbf16>, vector<4x8xbf16>, vector<256x8xf32> -> vector<256x8xf32>
    %55 = arith.addf %49, %54 : vector<256x8xf32>
    %c2_54 = arith.constant 2 : index
    %c0_55 = arith.constant 0 : index
    %c0_56 = arith.constant 0 : index
    %56 = vector.load %arg6[%c2_54, %c0_55, %c0_56] : memref<18x18x4xbf16, #tpu.memory_space<vmem>>, vector<16x16x4xbf16>
    %57 = vector.shape_cast %56 : vector<16x16x4xbf16> to vector<256x4xbf16>
    %c6 = arith.constant 6 : index
    %c0_57 = arith.constant 0 : index
    %c0_58 = arith.constant 0 : index
    %58 = vector.load %arg3[%c6, %c0_57, %c0_58] : memref<9x4x8xbf16, #tpu.memory_space<vmem>>, vector<1x4x8xbf16>
    %59 = vector.shape_cast %58 : vector<1x4x8xbf16> to vector<4x8xbf16>
    %cst_59 = arith.constant dense<0.000000e+00> : vector<256x8xf32>
    %60 = tpu.matmul %57, %59, %cst_59 {dimension_numbers = #tpu.dot_dimension_numbers<[1], [0], [0], [1], [0, 0, 1, 1], [], []>} : vector<256x4xbf16>, vector<4x8xbf16>, vector<256x8xf32> -> vector<256x8xf32>
    %61 = arith.addf %55, %60 : vector<256x8xf32>
    %c2_60 = arith.constant 2 : index
    %c1_61 = arith.constant 1 : index
    %c0_62 = arith.constant 0 : index
    %62 = vector.load %arg6[%c2_60, %c1_61, %c0_62] : memref<18x18x4xbf16, #tpu.memory_space<vmem>>, vector<16x16x4xbf16>
    %63 = vector.shape_cast %62 : vector<16x16x4xbf16> to vector<256x4xbf16>
    %c7 = arith.constant 7 : index
    %c0_63 = arith.constant 0 : index
    %c0_64 = arith.constant 0 : index
    %64 = vector.load %arg3[%c7, %c0_63, %c0_64] : memref<9x4x8xbf16, #tpu.memory_space<vmem>>, vector<1x4x8xbf16>
    %65 = vector.shape_cast %64 : vector<1x4x8xbf16> to vector<4x8xbf16>
    %cst_65 = arith.constant dense<0.000000e+00> : vector<256x8xf32>
    %66 = tpu.matmul %63, %65, %cst_65 {dimension_numbers = #tpu.dot_dimension_numbers<[1], [0], [0], [1], [0, 0, 1, 1], [], []>} : vector<256x4xbf16>, vector<4x8xbf16>, vector<256x8xf32> -> vector<256x8xf32>
    %67 = arith.addf %61, %66 : vector<256x8xf32>
    %c2_66 = arith.constant 2 : index
    %c2_67 = arith.constant 2 : index
    %c0_68 = arith.constant 0 : index
    %68 = vector.load %arg6[%c2_66, %c2_67, %c0_68] : memref<18x18x4xbf16, #tpu.memory_space<vmem>>, vector<16x16x4xbf16>
    %69 = vector.shape_cast %68 : vector<16x16x4xbf16> to vector<256x4xbf16>
    %c8 = arith.constant 8 : index
    %c0_69 = arith.constant 0 : index
    %c0_70 = arith.constant 0 : index
    %70 = vector.load %arg3[%c8, %c0_69, %c0_70] : memref<9x4x8xbf16, #tpu.memory_space<vmem>>, vector<1x4x8xbf16>
    %71 = vector.shape_cast %70 : vector<1x4x8xbf16> to vector<4x8xbf16>
    %cst_71 = arith.constant dense<0.000000e+00> : vector<256x8xf32>
    %72 = tpu.matmul %69, %71, %cst_71 {dimension_numbers = #tpu.dot_dimension_numbers<[1], [0], [0], [1], [0, 0, 1, 1], [], []>} : vector<256x4xbf16>, vector<4x8xbf16>, vector<256x8xf32> -> vector<256x8xf32>
    %73 = arith.addf %67, %72 : vector<256x8xf32>
    %c0_72 = arith.constant 0 : index
    %c0_73 = arith.constant 0 : index
    %74 = vector.load %arg4[%c0_72, %c0_73] : memref<1x8xf32, #tpu.memory_space<vmem>>, vector<1x8xf32>
    %75 = vector.broadcast %74 : vector<1x8xf32> to vector<256x8xf32>
    %76 = arith.addf %73, %75 : vector<256x8xf32>
    %cst_74 = arith.constant 0.000000e+00 : f32
    %77 = vector.broadcast %cst_74 : f32 to vector<256x8xf32>
    %78 = arith.cmpf oge, %76, %77 : vector<256x8xf32>
    %cst_75 = arith.constant 2.000000e-01 : f32
    %79 = vector.broadcast %cst_75 : f32 to vector<256x8xf32>
    %80 = arith.mulf %79, %76 : vector<256x8xf32>
    %81 = arith.select %78, %76, %80 : vector<256x8xi1>, vector<256x8xf32>
    %82 = vector.shape_cast %81 : vector<256x8xf32> to vector<16x16x8xf32>
    %c0_76 = arith.constant 0 : index
    %c0_77 = arith.constant 0 : index
    %c0_78 = arith.constant 0 : index
    %c0_79 = arith.constant 0 : index
    %83 = vector.load %arg5[%c0_76, %c0_77, %c0_78, %c0_79] : memref<1x16x16x8xf32, #tpu.memory_space<vmem>>, vector<1x16x16x8xf32>
    %84 = vector.shape_cast %83 : vector<1x16x16x8xf32> to vector<16x16x8xf32>
    %85 = vector.shape_cast %82 : vector<16x16x8xf32> to vector<1x16x16x8xf32>
    tpu.vector_store %arg5[%c0_76, %c0_77, %c0_78, %c0_79], %85 {strides = array<i32>} : memref<1x16x16x8xf32, #tpu.memory_space<vmem>>, vector<1x16x16x8xf32>,
    return
  }
  func.func @transform_0(%arg0: i32, %arg1: i32) -> (i32, i32, i32, i32) {
    %c0_i32 = arith.constant 0 : i32
    %c0_i32_0 = arith.constant 0 : i32
    %c0_i32_1 = arith.constant 0 : i32
    %c0_i32_2 = arith.constant 0 : i32
    return %arg0, %c0_i32, %c0_i32_0, %c0_i32_1 : i32, i32, i32, i32
  }
  func.func @transform_1(%arg0: i32, %arg1: i32) -> (i32, i32, i32) {
    %c0_i32 = arith.constant 0 : i32
    %c0_i32_0 = arith.constant 0 : i32
    %c0_i32_1 = arith.constant 0 : i32
    %c0_i32_2 = arith.constant 0 : i32
    return %c0_i32, %c0_i32_0, %c0_i32_1 : i32, i32, i32
  }
  func.func @transform_2(%arg0: i32, %arg1: i32) -> (i32, i32) {
    %c0_i32 = arith.constant 0 : i32
    %c0_i32_0 = arith.constant 0 : i32
    %c0_i32_1 = arith.constant 0 : i32
    return %c0_i32, %c0_i32_0 : i32, i32
  }
  func.func @transform_3(%arg0: i32, %arg1: i32) -> (i32, i32, i32, i32) {
    %c0_i32 = arith.constant 0 : i32
    %c0_i32_0 = arith.constant 0 : i32
    %c0_i32_1 = arith.constant 0 : i32
    return %arg0, %arg1, %c0_i32, %c0_i32_0 : i32, i32, i32, i32
  }
}

</mosaic_0001>

<bundles_post_ra>
// kernel: tpu_custom_call.1
= control target key start
LH: loop header
LB: loop body
LE: loop exit
PB: predicated region body
PF: predicated region fallthrough
CT: control target
= control target key end

     0   :  { %s6951_s12 = smov 0   ;;  %s6953_s13 = smov 0   ;;  %s8881_s0 = inlined_call_operand.vmem [shape: bf16[2,16,16,4], index: 0, kind: input, shape index: {}]   ;;  %s8882_s1 = inlined_call_operand.vmem [shape: bf16[9,4,8], index: 1, kind: input, shape index: {}]   ;;  %s8883_s2 = inlined_call_operand.vmem [shape: f32[1,8], index: 2, kind: input, shape index: {}]   ;;  %s8884_s3 = inlined_call_operand.vmem [shape: f32[2,16,16,8], index: 3, kind: output, shape index: {}]  }
   0x1   :  { %s6955_s14 = smov 0  }
   0x2 LB: > { %s25_s15 = sadd.s32 1, %s6924_s13  ;;  %p5705_p0 = scmp.ge.s32.totalorder %s6928_s14, 1  ;;  %s6928_s14 = sphi %s6955_s14, %s13_s14   ;;  %s6924_s13 = sphi %s6953_s13, %s8985_s13   ;;  %s6920_s12 = sphi %s6951_s12, %s8984_s12  }
   0x3   : > { %p27_p1 = scmp.ge.s32.totalorder %s25_s15, 2  ;;  %p151_p2 = scmp.lt.s32.totalorder %s6928_s14, 3 }
   0x5   : > { %s8987_s15 = smov (%p27_p1, %s25_s15), 0  ;;  %p152_p3 = pnand %p5705_p0, %p151_p2 }
   0x7   : > { %155 = sbr.rel (%p152_p3) target bundleno = 668 (0x29c), region = 32 }
   0xe   : > { %v5714_v0 = vld [vmem:[%s8882_s1 + $0x2] sm:$0x3]  ;;  %vm1415_vm0 = vcmask 1041408   ;;  %v5861_v1 = vld [vmem:[%s8882_s1 + $0x8] sm:$0x3]  ;;  %vm198_vm1 = vcmask 24576  }
   0xf   : > { %6780 = vmatprep.subr.msk.bf16.mxu1 %vm1415_vm0, %v5714_v0  ;;  %6784 = vmatprep.subr.msk.bf16.mxu0 %vm1415_vm0, %v5861_v1  ;;  %v1417_v2 = vsel %vm1415_vm0, %v5714_v0, 0  ;;  %v6981_v3 = vsel %vm1415_vm0, %v5861_v1, 0  ;;  %vm199_vm2 = vsmask.f32 256  ;;  %v201_v4 = vld [vmem:[#allocation2] sm:$0x1] }
  0x10   : > { %8905 = vst [vmem:[#allocation3_spill] sm:$0xff] %v6981_v3  ;;  %6217 = vmatpush3.bf16.msra.mxu1 %v1417_v2  ;;  %6353 = vmatpush3.bf16.msra.mxu0 %v6981_v3  ;;  %vm6985_vm3 = vmand %vm198_vm1, %vm199_vm2  ;;  %vm255_vm4 = vsmask.f32 7938  ;;  %v257_v6 = vld [vmem:[#allocation2 + $0x8] sm:$0x1]  ;;  %vm669_vm5 = vcmask 27648  }
  0x11   : > { %v202_v7 = vsel %vm6985_vm3, 0, %v201_v4  ;;  %vm6992_vm6 = vmand %vm198_vm1, %vm255_vm4  ;;  %v6930_v9 = vmov 0   ;;  %p180_p4 = scmp.lt.s32.totalorder %s6920_s12, 1  ;;  %v204_v11 = vld [vmem:[#allocation2 + $0xc] sm:$0x1]  ;;  %vm1366_vm12 = vcmask 31744  }
  0x12   : > { %791 = vst.msk [vmem:[#allocation2 + $0x4] sm:$0xf] %vm669_vm5, %v6930_v9  ;;  %839 = vst.msk [vmem:[#allocation2 + $0xd0] sm:$0xf] %vm669_vm5, %v6930_v9  ;;  %v258_v10 = vsel %vm6992_vm6, 0, %v257_v6  ;;  %v205_v13 = vsel %vm6985_vm3, 0, %v204_v11 }
  0x13   : > { %203 = vst [vmem:[#allocation2] sm:$0x1] %v202_v7  ;;  %v260_v12 = vld [vmem:[#allocation2 + $0x14] sm:$0x1]  ;;  %259 = vst [vmem:[#allocation2 + $0x8] sm:$0x1] %v258_v10 }
  0x14   : > { %v261_v14 = vsel %vm6992_vm6, 0, %v260_v12  ;;  %vm346_vm7 = vsmask.f32 4368  ;;  %v7008_v15 = vld [vmem:[%s8882_s1] sm:$0x3]  ;;  %s8989_s12 = smov (!%p180_p4, %s6920_s12), 1  ;;  %vm7031_vm8 = vmand %vm669_vm5, %vm255_vm4 }
  0x15   : > { %206 = vst [vmem:[#allocation2 + $0xc] sm:$0x1] %v205_v13  ;;  %262 = vst [vmem:[#allocation2 + $0x14] sm:$0x1] %v261_v14  ;;  %6781 = vmatprep.subr.msk.bf16.mxu1 %vm1415_vm0, %v7008_v15  ;;  %v7018_v16 = vld [vmem:[%s8882_s1 + $0xa] sm:$0x3] }
  0x16   : > { %v207_v17 = vld [vmem:[#allocation2 + $0x18] sm:$0x1]  ;;  %6786 = vmatprep.subr.msk.bf16.mxu0 %vm1415_vm0, %v7018_v16  ;;  %v263_v19 = vld [vmem:[#allocation2 + $0x20] sm:$0x1]  ;;  %v210_v20 = vld [vmem:[#allocation2 + $0x24] sm:$0x1] }
  0x17   : > { %v208_v18 = vsel %vm6985_vm3, 0, %v207_v17  ;;  %s6061_s24 = sshll.u32 %s8989_s12, 7  ;;  %v264_v21 = vsel %vm6992_vm6, 0, %v263_v19  ;;  %v211_v22 = vsel %vm6985_vm3, 0, %v210_v20  ;;  %v266_v23 = vld [vmem:[#allocation2 + $0x2c] sm:$0x1]  ;;  %vm7057_vm11 = vmor %vm199_vm2, %vm346_vm7 }
  0x18   : > { %209 = vst [vmem:[#allocation2 + $0x18] sm:$0x1] %v208_v18  ;;  %s7038_s27 = scalar_lea.vmem %s8881_s0, %s6061_s24  ;;  %265 = vst [vmem:[#allocation2 + $0x20] sm:$0x1] %v264_v21  ;;  %v267_v25 = vsel %vm6992_vm6, 0, %v266_v23  ;;  %vm1920_vm14 = vcmask 1042432  }
  0x19   : > { %212 = vst [vmem:[#allocation2 + $0x24] sm:$0x1] %v211_v22  ;;  %v213_v26 = vld [vmem:[#allocation2 + $0x30] sm:$0x1]  ;;  %v269_v27 = vld [vmem:[#allocation2 + $0x38] sm:$0x1] }
  0x1a   : > { %v881_v28 = vld [vmem:[#allocation2 + $0x4] sm:$0xf]  ;;  %v314_v29 = vld [vmem:[%s7038_s27] sm:$0xf]  ;;  %268 = vst [vmem:[#allocation2 + $0x2c] sm:$0x1] %v267_v25 }
  0x1b   : > { %v315_v30 = vld [vmem:[%s7038_s27 + $0x4] sm:$0xf]  ;;  %v788_v31 = vld [vmem:[#allocation2] sm:$0xf]  ;;  %v942_v32 = vshll.u32 %v881_v28, 16  ;;  %v946_v33 = vshrl.u32 %v881_v28, 16 }
  0x1c   : > { %v349_v34 = vshrl.u32 %v314_v29, 16  ;;  %v352_v35 = vshll.u32 %v314_v29, 16  ;;  %v789_v36 = vsel %vm7031_vm8, 0, %v788_v31  ;;  %v792_v37 = vld [vmem:[#allocation2 + $0x8] sm:$0x1]  ;;  %v357_v38 = vshrl.u32 %v315_v30, 16 }
  0x1d   : > { %vm929_vm9 = vsmask.f32 3328  ;;  %vm930_vm10 = vsmask.f32 7440  ;;  %v360_v39 = vshll.u32 %v315_v30, 16  ;;  %v214_v40 = vsel %vm6985_vm3, 0, %v213_v26 }
  0x1e   : > { %790 = vst [vmem:[#allocation2] sm:$0xf] %v789_v36  ;;  %v793_v41 = vsel %vm6985_vm3, 0, %v792_v37  ;;  %v7050_v42 = vrot.slane %v942_v32, 5  ;;  %v948_v43 = vrot.slane %v946_v33, 4  ;;  %v351_v44 = vrot.slane %v349_v34, 7  ;;  %vm7085_vm13 = vmor %vm929_vm9, %vm930_vm10 }
  0x1f   : > { %215 = vst [vmem:[#allocation2 + $0x30] sm:$0x1] %v214_v40  ;;  %794 = vst [vmem:[#allocation2 + $0x8] sm:$0x1] %v793_v41  ;;  %v359_v45 = vrot.slane %v357_v38, 7  ;;  %v270_v48 = vsel %vm6992_vm6, 0, %v269_v27 }
  0x20   : > { %v671_v46 = vld [vmem:[#allocation2 + $0xc] sm:$0xf]  ;;  %v316_v47 = vld [vmem:[%s7038_s27 + $0x8] sm:$0xf]  ;;  %v354_v50 = vor.u32 %v352_v35, %v351_v44  ;;  %v355_v51 = vrot.slane %v351_v44, 4  ;;  %v949_v59 = vor.u32 %v948_v43, %v7050_v42  ;;  %v7096_v40 = vsel %vm1415_vm0, %v7018_v16, 0 }
  0x21   : > { %v676_v52 = vld [vmem:[#allocation2 + $0x14] sm:$0x1]  ;;  %v317_v53 = vld [vmem:[%s7038_s27 + $0xc] sm:$0xf]  ;;  %v366_v54 = vshrl.u32 %v316_v47, 16  ;;  %v362_v55 = vor.u32 %v360_v39, %v359_v45  ;;  %v364_v56 = vrot.slane %v359_v45, 4 }
  0x22   : > { %271 = vst [vmem:[#allocation2 + $0x38] sm:$0x1] %v270_v48  ;;  %v369_v57 = vshll.u32 %v316_v47, 16  ;;  %v374_v58 = vshrl.u32 %v317_v53, 16  ;;  %v672_v60 = vsel %vm7031_vm8, %v354_v50, %v671_v46  ;;  %v377_v62 = vshll.u32 %v317_v53, 16  ;;  %s6062_s23 = sshll.u32 %s8989_s12, 8 }
  0x23   : > { %v368_v61 = vrot.slane %v366_v54, 7  ;;  %v318_v63 = vld [vmem:[%s7038_s27 + $0x10] sm:$0xf]  ;;  %v363_v0 = vsel %vm7057_vm11, %v355_v51, %v362_v55  ;;  %673 = vst [vmem:[#allocation2 + $0xc] sm:$0xf] %v672_v60  ;;  %v677_v1 = vsel %vm6985_vm3, %v364_v56, %v676_v52  ;;  %v950_v27 = vrot.slane %v949_v59, 4  ;;  %s8768_s26 = scalar_lea.vmem %s8884_s3, %s6062_s23 }
  0x24   : > { %v376_v2 = vrot.slane %v374_v58, 7  ;;  %v679_v4 = vld [vmem:[#allocation2 + $0x18] sm:$0xf]  ;;  %v319_v6 = vld [vmem:[%s7038_s27 + $0x14] sm:$0xf]  ;;  %v383_v7 = vshrl.u32 %v318_v63, 16 }
  0x25   : > { %675 = vst.msk [vmem:[#allocation2 + $0x10] sm:$0xf] %vm669_vm5, %v363_v0  ;;  %678 = vst [vmem:[#allocation2 + $0x14] sm:$0x1] %v677_v1  ;;  %v371_v9 = vor.u32 %v369_v57, %v368_v61  ;;  %v372_v10 = vrot.slane %v368_v61, 4  ;;  %v386_v12 = vshll.u32 %v318_v63, 16 }
  0x26   : > { %v683_v11 = vld [vmem:[#allocation2 + $0x20] sm:$0x1]  ;;  %v391_v13 = vshrl.u32 %v319_v6, 16  ;;  %v379_v17 = vor.u32 %v377_v62, %v376_v2  ;;  %v381_v18 = vrot.slane %v376_v2, 4  ;;  %v385_v19 = vrot.slane %v383_v7, 7 }
  0x27   : > { %v880_v14 = vld [vmem:[#allocation2] sm:$0xf]  ;;  %v394_v20 = vshll.u32 %v319_v6, 16  ;;  %v913_v21 = vld [vmem:[#allocation2 + $0x8] sm:$0x1]  ;;  %v680_v25 = vsel %vm7031_vm8, %v371_v9, %v679_v4  ;;  %v7092_v39 = vsel %vm1415_vm0, %v7008_v15, 0 }
  0x28   : > { %v933_v22 = vshrl.u32 %v880_v14, 16  ;;  %v936_v23 = vshll.u32 %v880_v14, 16  ;;  %v7074_v26 = vrot.slane %v391_v13, 7  ;;  %v952_v28 = vshll.u32 %v913_v21, 16  ;;  %681 = vst [vmem:[#allocation2 + $0x18] sm:$0xf] %v680_v25 }
  0x29   : > { %v380_v29 = vsel %vm7057_vm11, %v372_v10, %v379_v17  ;;  %v684_v30 = vsel %vm6985_vm3, %v381_v18, %v683_v11  ;;  %v686_v31 = vld [vmem:[#allocation2 + $0x24] sm:$0xf]  ;;  %v7081_v32 = vld [vmem:[%s7038_s27 + $0x18] sm:$0xf]  ;;  %v388_v36 = vor.u32 %v386_v12, %v385_v19  ;;  %v389_v37 = vrot.slane %v385_v19, 4 }
  0x2a   : > { %v935_v34 = vrot.slane %v933_v22, 4  ;;  %v938_v35 = vrot.slane %v936_v23, 5  ;;  %682 = vst.msk [vmem:[#allocation2 + $0x1c] sm:$0xf] %vm669_vm5, %v380_v29  ;;  %685 = vst [vmem:[#allocation2 + $0x20] sm:$0x1] %v684_v30  ;;  %v396_v41 = vor.u32 %v394_v20, %v7074_v26 }
  0x2b   : > { %v954_v38 = vrot.slane %v952_v28, 5  ;;  %v7099_v44 = vld [vmem:[#allocation2 + $0xc] sm:$0xf]  ;;  %v398_v45 = vrot.slane %v7074_v26, 4  ;;  %v687_v46 = vsel %vm7031_vm8, %v388_v36, %v686_v31  ;;  %v400_v47 = vshrl.u32 %v7081_v32, 16 }
  0x2c   : > { %v939_v43 = vor.u32 %v938_v35, %v935_v34  ;;  %v7107_v48 = vld [vmem:[#allocation2 + $0x10] sm:$0xf]  ;;  %v914_v50 = vld [vmem:[#allocation2 + $0x14] sm:$0x1]  ;;  %v957_v16 = vshrl.u32 %v7099_v44, 16  ;;  %v960_v51 = vshll.u32 %v7099_v44, 16  ;;  %v397_v52 = vsel %vm7057_vm11, %v389_v37, %v396_v41 }
  0x2d   : > { %v955_v15 = vsel %vm7085_vm13, %v950_v27, %v954_v38  ;;  %688 = vst [vmem:[#allocation2 + $0x24] sm:$0xf] %v687_v46  ;;  %v966_v54 = vshll.u32 %v7107_v48, 16  ;;  %v970_v55 = vshrl.u32 %v7107_v48, 16  ;;  %v976_v56 = vshll.u32 %v914_v50, 16 }
  0x2e   : > { %v940_v53 = vrot.slane %v939_v43, 4  ;;  %v2687_v57 = vld [vmem:[#allocation2 + $0xc] sm:$0xf]  ;;  %689 = vst.msk [vmem:[#allocation2 + $0x28] sm:$0xf] %vm669_vm5, %v397_v52  ;;  %v959_v58 = vrot.slane %v957_v16, 4 }
  0x2f   : > { %v962_v59 = vrot.slane %v960_v51, 5  ;;  %v7116_v60 = vld [vmem:[#allocation2 + $0x10] sm:$0xf]  ;;  %v7118_v61 = vld [vmem:[#allocation2 + $0x14] sm:$0x1]  ;;  %v968_v63 = vrot.slane %v966_v54, 5 }
  0x30   : > { %v945_v62 = vsel %vm7085_vm13, %v940_v53, %v7050_v42  ;;  %v972_v0 = vrot.slane %v970_v55, 4  ;;  %v978_v1 = vrot.slane %v976_v56, 5  ;;  %v2736_v6 = vshrl.u32 %v2687_v57, 16  ;;  %v7124_v9 = vld [vmem:[%s7038_s27 + $0x1c] sm:$0xf] }
  0x31   : > { %v5715_v2 = vcombine.low %v945_v62, %v955_v15  ;;  %v963_v4 = vor.u32 %v962_v59, %v959_v58  ;;  %v2739_v7 = vshll.u32 %v2687_v57, 16  ;;  %v2745_v11 = vshll.u32 %v7116_v60, 16  ;;  %v2690_v14 = vld [vmem:[#allocation2 + $0x18] sm:$0xf]  ;;  %v7130_v19 = vld [vmem:[#allocation2 + $0x1c] sm:$0xf] }
  0x32   : > { %v973_v10 = vor.u32 %v972_v0, %v968_v63  ;;  %v2749_v12 = vshrl.u32 %v7116_v60, 16  ;;  %v2755_v13 = vshll.u32 %v7118_v61, 16  ;;  %v2738_v17 = vrot.slane %v2736_v6, 4  ;;  %v7136_v30 = vld [vmem:[#allocation2 + $0x20] sm:$0x1] }
  0x33   : > { %6218 = vmatprep.mubr.msk.bf16.mxu1 %vm1366_vm12, %v5715_v2  ;;  %v964_v42 = vrot.slane %v963_v4, 4  ;;  %v2741_v18 = vrot.slane %v2739_v7, 5  ;;  %v403_v20 = vshll.u32 %v7081_v32, 16  ;;  %v2747_v22 = vrot.slane %v2745_v11, 5  ;;  %v884_v15 = vld [vmem:[#allocation2 + $0x18] sm:$0xf] }
  0x34   : > { %v974_v21 = vrot.slane %v973_v10, 4  ;;  %v2751_v23 = vrot.slane %v2749_v12, 4  ;;  %v408_v25 = vshrl.u32 %v7124_v9, 16  ;;  %v2757_v29 = vrot.slane %v2755_v13, 5  ;;  %v885_v57 = vld [vmem:[#allocation2 + $0x1c] sm:$0xf] }
  0x35   : > { %v969_v27 = vsel %vm7085_vm13, %v964_v42, %v968_v63  ;;  %v2742_v28 = vor.u32 %v2741_v18, %v2738_v17  ;;  %v2760_v31 = vshrl.u32 %v2690_v14, 16  ;;  %v2763_v36 = vshll.u32 %v2690_v14, 16  ;;  %v915_v63 = vld [vmem:[#allocation2 + $0x20] sm:$0x1]  ;;  %v886_v10 = vld [vmem:[#allocation2 + $0x24] sm:$0xf] }
  0x36   : > { %v979_v34 = vsel %vm7085_vm13, %v974_v21, %v978_v1  ;;  %v2752_v35 = vor.u32 %v2751_v23, %v2747_v22  ;;  %v2769_v37 = vshll.u32 %v7130_v19, 16  ;;  %v2773_v46 = vshrl.u32 %v7130_v19, 16  ;;  %v690_v1 = vld [vmem:[#allocation2 + $0x2c] sm:$0x1]  ;;  %v887_v21 = vld [vmem:[#allocation2 + $0x28] sm:$0xf] }
  0x37   : > { %v5716_v38 = vcombine.low %v969_v27, %v979_v34  ;;  %v2743_v41 = vrot.slane %v2742_v28, 4  ;;  %v2762_v43 = vrot.slane %v2760_v31, 4  ;;  %v2765_v16 = vrot.slane %v2763_v36, 5  ;;  %v7803_v24 = vld [vmem:[%s8882_s1 + $0x10] sm:$0x3] }
  0x38   : > { %v2753_v50 = vrot.slane %v2752_v35, 4  ;;  %v2771_v51 = vrot.slane %v2769_v37, 5  ;;  %v2779_v52 = vshll.u32 %v7136_v30, 16  ;;  %v2775_v54 = vrot.slane %v2773_v46, 4  ;;  %v2694_v37 = vld [vmem:[#allocation2 + $0x28] sm:$0xf] }
  0x39   : > { %6219 = vmatmul.mubr.msk.bf16.vlgmr.msra.gmra.mrb[0].mxu1 %vm1366_vm12, %v5716_v38  ;;  %v2748_v53 = vsel %vm7085_vm13, %v2743_v41, %v2747_v22  ;;  %v3486_v55 = vrot.slane %v7130_v19, 5  ;;  %v3489_v56 = vrot.slane %v7136_v30, 5  ;;  %v2766_v59 = vor.u32 %v2765_v16, %v2762_v43 }
  0x3a   : > { %v2758_v58 = vsel %vm7085_vm13, %v2753_v50, %v2757_v29  ;;  %6251 = vmatpush3.bf16.msra.mxu1 %v7092_v39  ;;  %v2781_v62 = vrot.slane %v2779_v52, 5  ;;  %v981_v0 = vshrl.u32 %v884_v15, 16  ;;  %v2776_v4 = vor.u32 %v2775_v54, %v2771_v51  ;;  %v2693_v29 = vld [vmem:[#allocation2 + $0x24] sm:$0xf] }
  0x3b   : > { %v5862_v2 = vcombine.low %v2748_v53, %v2758_v58  ;;  %v7153_v6 = vrot.slane %v3486_v55, 4  ;;  %v984_v7 = vshll.u32 %v884_v15, 16  ;;  %v2767_v11 = vrot.slane %v2766_v59, 4 }
  0x3c   : > { %v983_v12 = vrot.slane %v981_v0, 4  ;;  %v990_v13 = vshll.u32 %v885_v57, 16  ;;  %v994_v14 = vshrl.u32 %v885_v57, 16  ;;  %v2777_v39 = vrot.slane %v2776_v4, 4 }
  0x3d   : > { %6354 = vmatprep.mubr.msk.bf16.mxu0 %vm1366_vm12, %v5862_v2  ;;  %v986_v42 = vrot.slane %v984_v7, 5  ;;  %v1000_v17 = vshll.u32 %v915_v63, 16  ;;  %v691_v18 = vsel %vm6985_vm3, %v398_v45, %v690_v1  ;;  %v2772_v22 = vsel %vm7085_vm13, %v2767_v11, %v2771_v51  ;;  %v693_v2 = vld [vmem:[#allocation2 + $0x30] sm:$0xf] }
  0x3e   : > { %v992_v23 = vrot.slane %v990_v13, 5  ;;  %v996_v27 = vrot.slane %v994_v14, 4  ;;  %692 = vst [vmem:[#allocation2 + $0x2c] sm:$0x1] %v691_v18  ;;  %v1005_v28 = vshrl.u32 %v886_v10, 16  ;;  %v2782_v31 = vsel %vm7085_vm13, %v2777_v39, %v2781_v62 }
  0x3f   : > { %v987_v34 = vor.u32 %v986_v42, %v983_v12  ;;  %v1002_v35 = vrot.slane %v1000_v17, 5  ;;  %v1008_v36 = vshll.u32 %v886_v10, 16  ;;  %v5863_v26 = vcombine.low %v2772_v22, %v2782_v31  ;;  %v216_v17 = vld [vmem:[#allocation2 + $0x3c] sm:$0x1] }
  0x40   : > { %v997_v38 = vor.u32 %v996_v27, %v992_v23  ;;  %v1007_v41 = vrot.slane %v1005_v28, 4  ;;  %v1014_v45 = vshll.u32 %v887_v21, 16  ;;  %v1018_v15 = vshrl.u32 %v887_v21, 16  ;;  %v272_v27 = vld [vmem:[#allocation2 + $0x44] sm:$0x1] }
  0x41   : > { %v988_v43 = vrot.slane %v987_v34, 4  ;;  %v1010_v46 = vrot.slane %v1008_v36, 5  ;;  %v2784_v50 = vshrl.u32 %v2693_v29, 16  ;;  %6355 = vmatmul.mubr.msk.bf16.vlgmr.msra.gmra.mrb[0].mxu0 %vm1366_vm12, %v5863_v26  ;;  %v2787_v52 = vshll.u32 %v2693_v29, 16  ;;  %v323_v26 = vld [vmem:[%s7038_s27 + $0x24] sm:$0xf] }
  0x42   : > { %v998_v16 = vrot.slane %v997_v38, 4  ;;  %v1016_v51 = vrot.slane %v1014_v45, 5  ;;  %v2793_v53 = vshll.u32 %v2694_v37, 16  ;;  %6387 = vmatpush3.bf16.msra.mxu0 %v7096_v40  ;;  %v1020_v58 = vrot.slane %v1018_v15, 4 }
  0x43   : > { %v993_v54 = vsel %vm7085_vm13, %v988_v43, %v992_v23  ;;  %v1011_v57 = vor.u32 %v1010_v46, %v1007_v41  ;;  %v2786_v59 = vrot.slane %v2784_v50, 4  ;;  %vm1921_vm15 = vcmask 1046532   ;;  %v697_v43 = vld [vmem:[#allocation2 + $0x38] sm:$0x1] }
  0x44   : > { %v1003_v62 = vsel %vm7085_vm13, %v998_v16, %v1002_v35  ;;  %v2789_v63 = vrot.slane %v2787_v52, 5  ;;  %v2795_v0 = vrot.slane %v2793_v53, 5  ;;  %v2797_v1 = vshrl.u32 %v2694_v37, 16  ;;  %v322_v35 = vld [vmem:[%s7038_s27 + $0x20] sm:$0xf]  ;;  %vm7217_vm1 = vmor %vm1920_vm14, %vm1921_vm15 }
  0x45   : > { %v5717_v4 = vcombine.low %v993_v54, %v1003_v62  ;;  %v916_v7 = vld [vmem:[#allocation2 + $0x2c] sm:$0x1]  ;;  %v1012_v10 = vrot.slane %v1011_v57, 4  ;;  %v1021_v11 = vor.u32 %v1020_v58, %v1016_v51  ;;  %v402_v12 = vrot.slane %v400_v47, 7  ;;  %v324_v52 = vld [vmem:[%s7038_s27 + $0x28] sm:$0xf] }
  0x46   : > { %v7170_v40 = vld [vmem:[#allocation2 + $0x2c] sm:$0x1]  ;;  %v1024_v13 = vshll.u32 %v916_v7, 16  ;;  %v2790_v14 = vor.u32 %v2789_v63, %v2786_v59  ;;  %v2799_v39 = vrot.slane %v2797_v1, 4  ;;  %v410_v36 = vrot.slane %v408_v25, 7 }
  0x47   : > { %v2803_v42 = vshll.u32 %v7170_v40, 16  ;;  %6222 = vmatprep.mubr.msk.bf16.mxu1 %vm1366_vm12, %v5717_v4  ;;  %v1017_v18 = vsel %vm7085_vm13, %v1012_v10, %v1016_v51  ;;  %v1022_v21 = vrot.slane %v1021_v11, 4  ;;  %v405_v22 = vor.u32 %v403_v20, %v402_v12  ;;  %v7183_v47 = vld [vmem:[%s8882_s1 + $0xc] sm:$0x3]  ;;  %v219_v25 = vld [vmem:[#allocation2 + $0x48] sm:$0x1] }
  0x48   : > { %v406_v23 = vrot.slane %v402_v12, 4  ;;  %v1026_v28 = vrot.slane %v1024_v13, 5  ;;  %v2791_v29 = vrot.slane %v2790_v14, 4  ;;  %v2800_v31 = vor.u32 %v2799_v39, %v2795_v0  ;;  %6787 = vmatprep.subr.msk.bf16.mxu0 %vm1415_vm0, %v7183_v47  ;;  %v275_v51 = vld [vmem:[#allocation2 + $0x50] sm:$0x1] }
  0x49   : > { %v2805_v34 = vrot.slane %v2803_v42, 5  ;;  %v411_v32 = vshll.u32 %v7124_v9, 16  ;;  %v694_v20 = vsel %vm7031_vm8, %v405_v22, %v693_v2  ;;  %v217_v37 = vsel %vm6985_vm3, 0, %v216_v17  ;;  %v7225_v17 = vld [vmem:[%s7038_s27 + $0x2c] sm:$0xf] }
  0x4a   : > { %v1027_v38 = vsel %vm7085_vm13, %v1022_v21, %v1026_v28  ;;  %v2796_v41 = vsel %vm7085_vm13, %v2791_v29, %v2795_v0  ;;  %v2801_v45 = vrot.slane %v2800_v31, 4  ;;  %695 = vst [vmem:[#allocation2 + $0x30] sm:$0xf] %v694_v20  ;;  %218 = vst [vmem:[#allocation2 + $0x3c] sm:$0x1] %v217_v37  ;;  %v273_v9 = vsel %vm6992_vm6, 0, %v272_v27 }
  0x4b   : > { %v5718_v46 = vcombine.low %v1017_v18, %v1027_v38  ;;  %v413_v15 = vor.u32 %v411_v32, %v410_v36  ;;  %v415_v50 = vrot.slane %v410_v36, 4  ;;  %274 = vst [vmem:[#allocation2 + $0x44] sm:$0x1] %v273_v9  ;;  %v417_v16 = vshrl.u32 %v322_v35, 16 }
  0x4c   : > { %v2806_v53 = vsel %vm7085_vm13, %v2801_v45, %v2805_v34  ;;  %v420_v54 = vshll.u32 %v322_v35, 16  ;;  %v425_v57 = vshrl.u32 %v323_v26, 16  ;;  %v428_v58 = vshll.u32 %v323_v26, 16 }
  0x4d   : > { %6223 = vmatmul.mubr.msk.bf16.gmra.mrb[4].mxu1 %vm1366_vm12, %v5718_v46  ;;  %v5864_v59 = vcombine.low %v2796_v41, %v2806_v53  ;;  %v414_v62 = vsel %vm7057_vm11, %v406_v23, %v413_v15  ;;  %v698_v63 = vsel %vm6985_vm3, %v415_v50, %v697_v43  ;;  %v419_v0 = vrot.slane %v417_v16, 7 }
  0x4e   : > { %696 = vst.msk [vmem:[#allocation2 + $0x34] sm:$0xf] %vm669_vm5, %v414_v62  ;;  %699 = vst [vmem:[#allocation2 + $0x38] sm:$0x1] %v698_v63  ;;  %v427_v1 = vrot.slane %v425_v57, 7  ;;  %v220_v2 = vsel %vm6985_vm3, 0, %v219_v25  ;;  %v7234_v28 = vsel %vm7217_vm1, %v7153_v6, %v3489_v56 }
  0x4f   : > { %v276_v4 = vsel %vm6992_vm6, 0, %v275_v51  ;;  %v434_v7 = vshrl.u32 %v324_v52, 16  ;;  %v3479_v11 = vrot.slane %v7116_v60, 5  ;;  %v3482_v12 = vrot.slane %v7118_v61, 5  ;;  %6358 = vmatprep.mubr.msk.bf16.mxu0 %vm1366_vm12, %v5864_v59  ;;  %221 = vst [vmem:[#allocation2 + $0x48] sm:$0x1] %v220_v2 }
  0x50   : > { %v422_v13 = vor.u32 %v420_v54, %v419_v0  ;;  %v423_v14 = vrot.slane %v419_v0, 4  ;;  %277 = vst [vmem:[#allocation2 + $0x50] sm:$0x1] %v276_v4  ;;  %v430_v39 = vor.u32 %v428_v58, %v427_v1  ;;  %v432_v42 = vrot.slane %v427_v1, 4 }
  0x51   : > { %v7227_v18 = vrot.slane %v434_v7, 7  ;;  %v437_v21 = vshll.u32 %v324_v52, 16  ;;  %v2696_v22 = vld [vmem:[#allocation2 + $0x30] sm:$0xf]  ;;  %v700_v27 = vld [vmem:[#allocation2 + $0x3c] sm:$0xf] }
  0x52   : > { %v888_v23 = vld [vmem:[#allocation2 + $0x30] sm:$0xf]  ;;  %v2808_v29 = vshrl.u32 %v2696_v22, 16  ;;  %v2811_v31 = vshll.u32 %v2696_v22, 16  ;;  %v704_v36 = vld [vmem:[#allocation2 + $0x44] sm:$0x1]  ;;  %v431_v32 = vsel %vm7057_vm11, %v423_v14, %v430_v39  ;;  %v701_v20 = vsel %vm7031_vm8, %v422_v13, %v700_v27 }
  0x53   : > { %v1029_v34 = vshrl.u32 %v888_v23, 16  ;;  %v1032_v35 = vshll.u32 %v888_v23, 16  ;;  %v705_v37 = vsel %vm6985_vm3, %v432_v42, %v704_v36  ;;  %v442_v30 = vshrl.u32 %v7225_v17, 16  ;;  %702 = vst [vmem:[#allocation2 + $0x3c] sm:$0xf] %v701_v20 }
  0x54   : > { %v2810_v26 = vrot.slane %v2808_v29, 4  ;;  %v2813_v38 = vrot.slane %v2811_v31, 5  ;;  %703 = vst.msk [vmem:[#allocation2 + $0x40] sm:$0xf] %vm669_vm5, %v431_v32  ;;  %706 = vst [vmem:[#allocation2 + $0x44] sm:$0x1] %v705_v37  ;;  %v439_v9 = vor.u32 %v437_v21, %v7227_v18 }
  0x55   : > { %v1031_v56 = vrot.slane %v1029_v34, 4  ;;  %v1034_v6 = vrot.slane %v1032_v35, 5  ;;  %v7244_v41 = vld [vmem:[#allocation2 + $0x34] sm:$0xf]  ;;  %v7246_v45 = vld [vmem:[#allocation2 + $0x38] sm:$0x1] }
  0x56   : > { %v889_v43 = vld [vmem:[#allocation2 + $0x34] sm:$0xf]  ;;  %v2814_v25 = vor.u32 %v2813_v38, %v2810_v26  ;;  %v2817_v46 = vshll.u32 %v7244_v41, 16  ;;  %v2821_v15 = vshrl.u32 %v7244_v41, 16  ;;  %v2827_v50 = vshll.u32 %v7246_v45, 16 }
  0x57   : > { %v917_v16 = vld [vmem:[#allocation2 + $0x38] sm:$0x1]  ;;  %v1035_v51 = vor.u32 %v1034_v6, %v1031_v56  ;;  %v1038_v52 = vshll.u32 %v889_v43, 16  ;;  %v1042_v53 = vshrl.u32 %v889_v43, 16  ;;  %v445_v62 = vshll.u32 %v7225_v17, 16 }
  0x58   : > { %v1048_v54 = vshll.u32 %v917_v16, 16  ;;  %v2815_v57 = vrot.slane %v2814_v25, 4  ;;  %v2819_v58 = vrot.slane %v2817_v46, 5  ;;  %v2823_v59 = vrot.slane %v2821_v15, 4  ;;  %v707_v63 = vld [vmem:[#allocation2 + $0x48] sm:$0xf] }
  0x59   : > { %v2829_v0 = vrot.slane %v2827_v50, 5  ;;  %v1036_v1 = vrot.slane %v1035_v51, 4  ;;  %v1040_v2 = vrot.slane %v1038_v52, 5  ;;  %v1044_v4 = vrot.slane %v1042_v53, 4  ;;  %v6857_v49 = vld [vmem:[#allocation2 + $0x30] sm:$0xf] }
  0x5a   : > { %v2824_v7 = vor.u32 %v2823_v59, %v2819_v58  ;;  %v1050_v13 = vrot.slane %v1048_v54, 5  ;;  %v440_v14 = vrot.slane %v7227_v18, 4  ;;  %v444_v39 = vrot.slane %v442_v30, 7  ;;  %v890_v23 = vld [vmem:[#allocation2 + $0x3c] sm:$0xf] }
  0x5b   : > { %v2820_v42 = vsel %vm7085_vm13, %v2815_v57, %v2819_v58  ;;  %v1041_v21 = vsel %vm7085_vm13, %v1036_v1, %v1040_v2  ;;  %v1045_v22 = vor.u32 %v1044_v4, %v1040_v2  ;;  %v891_v27 = vld [vmem:[#allocation2 + $0x40] sm:$0xf]  ;;  %v918_v17 = vld [vmem:[#allocation2 + $0x44] sm:$0x1]  ;;  %v708_v29 = vsel %vm7031_vm8, %v439_v9, %v707_v63  ;;  %v2699_v32 = vld [vmem:[#allocation2 + $0x3c] sm:$0xf] }
  0x5c   : > { %v2825_v31 = vrot.slane %v2824_v7, 4  ;;  %v1053_v34 = vshrl.u32 %v890_v23, 16  ;;  %v1056_v35 = vshll.u32 %v890_v23, 16  ;;  %v1062_v36 = vshll.u32 %v891_v27, 16  ;;  %709 = vst [vmem:[#allocation2 + $0x48] sm:$0xf] %v708_v29 }
  0x5d   : > { %v1046_v18 = vrot.slane %v1045_v22, 4  ;;  %v1066_v20 = vshrl.u32 %v891_v27, 16  ;;  %v1072_v37 = vshll.u32 %v918_v17, 16  ;;  %v7260_v30 = vld [vmem:[#allocation2 + $0x40] sm:$0xf]  ;;  %v2832_v26 = vshrl.u32 %v2699_v32, 16 }
  0x5e   : > { %v2830_v38 = vsel %vm7085_vm13, %v2825_v31, %v2829_v0  ;;  %v1055_v56 = vrot.slane %v1053_v34, 4  ;;  %v1058_v6 = vrot.slane %v1056_v35, 5  ;;  %v1064_v43 = vrot.slane %v1062_v36, 5  ;;  %v7264_v25 = vld [vmem:[#allocation2 + $0x44] sm:$0x1] }
  0x5f   : > { %v5865_v9 = vcombine.low %v2820_v42, %v2830_v38  ;;  %v1051_v46 = vsel %vm7085_vm13, %v1046_v18, %v1050_v13  ;;  %v1068_v15 = vrot.slane %v1066_v20, 4  ;;  %v1074_v50 = vrot.slane %v1072_v37, 5  ;;  %v711_v63 = vld [vmem:[#allocation2 + $0x50] sm:$0x1]  ;;  %v7284_v20 = vld [vmem:[%s7038_s27 + $0x34] sm:$0xf] }
  0x60   : > { %v5719_v16 = vcombine.low %v1041_v21, %v1051_v46  ;;  %v1059_v51 = vor.u32 %v1058_v6, %v1055_v56  ;;  %v2834_v52 = vrot.slane %v2832_v26, 4  ;;  %v2835_v53 = vshll.u32 %v2699_v32, 16  ;;  %v326_v18 = vld [vmem:[%s7038_s27 + $0x30] sm:$0xf]  ;;  %v5795_v56 = vld [vmem:[%s8882_s1 + $0x4] sm:$0x3] }
  0x61   : > { %6359 = vmatmul.mubr.msk.bf16.gmra.mrb[4].mxu0 %vm1366_vm12, %v5865_v9  ;;  %v1069_v54 = vor.u32 %v1068_v15, %v1064_v43  ;;  %v2841_v57 = vshll.u32 %v7260_v30, 16  ;;  %v2845_v58 = vshrl.u32 %v7260_v30, 16  ;;  %v2851_v59 = vshll.u32 %v7264_v25, 16  ;;  %v225_v15 = vld [vmem:[#allocation2 + $0x60] sm:$0x1]  ;;  %6782 = vmatprep.subr.msk.bf16.mxu1 %vm1415_vm0, %v5795_v56 }
  0x62   : > { %6226 = vmatprep.mubr.msk.bf16.mxu1 %vm1366_vm12, %v5719_v16  ;;  %v1060_v0 = vrot.slane %v1059_v51, 4  ;;  %v2837_v1 = vrot.slane %v2835_v53, 5  ;;  %v447_v2 = vor.u32 %v445_v62, %v444_v39  ;;  %v449_v4 = vrot.slane %v444_v39, 4  ;;  %v222_v62 = vld [vmem:[#allocation2 + $0x54] sm:$0x1] }
  0x63   : > { %v1070_v7 = vrot.slane %v1069_v54, 4  ;;  %v2843_v13 = vrot.slane %v2841_v57, 5  ;;  %v2847_v42 = vrot.slane %v2845_v58, 4  ;;  %v2853_v21 = vrot.slane %v2851_v59, 5  ;;  %v2702_v22 = vld [vmem:[#allocation2 + $0x48] sm:$0xf] }
  0x64   : > { %v1065_v23 = vsel %vm7085_vm13, %v1060_v0, %v1064_v43  ;;  %v2838_v27 = vor.u32 %v2837_v1, %v2834_v52  ;;  %v448_v17 = vsel %vm7057_vm11, %v440_v14, %v447_v2  ;;  %v712_v29 = vsel %vm6985_vm3, %v449_v4, %v711_v63  ;;  %v892_v31 = vld [vmem:[#allocation2 + $0x48] sm:$0xf]  ;;  %v278_v39 = vld [vmem:[#allocation2 + $0x5c] sm:$0x1] }
  0x65   : > { %v1075_v34 = vsel %vm7085_vm13, %v1070_v7, %v1074_v50  ;;  %v2848_v35 = vor.u32 %v2847_v42, %v2843_v13  ;;  %710 = vst.msk [vmem:[#allocation2 + $0x4c] sm:$0xf] %vm669_vm5, %v448_v17  ;;  %713 = vst [vmem:[#allocation2 + $0x50] sm:$0x1] %v712_v29  ;;  %v2856_v36 = vshrl.u32 %v2702_v22, 16  ;;  %v2859_v32 = vshll.u32 %v2702_v22, 16 }
  0x66   : > { %v5720_v37 = vcombine.low %v1065_v23, %v1075_v34  ;;  %v2839_v14 = vrot.slane %v2838_v27, 4  ;;  %v1077_v26 = vshrl.u32 %v892_v31, 16  ;;  %v1080_v38 = vshll.u32 %v892_v31, 16  ;;  %v281_v53 = vld [vmem:[#allocation2 + $0x68] sm:$0x1] }
  0x67   : > { %v2849_v6 = vrot.slane %v2848_v35, 4  ;;  %v2858_v43 = vrot.slane %v2856_v36, 4  ;;  %v2861_v9 = vrot.slane %v2859_v32, 5  ;;  %v223_v46 = vsel %vm6985_vm3, 0, %v222_v62  ;;  %v328_v27 = vld [vmem:[%s7038_s27 + $0x38] sm:$0xf] }
  0x68   : > { %6227 = vmatmul.mubr.msk.bf16.gmra.mrb[8].mxu1 %vm1366_vm12, %v5720_v37  ;;  %v2844_v50 = vsel %vm7085_vm13, %v2839_v14, %v2843_v13  ;;  %v1079_v16 = vrot.slane %v1077_v26, 4  ;;  %v1082_v51 = vrot.slane %v1080_v38, 5  ;;  %224 = vst [vmem:[#allocation2 + $0x54] sm:$0x1] %v223_v46  ;;  %v279_v52 = vsel %vm6992_vm6, 0, %v278_v39 }
  0x69   : > { %v2854_v54 = vsel %vm7085_vm13, %v2849_v6, %v2853_v21  ;;  %v2862_v57 = vor.u32 %v2861_v9, %v2858_v43  ;;  %280 = vst [vmem:[#allocation2 + $0x5c] sm:$0x1] %v279_v52  ;;  %v451_v58 = vshrl.u32 %v326_v18, 16  ;;  %v454_v59 = vshll.u32 %v326_v18, 16 }
  0x6a   : > { %v5866_v63 = vcombine.low %v2844_v50, %v2854_v54  ;;  %v1083_v0 = vor.u32 %v1082_v51, %v1079_v16  ;;  %v459_v1 = vshrl.u32 %v7284_v20, 16  ;;  %v462_v2 = vshll.u32 %v7284_v20, 16  ;;  %v329_v20 = vld [vmem:[%s7038_s27 + $0x3c] sm:$0xf]  ;;  %v284_v54 = vld [vmem:[#allocation2 + $0x74] sm:$0x1] }
  0x6b   : > { %v7301_v4 = vrot.slane %v2862_v57, 4  ;;  %v453_v7 = vrot.slane %v451_v58, 7  ;;  %v226_v13 = vsel %vm6985_vm3, 0, %v225_v15  ;;  %v282_v42 = vsel %vm6992_vm6, 0, %v281_v53  ;;  %v228_v53 = vld [vmem:[#allocation2 + $0x6c] sm:$0x1] }
  0x6c   : > { %6362 = vmatprep.mubr.msk.bf16.mxu0 %vm1366_vm12, %v5866_v63  ;;  %v7308_v21 = vld [vmem:[#allocation2 + $0x4c] sm:$0xf]  ;;  %v7310_v22 = vld [vmem:[#allocation2 + $0x50] sm:$0x1]  ;;  %227 = vst [vmem:[#allocation2 + $0x60] sm:$0x1] %v226_v13  ;;  %v5748_v17 = vcombine.low %v7099_v44, %v7107_v48 }
  0x6d   : > { %v893_v23 = vld [vmem:[#allocation2 + $0x4c] sm:$0xf]  ;;  %283 = vst [vmem:[#allocation2 + $0x68] sm:$0x1] %v282_v42  ;;  %v2865_v29 = vshll.u32 %v7308_v21, 16  ;;  %v2869_v31 = vshrl.u32 %v7308_v21, 16  ;;  %v456_v18 = vor.u32 %v454_v59, %v453_v7 }
  0x6e   : > { %v2875_v62 = vshll.u32 %v7310_v22, 16  ;;  %v919_v39 = vld [vmem:[#allocation2 + $0x50] sm:$0x1]  ;;  %v1084_v34 = vrot.slane %v1083_v0, 4  ;;  %v1086_v35 = vshll.u32 %v893_v23, 16  ;;  %v1090_v36 = vshrl.u32 %v893_v23, 16 }
  0x6f   : > { %v1096_v32 = vshll.u32 %v919_v39, 16  ;;  %v2867_v37 = vrot.slane %v2865_v29, 5  ;;  %v2871_v14 = vrot.slane %v2869_v31, 4  ;;  %v457_v38 = vrot.slane %v453_v7, 4  ;;  %v714_v56 = vld [vmem:[#allocation2 + $0x54] sm:$0xf] }
  0x70   : > { %v2877_v26 = vrot.slane %v2875_v62, 5  ;;  %v1088_v6 = vrot.slane %v1086_v35, 5  ;;  %v1092_v43 = vrot.slane %v1090_v36, 4  ;;  %v461_v46 = vrot.slane %v459_v1, 7  ;;  %v718_v15 = vld [vmem:[#allocation2 + $0x5c] sm:$0x1] }
  0x71   : > { %v1098_v9 = vrot.slane %v1096_v32, 5  ;;  %v2868_v50 = vsel %vm7085_vm13, %v7301_v4, %v2867_v37  ;;  %v2872_v16 = vor.u32 %v2871_v14, %v2867_v37  ;;  %v715_v51 = vsel %vm7031_vm8, %v456_v18, %v714_v56  ;;  %v7327_v42 = vld [vmem:[%s7038_s27 + $0x40] sm:$0xf]  ;;  %v7330_v23 = vld [vmem:[%s7038_s27 + $0x44] sm:$0xf] }
  0x72   : > { %v468_v52 = vshrl.u32 %v328_v27, 16  ;;  %v1089_v57 = vsel %vm7085_vm13, %v1084_v34, %v1088_v6  ;;  %v1093_v58 = vor.u32 %v1092_v43, %v1088_v6  ;;  %v464_v59 = vor.u32 %v462_v2, %v461_v46  ;;  %716 = vst [vmem:[#allocation2 + $0x54] sm:$0xf] %v715_v51  ;;  %v3413_v34 = vld [vmem:[#allocation2 + $0xc] sm:$0xe] }
  0x73   : > { %v466_v63 = vrot.slane %v461_v46, 4  ;;  %v2873_v0 = vrot.slane %v2872_v16, 4  ;;  %v471_v7 = vshll.u32 %v328_v27, 16  ;;  %v476_v4 = vshrl.u32 %v329_v20, 16  ;;  %v721_v13 = vld [vmem:[#allocation2 + $0x60] sm:$0xf] }
  0x74   : > { %v470_v1 = vrot.slane %v468_v52, 7  ;;  %v1094_v29 = vrot.slane %v1093_v58, 4  ;;  %v465_v31 = vsel %vm7057_vm11, %v457_v38, %v464_v59  ;;  %v479_v39 = vshll.u32 %v329_v20, 16  ;;  %v725_v2 = vld [vmem:[#allocation2 + $0x68] sm:$0x1] }
  0x75   : > { %v719_v62 = vsel %vm6985_vm3, %v466_v63, %v718_v15  ;;  %v2878_v35 = vsel %vm7085_vm13, %v2873_v0, %v2877_v26  ;;  %717 = vst.msk [vmem:[#allocation2 + $0x58] sm:$0xf] %vm669_vm5, %v465_v31  ;;  %v478_v32 = vrot.slane %v476_v4, 7  ;;  %v229_v14 = vsel %vm6985_vm3, 0, %v228_v53 }
  0x76   : > { %720 = vst [vmem:[#allocation2 + $0x5c] sm:$0x1] %v719_v62  ;;  %v473_v27 = vor.u32 %v471_v7, %v470_v1  ;;  %v474_v36 = vrot.slane %v470_v1, 4  ;;  %v5867_v18 = vcombine.low %v2868_v50, %v2878_v35  ;;  %v1099_v37 = vsel %vm7085_vm13, %v1094_v29, %v1098_v9  ;;  %230 = vst [vmem:[#allocation2 + $0x6c] sm:$0x1] %v229_v14 }
  0x77   : > { %v285_v20 = vsel %vm6992_vm6, 0, %v284_v54  ;;  %v5721_v38 = vcombine.low %v1089_v57, %v1099_v37  ;;  %v481_v56 = vor.u32 %v479_v39, %v478_v32  ;;  %v483_v6 = vrot.slane %v478_v32, 4 }
  0x78   : > { %v722_v26 = vsel %vm7031_vm8, %v473_v27, %v721_v13  ;;  %286 = vst [vmem:[#allocation2 + $0x74] sm:$0x1] %v285_v20  ;;  %6363 = vmatmul.mubr.msk.bf16.gmra.mrb[8].mxu0 %vm1366_vm12, %v5867_v18  ;;  %v485_v43 = vshrl.u32 %v7327_v42, 16  ;;  %v488_v9 = vshll.u32 %v7327_v42, 16  ;;  %v493_v46 = vshrl.u32 %v7330_v23, 16 }
  0x79   : > { %723 = vst [vmem:[#allocation2 + $0x60] sm:$0xf] %v722_v26  ;;  %v496_v15 = vshll.u32 %v7330_v23, 16  ;;  %6230 = vmatprep.mubr.msk.bf16.mxu1 %vm1366_vm12, %v5721_v38  ;;  %v894_v50 = vld [vmem:[#allocation2 + $0x54] sm:$0xf]  ;;  %v482_v51 = vsel %vm7057_vm11, %v474_v36, %v481_v56  ;;  %v726_v52 = vsel %vm6985_vm3, %v483_v6, %v725_v2  ;;  %v5894_v53 = vrot.slane %v3413_v34, 9 }
  0x7a   : > { %v2705_v16 = vld [vmem:[#allocation2 + $0x54] sm:$0xf]  ;;  %v3481_v54 = vrot.slane %v3479_v11, 4  ;;  %v1101_v57 = vshrl.u32 %v894_v50, 16  ;;  %v1104_v58 = vshll.u32 %v894_v50, 16  ;;  %v7360_v0 = vrot.slane %v485_v43, 7 }
  0x7b   : > { %v2880_v59 = vshrl.u32 %v2705_v16, 16  ;;  %v2883_v63 = vshll.u32 %v2705_v16, 16  ;;  %724 = vst.msk [vmem:[#allocation2 + $0x64] sm:$0xf] %vm669_vm5, %v482_v51  ;;  %727 = vst [vmem:[#allocation2 + $0x68] sm:$0x1] %v726_v52  ;;  %v7368_v7 = vsel %vm7217_vm1, %v5894_v53, %v3479_v11 }
  0x7c   : > { %v7362_v1 = vrot.slane %v493_v46, 7  ;;  %v7374_v4 = vsel %vm7217_vm1, %v3481_v54, %v3482_v12  ;;  %v895_v13 = vld [vmem:[#allocation2 + $0x58] sm:$0xf]  ;;  %v1103_v29 = vrot.slane %v1101_v57, 4  ;;  %v1106_v31 = vrot.slane %v1104_v58, 5 }
  0x7d   : > { %v920_v42 = vld [vmem:[#allocation2 + $0x5c] sm:$0x1]  ;;  %v5911_v62 = vcombine.low %v7368_v7, %v7374_v4  ;;  %v1110_v39 = vshll.u32 %v895_v13, 16  ;;  %v1114_v2 = vshrl.u32 %v895_v13, 16  ;;  %v7378_v34 = vld [vmem:[#allocation2 + $0x58] sm:$0xf]  ;;  %v490_v52 = vor.u32 %v488_v9, %v7360_v0 }
  0x7e   : > { %v1120_v60 = vshll.u32 %v920_v42, 16  ;;  %v2882_v11 = vrot.slane %v2880_v59, 4  ;;  %v1107_v35 = vor.u32 %v1106_v31, %v1103_v29  ;;  %v7380_v27 = vld [vmem:[#allocation2 + $0x5c] sm:$0x1]  ;;  %v2885_v61 = vrot.slane %v2883_v63, 5 }
  0x7f   : > { %v2889_v12 = vshll.u32 %v7378_v34, 16  ;;  %v2893_v36 = vshrl.u32 %v7378_v34, 16  ;;  %v1112_v32 = vrot.slane %v1110_v39, 5  ;;  %v1116_v18 = vrot.slane %v1114_v2, 4 }
  0x80   : > { %v1122_v37 = vrot.slane %v1120_v60, 5  ;;  %v2899_v14 = vshll.u32 %v7380_v27, 16  ;;  %v2708_v20 = vld [vmem:[#allocation2 + $0x60] sm:$0xf]  ;;  %v1108_v38 = vrot.slane %v1107_v35, 4  ;;  %v2886_v56 = vor.u32 %v2885_v61, %v2882_v11 }
  0x81   : > { %v2891_v6 = vrot.slane %v2889_v12, 5  ;;  %v2895_v26 = vrot.slane %v2893_v36, 4  ;;  %v1117_v43 = vor.u32 %v1116_v18, %v1112_v32  ;;  %v2904_v51 = vshrl.u32 %v2708_v20, 16  ;;  %v896_v59 = vld [vmem:[#allocation2 + $0x60] sm:$0xf] }
  0x82   : > { %v2901_v46 = vrot.slane %v2899_v14, 5  ;;  %v7385_v50 = vld [vmem:[#allocation2 + $0x64] sm:$0xf]  ;;  %v7387_v16 = vld [vmem:[#allocation2 + $0x68] sm:$0x1]  ;;  %v1113_v53 = vsel %vm7085_vm13, %v1108_v38, %v1112_v32  ;;  %v2887_v54 = vrot.slane %v2886_v56, 4 }
  0x83   : > { %v2896_v57 = vor.u32 %v2895_v26, %v2891_v6  ;;  %v2907_v58 = vshll.u32 %v2708_v20, 16  ;;  %v1118_v63 = vrot.slane %v1117_v43, 4  ;;  %v2906_v13 = vrot.slane %v2904_v51, 4  ;;  %v897_v60 = vld [vmem:[#allocation2 + $0x64] sm:$0xf] }
  0x84   : > { %v2913_v42 = vshll.u32 %v7385_v50, 16  ;;  %v2917_v29 = vshrl.u32 %v7385_v50, 16  ;;  %v2892_v31 = vsel %vm7085_vm13, %v2887_v54, %v2891_v6  ;;  %v2923_v9 = vshll.u32 %v7387_v16, 16  ;;  %v921_v12 = vld [vmem:[#allocation2 + $0x68] sm:$0x1] }
  0x85   : > { %v2897_v39 = vrot.slane %v2896_v57, 4  ;;  %v2909_v2 = vrot.slane %v2907_v58, 5  ;;  %v1123_v11 = vsel %vm7085_vm13, %v1118_v63, %v1122_v37  ;;  %v1125_v36 = vshrl.u32 %v896_v59, 16  ;;  %v728_v43 = vld [vmem:[#allocation2 + $0x6c] sm:$0xf] }
  0x86   : > { %v2915_v35 = vrot.slane %v2913_v42, 5  ;;  %v2919_v61 = vrot.slane %v2917_v29, 4  ;;  %v5722_v32 = vcombine.low %v1113_v53, %v1123_v11  ;;  %v2925_v20 = vrot.slane %v2923_v9, 5  ;;  %v3414_v51 = vld [vmem:[#allocation2 + $0x18] sm:$0xe] }
  0x87   : > { %v2902_v18 = vsel %vm7085_vm13, %v2897_v39, %v2901_v46  ;;  %v2910_v14 = vor.u32 %v2909_v2, %v2906_v13  ;;  %v1127_v6 = vrot.slane %v1125_v36, 4  ;;  %v1128_v26 = vshll.u32 %v896_v59, 16  ;;  %v732_v53 = vld [vmem:[#allocation2 + $0x74] sm:$0x1]  ;;  %v231_v63 = vld [vmem:[#allocation2 + $0x78] sm:$0x1] }
  0x88   : > { %v5868_v38 = vcombine.low %v2892_v31, %v2902_v18  ;;  %v2920_v56 = vor.u32 %v2919_v61, %v2915_v35  ;;  %6231 = vmatmul.mubr.msk.bf16.gmra.mrb[12].mxu1 %vm1366_vm12, %v5722_v32  ;;  %v1134_v54 = vshll.u32 %v897_v60, 16  ;;  %v1138_v57 = vshrl.u32 %v897_v60, 16  ;;  %v287_v29 = vld [vmem:[#allocation2 + $0x80] sm:$0x1]  ;;  %v332_v31 = vld [vmem:[%s7038_s27 + $0x48] sm:$0xf] }
  0x89   : > { %v2911_v37 = vrot.slane %v2910_v14, 4  ;;  %v1144_v58 = vshll.u32 %v921_v12, 16  ;;  %v1130_v13 = vrot.slane %v1128_v26, 5  ;;  %v491_v42 = vrot.slane %v7360_v0, 4  ;;  %v333_v11 = vld [vmem:[%s7038_s27 + $0x4c] sm:$0xf] }
  0x8a   : > { %6366 = vmatprep.mubr.msk.bf16.mxu0 %vm1366_vm12, %v5868_v38  ;;  %v2921_v46 = vrot.slane %v2920_v56, 4  ;;  %v498_v59 = vor.u32 %v496_v15, %v7362_v1  ;;  %v1136_v2 = vrot.slane %v1134_v54, 5  ;;  %v1140_v9 = vrot.slane %v1138_v57, 4  ;;  %v234_v15 = vld [vmem:[#allocation2 + $0x84] sm:$0x1] }
  0x8b   : > { %v2916_v39 = vsel %vm7085_vm13, %v2911_v37, %v2915_v35  ;;  %v1146_v60 = vrot.slane %v1144_v58, 5  ;;  %v1131_v12 = vor.u32 %v1130_v13, %v1127_v6  ;;  %v500_v23 = vrot.slane %v7362_v1, 4  ;;  %v290_v14 = vld [vmem:[#allocation2 + $0x8c] sm:$0x1]  ;;  %v334_v38 = vld [vmem:[%s7038_s27 + $0x50] sm:$0xf] }
  0x8c   : > { %v2926_v61 = vsel %vm7085_vm13, %v2921_v46, %v2925_v20  ;;  %v499_v0 = vsel %vm7057_vm11, %v491_v42, %v498_v59  ;;  %v1141_v32 = vor.u32 %v1140_v9, %v1136_v2  ;;  %v729_v35 = vsel %vm7031_vm8, %v490_v52, %v728_v43  ;;  %v7427_v26 = vld [vmem:[%s7038_s27 + $0x54] sm:$0xf]  ;;  %v7443_v58 = vld [vmem:[#allocation2 + $0x24] sm:$0xe]  ;;  %v6877_v3 = vld [vmem:[#allocation2 + $0x68] sm:$0x1] }
  0x8d   : > { %v5869_v36 = vcombine.low %v2916_v39, %v2926_v61  ;;  %731 = vst.msk [vmem:[#allocation2 + $0x70] sm:$0xf] %vm669_vm5, %v499_v0  ;;  %v5895_v18 = vrot.slane %v3414_v51, 9  ;;  %v1132_v56 = vrot.slane %v1131_v12, 4  ;;  %730 = vst [vmem:[#allocation2 + $0x6c] sm:$0xf] %v729_v35  ;;  %v733_v20 = vsel %vm6985_vm3, %v500_v23, %v732_v53 }
  0x8e   : > { %v4047_v6 = vsel %vm1415_vm0, %v7183_v47, 0  ;;  %v232_v1 = vsel %vm6985_vm3, 0, %v231_v63  ;;  %v1142_v52 = vrot.slane %v1141_v32, 4  ;;  %734 = vst [vmem:[#allocation2 + $0x74] sm:$0x1] %v733_v20  ;;  %v288_v51 = vsel %vm6992_vm6, 0, %v287_v29 }
  0x8f   : > { %6367 = vmatmul.mubr.msk.bf16.gmra.mrb[12].mxu0 %vm1366_vm12, %v5869_v36  ;;  %v3487_v43 = vsel %vm7217_vm1, %v5895_v18, %v3486_v55  ;;  %233 = vst [vmem:[#allocation2 + $0x78] sm:$0x1] %v232_v1  ;;  %v502_v37 = vshrl.u32 %v332_v31, 16  ;;  %v1137_v47 = vsel %vm7085_vm13, %v1132_v56, %v1136_v2  ;;  %289 = vst [vmem:[#allocation2 + $0x80] sm:$0x1] %v288_v51  ;;  %v505_v19 = vshll.u32 %v332_v31, 16 }
  0x90   : > { %6388 = vmatprep.mubr.msk.bf16.mxu0 %vm1366_vm12, %v5911_v62  ;;  %v5912_v54 = vcombine.low %v3487_v43, %v7234_v28  ;;  %v510_v57 = vshrl.u32 %v333_v11, 16  ;;  %v1147_v55 = vsel %vm7085_vm13, %v1142_v52, %v1146_v60  ;;  %v513_v63 = vshll.u32 %v333_v11, 16  ;;  %v5976_v11 = vld [vmem:[%s8882_s1 + $0xe] sm:$0x3] }
  0x91   : > { %v504_v53 = vrot.slane %v502_v37, 7  ;;  %v235_v46 = vsel %vm6985_vm3, 0, %v234_v15  ;;  %v5723_v13 = vcombine.low %v1137_v47, %v1147_v55  ;;  %v291_v7 = vsel %vm6992_vm6, 0, %v290_v14 }
  0x92   : > { %v512_v42 = vrot.slane %v510_v57, 7  ;;  %236 = vst [vmem:[#allocation2 + $0x84] sm:$0x1] %v235_v46  ;;  %v519_v28 = vshrl.u32 %v334_v38, 16  ;;  %292 = vst [vmem:[#allocation2 + $0x8c] sm:$0x1] %v291_v7 }
  0x93   : > { %v507_v4 = vor.u32 %v505_v19, %v504_v53  ;;  %v508_v62 = vrot.slane %v504_v53, 4  ;;  %v522_v59 = vshll.u32 %v334_v38, 16  ;;  %v527_v29 = vshrl.u32 %v7427_v26, 16  ;;  %6234 = vmatprep.mubr.msk.bf16.mxu1 %vm1366_vm12, %v5723_v13  ;;  %v3416_v19 = vld [vmem:[#allocation2 + $0x30] sm:$0xe] }
  0x94   : > { %v899_v31 = vld [vmem:[#allocation2 + $0x70] sm:$0xf]  ;;  %v515_v39 = vor.u32 %v513_v63, %v512_v42  ;;  %v517_v2 = vrot.slane %v512_v42, 4  ;;  %v521_v9 = vrot.slane %v519_v28, 7  ;;  %v530_v60 = vshll.u32 %v7427_v26, 16 }
  0x95   : > { %v898_v61 = vld [vmem:[#allocation2 + $0x6c] sm:$0xf]  ;;  %v1158_v12 = vshll.u32 %v899_v31, 16  ;;  %v1162_v0 = vshrl.u32 %v899_v31, 16  ;;  %v529_v23 = vrot.slane %v527_v29, 7  ;;  %v5896_v15 = vrot.slane %v7443_v58, 9 }
  0x96   : > { %v922_v36 = vld [vmem:[#allocation2 + $0x74] sm:$0x1]  ;;  %v1149_v32 = vshrl.u32 %v898_v61, 16  ;;  %v1152_v35 = vshll.u32 %v898_v61, 16  ;;  %v516_v18 = vsel %vm7057_vm11, %v508_v62, %v515_v39  ;;  %v735_v14 = vld [vmem:[#allocation2 + $0x78] sm:$0xf]  ;;  %v524_v38 = vor.u32 %v522_v59, %v521_v9 }
  0x97   : > { %v1160_v56 = vrot.slane %v1158_v12, 5  ;;  %v1164_v20 = vrot.slane %v1162_v0, 4  ;;  %v1168_v1 = vshll.u32 %v922_v36, 16  ;;  %6389 = vmatmul.mubr.msk.bf16.vlgmr.msra.gmra.mrb[0].mxu0 %vm1366_vm12, %v5912_v54  ;;  %v736_v26 = vsel %vm7031_vm8, %v507_v4, %v735_v14  ;;  %738 = vst.msk [vmem:[#allocation2 + $0x7c] sm:$0xf] %vm669_vm5, %v516_v18 }
  0x98   : > { %v739_v52 = vld [vmem:[#allocation2 + $0x80] sm:$0x1]  ;;  %v1151_v43 = vrot.slane %v1149_v32, 4  ;;  %v1154_v51 = vrot.slane %v1152_v35, 5  ;;  %6421 = vmatpush3.bf16.msra.mxu0 %v4047_v6  ;;  %737 = vst [vmem:[#allocation2 + $0x78] sm:$0xf] %v736_v26  ;;  %v532_v55 = vor.u32 %v530_v60, %v529_v23 }
  0x99   : > { %v740_v37 = vsel %vm6985_vm3, %v517_v2, %v739_v52  ;;  %v525_v47 = vrot.slane %v521_v9, 4  ;;  %v1165_v57 = vor.u32 %v1164_v20, %v1160_v56  ;;  %v1170_v58 = vrot.slane %v1168_v1, 5  ;;  %v742_v53 = vld [vmem:[#allocation2 + $0x84] sm:$0xf]  ;;  %v237_v63 = vld [vmem:[#allocation2 + $0x90] sm:$0x1]  ;;  %6788 = vmatprep.subr.msk.bf16.mxu0 %vm1415_vm0, %v5976_v11 }
  0x9a   : > { %741 = vst [vmem:[#allocation2 + $0x80] sm:$0x1] %v740_v37  ;;  %v534_v54 = vrot.slane %v529_v23, 4  ;;  %v1155_v46 = vor.u32 %v1154_v51, %v1151_v43  ;;  %v743_v13 = vsel %vm7031_vm8, %v524_v38, %v742_v53  ;;  %v746_v6 = vld [vmem:[#allocation2 + $0x8c] sm:$0x1]  ;;  %v3496_v28 = vrot.slane %v7170_v40, 5 }
  0x9b   : > { %v6847_v42 = vld [vmem:[#allocation2 + $0x28] sm:$0xf]  ;;  %v293_v4 = vld [vmem:[#allocation2 + $0x98] sm:$0x1]  ;;  %v1166_v62 = vrot.slane %v1165_v57, 4  ;;  %v533_v59 = vsel %vm7057_vm11, %v525_v47, %v532_v55  ;;  %v5897_v31 = vrot.slane %v3416_v19, 9 }
  0x9c   : > { %v3493_v7 = vrot.slane %v6847_v42, 5  ;;  %744 = vst [vmem:[#allocation2 + $0x84] sm:$0xf] %v743_v13  ;;  %v747_v29 = vsel %vm6985_vm3, %v534_v54, %v746_v6  ;;  %v1156_v39 = vrot.slane %v1155_v46, 4  ;;  %745 = vst.msk [vmem:[#allocation2 + $0x88] sm:$0xf] %vm669_vm5, %v533_v59 }
  0x9d   : > { %748 = vst [vmem:[#allocation2 + $0x8c] sm:$0x1] %v747_v29  ;;  %v3500_v40 = vrot.slane %v7244_v41, 5  ;;  %v1171_v60 = vsel %vm7085_vm13, %v1166_v62, %v1170_v58  ;;  %v3503_v11 = vrot.slane %v7246_v45, 5  ;;  %v238_v61 = vsel %vm6985_vm3, 0, %v237_v63 }
  0x9e   : > { %v3494_v2 = vsel %vm7217_vm1, %v5896_v15, %v3493_v7  ;;  %v3495_v9 = vrot.slane %v3493_v7, 4  ;;  %v294_v12 = vsel %vm6992_vm6, 0, %v293_v4  ;;  %v336_v0 = vld [vmem:[%s7038_s27 + $0x58] sm:$0xf]  ;;  %v1161_v23 = vsel %vm7085_vm13, %v1156_v39, %v1160_v56  ;;  %v7488_v36 = vld [vmem:[#allocation2 + $0x7c] sm:$0xf] }
  0x9f   : > { %v3501_v15 = vsel %vm7217_vm1, %v5897_v31, %v3500_v40  ;;  %v3502_v32 = vrot.slane %v3500_v40, 4  ;;  %239 = vst [vmem:[#allocation2 + $0x90] sm:$0x1] %v238_v61  ;;  %295 = vst [vmem:[#allocation2 + $0x98] sm:$0x1] %v294_v12  ;;  %v5724_v45 = vcombine.low %v1161_v23, %v1171_v60  ;;  %v1182_v18 = vshll.u32 %v7488_v36, 16 }
  0xa0   : > { %v3497_v41 = vsel %vm7217_vm1, %v3495_v9, %v3496_v28  ;;  %v7494_v35 = vld [vmem:[#allocation2 + $0x78] sm:$0xf]  ;;  %v1186_v14 = vshrl.u32 %v7488_v36, 16  ;;  %v536_v52 = vshrl.u32 %v336_v0, 16  ;;  %v337_v55 = vld [vmem:[%s7038_s27 + $0x5c] sm:$0xf] }
  0xa1   : > { %v5913_v38 = vcombine.low %v3494_v2, %v3497_v41  ;;  %v923_v56 = vld [vmem:[#allocation2 + $0x80] sm:$0x1]  ;;  %v1173_v20 = vshrl.u32 %v7494_v35, 16  ;;  %v1176_v1 = vshll.u32 %v7494_v35, 16  ;;  %v3504_v26 = vsel %vm7217_vm1, %v3502_v32, %v3503_v11  ;;  %6235 = vmatmul.mubr.msk.bf16.gmra.mrb[16].mxu1 %vm1366_vm12, %v5724_v45  ;;  %v240_v59 = vld [vmem:[#allocation2 + $0x9c] sm:$0x1] }
  0xa2   : > { %v1184_v43 = vrot.slane %v1182_v18, 5  ;;  %v1188_v51 = vrot.slane %v1186_v14, 4  ;;  %v1192_v37 = vshll.u32 %v923_v56, 16  ;;  %v5914_v47 = vcombine.low %v3501_v15, %v3504_v26  ;;  %v296_v9 = vld [vmem:[#allocation2 + $0xa4] sm:$0x1] }
  0xa3   : > { %6392 = vmatprep.mubr.msk.bf16.mxu0 %vm1366_vm12, %v5913_v38  ;;  %v1175_v19 = vrot.slane %v1173_v20, 4  ;;  %v1178_v57 = vrot.slane %v1176_v1, 5  ;;  %v7504_v58 = vld [vmem:[#allocation2 + $0x84] sm:$0xf]  ;;  %v538_v54 = vrot.slane %v536_v52, 7  ;;  %v539_v53 = vshll.u32 %v336_v0, 16 }
  0xa4   : > { %v1189_v63 = vor.u32 %v1188_v51, %v1184_v43  ;;  %v1194_v46 = vrot.slane %v1192_v37, 5  ;;  %v7507_v13 = vld [vmem:[#allocation2 + $0x88] sm:$0xf]  ;;  %v924_v6 = vld [vmem:[#allocation2 + $0x8c] sm:$0x1]  ;;  %v1197_v42 = vshrl.u32 %v7504_v58, 16  ;;  %6393 = vmatmul.mubr.msk.bf16.gmra.mrb[4].mxu0 %vm1366_vm12, %v5914_v47 }
  0xa5   : > { %v1179_v7 = vor.u32 %v1178_v57, %v1175_v19  ;;  %v1200_v28 = vshll.u32 %v7504_v58, 16  ;;  %v1206_v4 = vshll.u32 %v7507_v13, 16  ;;  %v1210_v62 = vshrl.u32 %v7507_v13, 16  ;;  %v338_v32 = vld [vmem:[%s7038_s27 + $0x60] sm:$0xf] }
  0xa6   : > { %v1190_v29 = vrot.slane %v1189_v63, 4  ;;  %v1199_v31 = vrot.slane %v1197_v42, 4  ;;  %v1216_v39 = vshll.u32 %v924_v6, 16  ;;  %v541_v2 = vor.u32 %v539_v53, %v538_v54  ;;  %v749_v12 = vld [vmem:[#allocation2 + $0x90] sm:$0xf] }
  0xa7   : > { %v1180_v40 = vrot.slane %v1179_v7, 4  ;;  %v1202_v60 = vrot.slane %v1200_v28, 5  ;;  %v1208_v11 = vrot.slane %v1206_v4, 5  ;;  %v1212_v61 = vrot.slane %v1210_v62, 4  ;;  %v753_v56 = vld [vmem:[#allocation2 + $0x98] sm:$0x1] }
  0xa8   : > { %v1195_v0 = vsel %vm7085_vm13, %v1190_v29, %v1194_v46  ;;  %v1218_v23 = vrot.slane %v1216_v39, 5  ;;  %v542_v41 = vrot.slane %v538_v54, 4  ;;  %v544_v15 = vshrl.u32 %v337_v55, 16  ;;  %v339_v20 = vld [vmem:[%s7038_s27 + $0x64] sm:$0xf] }
  0xa9   : > { %v1185_v45 = vsel %vm7085_vm13, %v1180_v40, %v1184_v43  ;;  %v1203_v18 = vor.u32 %v1202_v60, %v1199_v31  ;;  %v1213_v14 = vor.u32 %v1212_v61, %v1208_v11  ;;  %v547_v38 = vshll.u32 %v337_v55, 16  ;;  %v3417_v37 = vld [vmem:[#allocation2 + $0x3c] sm:$0xe]  ;;  %v3418_v28 = vld [vmem:[#allocation2 + $0x48] sm:$0xe] }
  0xaa   : > { %v5725_v1 = vcombine.low %v1185_v45, %v1195_v0  ;;  %v546_v26 = vrot.slane %v544_v15, 7  ;;  %v750_v52 = vsel %vm7031_vm8, %v541_v2, %v749_v12  ;;  %v241_v51 = vsel %vm6985_vm3, 0, %v240_v59  ;;  %v243_v31 = vld [vmem:[#allocation2 + $0xa8] sm:$0x1]  ;;  %v299_v60 = vld [vmem:[#allocation2 + $0xb0] sm:$0x1] }
  0xab   : > { %v1204_v47 = vrot.slane %v1203_v18, 4  ;;  %v1214_v19 = vrot.slane %v1213_v14, 4  ;;  %751 = vst [vmem:[#allocation2 + $0x90] sm:$0xf] %v750_v52  ;;  %242 = vst [vmem:[#allocation2 + $0x9c] sm:$0x1] %v241_v51 }
  0xac   : > { %v297_v43 = vsel %vm6992_vm6, 0, %v296_v9  ;;  %v553_v57 = vshrl.u32 %v338_v32, 16  ;;  %6238 = vmatprep.mubr.msk.bf16.mxu1 %vm1366_vm12, %v5725_v1  ;;  %v549_v55 = vor.u32 %v547_v38, %v546_v26  ;;  %v551_v54 = vrot.slane %v546_v26, 4  ;;  %v341_v26 = vld [vmem:[%s7038_s27 + $0x6c] sm:$0xf] }
  0xad   : > { %298 = vst [vmem:[#allocation2 + $0xa4] sm:$0x1] %v297_v43  ;;  %v556_v53 = vshll.u32 %v338_v32, 16  ;;  %v561_v63 = vshrl.u32 %v339_v20, 16  ;;  %v1209_v46 = vsel %vm7085_vm13, %v1204_v47, %v1208_v11  ;;  %v1219_v6 = vsel %vm7085_vm13, %v1214_v19, %v1218_v23  ;;  %v340_v23 = vld [vmem:[%s7038_s27 + $0x68] sm:$0xf] }
  0xae   : > { %v555_v42 = vrot.slane %v553_v57, 7  ;;  %v564_v7 = vshll.u32 %v339_v20, 16  ;;  %v5726_v4 = vcombine.low %v1209_v46, %v1219_v6  ;;  %v550_v62 = vsel %vm7057_vm11, %v542_v41, %v549_v55 }
  0xaf   : > { %v754_v59 = vsel %vm6985_vm3, %v551_v54, %v753_v56  ;;  %v563_v29 = vrot.slane %v561_v63, 7  ;;  %752 = vst.msk [vmem:[#allocation2 + $0x94] sm:$0xf] %vm669_vm5, %v550_v62  ;;  %v5898_v9 = vrot.slane %v3417_v37, 9  ;;  %v3507_v40 = vrot.slane %v7260_v30, 5 }
  0xb0   : > { %755 = vst [vmem:[#allocation2 + $0x98] sm:$0x1] %v754_v59  ;;  %v558_v39 = vor.u32 %v556_v53, %v555_v42  ;;  %v559_v2 = vrot.slane %v555_v42, 4  ;;  %6239 = vmatmul.mubr.msk.bf16.gmra.mrb[20].mxu1 %vm1366_vm12, %v5726_v4  ;;  %v3510_v12 = vrot.slane %v7264_v25, 5  ;;  %v5899_v0 = vrot.slane %v3418_v28, 9 }
  0xb1   : > { %v566_v11 = vor.u32 %v564_v7, %v563_v29  ;;  %v568_v61 = vrot.slane %v563_v29, 4  ;;  %v3508_v41 = vsel %vm7217_vm1, %v5898_v9, %v3507_v40  ;;  %v3509_v15 = vrot.slane %v3507_v40, 4  ;;  %v246_v54 = vld [vmem:[#allocation2 + $0xb4] sm:$0x1] }
  0xb2   : > { %v3514_v32 = vrot.slane %v7308_v21, 5  ;;  %v3517_v45 = vrot.slane %v7310_v22, 5  ;;  %v7544_v18 = vld [vmem:[#allocation2 + $0x90] sm:$0xf]  ;;  %v756_v14 = vld [vmem:[#allocation2 + $0x9c] sm:$0xf] }
  0xb3   : > { %v567_v30 = vsel %vm7057_vm11, %v559_v2, %v566_v11  ;;  %v244_v25 = vsel %vm6985_vm3, 0, %v243_v31  ;;  %v300_v38 = vsel %vm6992_vm6, 0, %v299_v60  ;;  %v1221_v56 = vshrl.u32 %v7544_v18, 16  ;;  %v302_v11 = vld [vmem:[#allocation2 + $0xbc] sm:$0x1] }
  0xb4   : > { %v1224_v20 = vshll.u32 %v7544_v18, 16  ;;  %v757_v21 = vsel %vm7031_vm8, %v558_v39, %v756_v14  ;;  %759 = vst.msk [vmem:[#allocation2 + $0xa0] sm:$0xf] %vm669_vm5, %v567_v30  ;;  %v760_v22 = vld [vmem:[#allocation2 + $0xa4] sm:$0x1]  ;;  %v3511_v1 = vsel %vm7217_vm1, %v3509_v15, %v3510_v12  ;;  %v3515_v37 = vsel %vm7217_vm1, %v5899_v0, %v3514_v32 }
  0xb5   : > { %245 = vst [vmem:[#allocation2 + $0xa8] sm:$0x1] %v244_v25  ;;  %301 = vst [vmem:[#allocation2 + $0xb0] sm:$0x1] %v300_v38  ;;  %v761_v52 = vsel %vm6985_vm3, %v568_v61, %v760_v22  ;;  %v5915_v51 = vcombine.low %v3508_v41, %v3511_v1  ;;  %v3516_v47 = vrot.slane %v3514_v32, 4  ;;  %v1223_v19 = vrot.slane %v1221_v56, 4 }
  0xb6   : > { %758 = vst [vmem:[#allocation2 + $0x9c] sm:$0xf] %v757_v21  ;;  %v1226_v43 = vrot.slane %v1224_v20, 5  ;;  %762 = vst [vmem:[#allocation2 + $0xa4] sm:$0x1] %v761_v52  ;;  %v570_v57 = vshrl.u32 %v340_v23, 16 }
  0xb7   : > { %v573_v55 = vshll.u32 %v340_v23, 16  ;;  %v7564_v53 = vld [vmem:[#allocation2 + $0x94] sm:$0xf]  ;;  %v925_v63 = vld [vmem:[#allocation2 + $0x98] sm:$0x1]  ;;  %6396 = vmatprep.mubr.msk.bf16.mxu0 %vm1366_vm12, %v5915_v51  ;;  %v3518_v46 = vsel %vm7217_vm1, %v3516_v47, %v3517_v45  ;;  %v578_v6 = vshrl.u32 %v341_v26, 16 }
  0xb8   : > { %v581_v42 = vshll.u32 %v341_v26, 16  ;;  %v1227_v7 = vor.u32 %v1226_v43, %v1223_v19  ;;  %v1230_v28 = vshll.u32 %v7564_v53, 16  ;;  %v1234_v4 = vshrl.u32 %v7564_v53, 16  ;;  %v342_v26 = vld [vmem:[%s7038_s27 + $0x70] sm:$0xf] }
  0xb9   : > { %v1240_v62 = vshll.u32 %v925_v63, 16  ;;  %v5916_v59 = vcombine.low %v3515_v37, %v3518_v46  ;;  %v572_v29 = vrot.slane %v570_v57, 7  ;;  %v580_v31 = vrot.slane %v578_v6, 7  ;;  %v343_v19 = vld [vmem:[%s7038_s27 + $0x74] sm:$0xf] }
  0xba   : > { %v247_v39 = vsel %vm6985_vm3, 0, %v246_v54  ;;  %v1228_v2 = vrot.slane %v1227_v7, 4  ;;  %v1232_v9 = vrot.slane %v1230_v28, 5  ;;  %v1236_v40 = vrot.slane %v1234_v4, 4  ;;  %v3419_v63 = vld [vmem:[#allocation2 + $0x54] sm:$0xe] }
  0xbb   : > { %v1242_v60 = vrot.slane %v1240_v62, 5  ;;  %248 = vst [vmem:[#allocation2 + $0xb4] sm:$0x1] %v247_v39  ;;  %v7573_v61 = vld [vmem:[#allocation2 + $0xa0] sm:$0xf]  ;;  %6397 = vmatmul.mubr.msk.bf16.gmra.mrb[8].mxu0 %vm1366_vm12, %v5916_v59  ;;  %v575_v12 = vor.u32 %v573_v55, %v572_v29  ;;  %v576_v0 = vrot.slane %v572_v29, 4  ;;  %v583_v23 = vor.u32 %v581_v42, %v580_v31 }
  0xbc   : > { %v585_v41 = vrot.slane %v580_v31, 4  ;;  %v763_v15 = vld [vmem:[#allocation2 + $0xa8] sm:$0xf]  ;;  %v1233_v32 = vsel %vm7085_vm13, %v1228_v2, %v1232_v9  ;;  %v1237_v45 = vor.u32 %v1236_v40, %v1232_v9  ;;  %v1254_v14 = vshll.u32 %v7573_v61, 16  ;;  %v767_v38 = vld [vmem:[#allocation2 + $0xb0] sm:$0x1] }
  0xbd   : > { %v7578_v30 = vld [vmem:[#allocation2 + $0x9c] sm:$0xf]  ;;  %v1258_v25 = vshrl.u32 %v7573_v61, 16  ;;  %v926_v56 = vld [vmem:[#allocation2 + $0xa4] sm:$0x1]  ;;  %v584_v22 = vsel %vm7057_vm11, %v576_v0, %v583_v23  ;;  %v764_v1 = vsel %vm7031_vm8, %v575_v12, %v763_v15  ;;  %v303_v54 = vsel %vm6992_vm6, 0, %v302_v11 }
  0xbe   : > { %v1245_v20 = vshrl.u32 %v7578_v30, 16  ;;  %v1248_v21 = vshll.u32 %v7578_v30, 16  ;;  %v1238_v52 = vrot.slane %v1237_v45, 4  ;;  %v1256_v51 = vrot.slane %v1254_v14, 5  ;;  %765 = vst [vmem:[#allocation2 + $0xa8] sm:$0xf] %v764_v1 }
  0xbf   : > { %v1260_v37 = vrot.slane %v1258_v25, 4  ;;  %v1264_v47 = vshll.u32 %v926_v56, 16  ;;  %766 = vst.msk [vmem:[#allocation2 + $0xac] sm:$0xf] %vm669_vm5, %v584_v22  ;;  %v768_v55 = vsel %vm6985_vm3, %v585_v41, %v767_v38  ;;  %304 = vst [vmem:[#allocation2 + $0xbc] sm:$0x1] %v303_v54 }
  0xc0   : > { %v1247_v43 = vrot.slane %v1245_v20, 4  ;;  %v1250_v57 = vrot.slane %v1248_v21, 5  ;;  %v1243_v46 = vsel %vm7085_vm13, %v1238_v52, %v1242_v60  ;;  %769 = vst [vmem:[#allocation2 + $0xb0] sm:$0x1] %v768_v55  ;;  %v587_v7 = vshrl.u32 %v342_v26, 16 }
  0xc1   : > { %v1261_v6 = vor.u32 %v1260_v37, %v1256_v51  ;;  %v1266_v42 = vrot.slane %v1264_v47, 5  ;;  %v5727_v28 = vcombine.low %v1233_v32, %v1243_v46  ;;  %v590_v62 = vshll.u32 %v342_v26, 16  ;;  %v3420_v29 = vld [vmem:[#allocation2 + $0x60] sm:$0xe]  ;;  %v3421_v54 = vld [vmem:[#allocation2 + $0x6c] sm:$0xe] }
  0xc2   : > { %v1251_v4 = vor.u32 %v1250_v57, %v1247_v43  ;;  %v595_v59 = vshrl.u32 %v343_v19, 16  ;;  %v589_v39 = vrot.slane %v587_v7, 7  ;;  %v598_v2 = vshll.u32 %v343_v19, 16  ;;  %v770_v15 = vld [vmem:[#allocation2 + $0xb4] sm:$0xf] }
  0xc3   : > { %v1262_v31 = vrot.slane %v1261_v6, 4  ;;  %v5900_v9 = vrot.slane %v3419_v63, 9  ;;  %6242 = vmatprep.mubr.msk.bf16.mxu1 %vm1366_vm12, %v5727_v28  ;;  %v3521_v60 = vrot.slane %v7378_v34, 5  ;;  %v3524_v12 = vrot.slane %v7380_v27, 5  ;;  %v2712_v7 = vld [vmem:[#allocation2 + $0x70] sm:$0xf] }
  0xc4   : > { %v1252_v40 = vrot.slane %v1251_v4, 4  ;;  %v597_v11 = vrot.slane %v595_v59, 7  ;;  %v592_v23 = vor.u32 %v590_v62, %v589_v39  ;;  %v593_v41 = vrot.slane %v589_v39, 4 }
  0xc5   : > { %v1267_v0 = vsel %vm7085_vm13, %v1262_v31, %v1266_v42  ;;  %v5901_v32 = vrot.slane %v3420_v29, 9  ;;  %v7604_v14 = vld [vmem:[#allocation2 + $0xa8] sm:$0xf]  ;;  %v3522_v34 = vsel %vm7217_vm1, %v5900_v9, %v3521_v60  ;;  %v3523_v47 = vrot.slane %v3521_v60, 4  ;;  %v2713_v29 = vld [vmem:[#allocation2 + $0x74] sm:$0x1] }
  0xc6   : > { %v1257_v45 = vsel %vm7085_vm13, %v1252_v40, %v1256_v51  ;;  %v7606_v25 = vld [vmem:[#allocation2 + $0xac] sm:$0xf]  ;;  %v600_v38 = vor.u32 %v598_v2, %v597_v11  ;;  %v602_v56 = vrot.slane %v597_v11, 4  ;;  %v1269_v20 = vshrl.u32 %v7604_v14, 16  ;;  %v774_v37 = vld [vmem:[#allocation2 + $0xbc] sm:$0x1] }
  0xc7   : > { %v5728_v27 = vcombine.low %v1257_v45, %v1267_v0  ;;  %v1272_v21 = vshll.u32 %v7604_v14, 16  ;;  %v1278_v22 = vshll.u32 %v7606_v25, 16  ;;  %v7613_v1 = vld [vmem:[#allocation2 + $0xb0] sm:$0x1]  ;;  %v1282_v26 = vshrl.u32 %v7606_v25, 16 }
  0xc8   : > { %v601_v52 = vsel %vm7057_vm11, %v593_v41, %v600_v38  ;;  %v771_v51 = vsel %vm7031_vm8, %v592_v23, %v770_v15  ;;  %v1271_v19 = vrot.slane %v1269_v20, 4  ;;  %v1288_v55 = vshll.u32 %v7613_v1, 16  ;;  %v7644_v38 = vld [vmem:[#allocation2 + $0x7c] sm:$0xf] }
  0xc9   : > { %6243 = vmatmul.mubr.msk.bf16.gmra.mrb[24].mxu1 %vm1366_vm12, %v5728_v27  ;;  %v1274_v43 = vrot.slane %v1272_v21, 5  ;;  %v1280_v57 = vrot.slane %v1278_v22, 5  ;;  %772 = vst [vmem:[#allocation2 + $0xb4] sm:$0xf] %v771_v51  ;;  %773 = vst.msk [vmem:[#allocation2 + $0xb8] sm:$0xf] %vm669_vm5, %v601_v52  ;;  %v775_v46 = vsel %vm6985_vm3, %v602_v56, %v774_v37  ;;  %v3525_v6 = vsel %vm7217_vm1, %v3523_v47, %v3524_v12 }
  0xca   : > { %v1284_v63 = vrot.slane %v1282_v26, 4  ;;  %v3528_v42 = vrot.slane %v7385_v50, 5  ;;  %v1290_v4 = vrot.slane %v1288_v55, 5  ;;  %776 = vst [vmem:[#allocation2 + $0xbc] sm:$0x1] %v775_v46  ;;  %v5917_v62 = vcombine.low %v3522_v34, %v3525_v6 }
  0xcb   : > { %v1275_v28 = vor.u32 %v1274_v43, %v1271_v19  ;;  %v3531_v59 = vrot.slane %v7387_v16, 5  ;;  %v5902_v9 = vrot.slane %v3421_v54, 9  ;;  %v3535_v11 = vrot.slane %v2712_v7, 5  ;;  %v3422_v56 = vld [vmem:[#allocation2 + $0x78] sm:$0xe] }
  0xcc   : > { %v1285_v31 = vor.u32 %v1284_v63, %v1280_v57  ;;  %v3529_v39 = vsel %vm7217_vm1, %v5901_v32, %v3528_v42  ;;  %v3530_v2 = vrot.slane %v3528_v42, 4  ;;  %6400 = vmatprep.mubr.msk.bf16.mxu0 %vm1366_vm12, %v5917_v62  ;;  %v3538_v12 = vrot.slane %v2713_v29, 5  ;;  %v7650_v22 = vld [vmem:[#allocation2 + $0x80] sm:$0x1]  ;;  %v2718_v26 = vld [vmem:[#allocation2 + $0x88] sm:$0xf] }
  0xcd   : > { %v1276_v40 = vrot.slane %v1275_v28, 4  ;;  %v3537_v23 = vrot.slane %v3535_v11, 4  ;;  %v3536_v45 = vsel %vm7217_vm1, %v5902_v9, %v3535_v11  ;;  %v2719_v47 = vld [vmem:[#allocation2 + $0x8c] sm:$0x1]  ;;  %v3423_v19 = vld [vmem:[#allocation2 + $0x84] sm:$0xe] }
  0xce   : > { %v1286_v60 = vrot.slane %v1285_v31, 4  ;;  %v3532_v50 = vsel %vm7217_vm1, %v3530_v2, %v3531_v59  ;;  %v3424_v63 = vld [vmem:[#allocation2 + $0x90] sm:$0xe]  ;;  %v7659_v6 = vld [vmem:[#allocation2 + $0x4] sm:$0xf]  ;;  %v5903_v29 = vrot.slane %v3422_v56, 9 }
  0xcf   : > { %v1281_v0 = vsel %vm7085_vm13, %v1276_v40, %v1280_v57  ;;  %v5918_v16 = vcombine.low %v3529_v39, %v3532_v50  ;;  %v3539_v37 = vsel %vm7217_vm1, %v3537_v23, %v3538_v12  ;;  %v6849_v42 = vld [vmem:[#allocation2] sm:$0xf]  ;;  %v3542_v31 = vrot.slane %v7644_v38, 5  ;;  %v2722_v11 = vld [vmem:[#allocation2 + $0x98] sm:$0x1] }
  0xd0   : > { %v1291_v41 = vsel %vm7085_vm13, %v1286_v60, %v1290_v4  ;;  %v7638_v15 = vld [vmem:[#allocation2 + $0xb4] sm:$0xf]  ;;  %v7640_v32 = vld [vmem:[#allocation2 + $0xb8] sm:$0xf]  ;;  %v5747_v7 = vcombine.low %v6849_v42, %v7659_v6  ;;  %v5919_v28 = vcombine.low %v3536_v45, %v3539_v37  ;;  %v3545_v2 = vrot.slane %v7650_v22, 5 }
  0xd1   : > { %v5729_v34 = vcombine.low %v1281_v0, %v1291_v41  ;;  %v1293_v27 = vshrl.u32 %v7638_v15, 16  ;;  %v1296_v20 = vshll.u32 %v7638_v15, 16  ;;  %v1302_v21 = vshll.u32 %v7640_v32, 16  ;;  %6401 = vmatmul.mubr.msk.bf16.gmra.mrb[12].mxu0 %vm1366_vm12, %v5918_v16  ;;  %v7652_v52 = vld [vmem:[#allocation2 + $0xbc] sm:$0x1] }
  0xd2   : > { %v1306_v51 = vshrl.u32 %v7640_v32, 16  ;;  %v1312_v54 = vshll.u32 %v7652_v52, 16  ;;  %v2721_v4 = vld [vmem:[#allocation2 + $0x94] sm:$0xf]  ;;  %6404 = vmatprep.mubr.msk.bf16.mxu0 %vm1366_vm12, %v5919_v28  ;;  %v5904_v9 = vrot.slane %v3423_v19, 9  ;;  %v3549_v40 = vrot.slane %v2718_v26, 5 }
  0xd3   : > { %6246 = vmatprep.mubr.msk.bf16.mxu1 %vm1366_vm12, %v5729_v34  ;;  %v1295_v43 = vrot.slane %v1293_v27, 4  ;;  %v1298_v57 = vrot.slane %v1296_v20, 5  ;;  %v1304_v55 = vrot.slane %v1302_v21, 5  ;;  %v3543_v50 = vsel %vm7217_vm1, %v5903_v29, %v3542_v31  ;;  %v3425_v16 = vld [vmem:[#allocation2 + $0x9c] sm:$0xe] }
  0xd4   : > { %v1308_v46 = vrot.slane %v1306_v51, 4  ;;  %v1314_v59 = vrot.slane %v1312_v54, 5  ;;  %v3544_v12 = vrot.slane %v3542_v31, 4  ;;  %v3552_v0 = vrot.slane %v2719_v47, 5  ;;  %v2724_v26 = vld [vmem:[#allocation2 + $0xa0] sm:$0xf] }
  0xd5   : > { %v1299_v62 = vor.u32 %v1298_v57, %v1295_v43  ;;  %v3550_v41 = vsel %vm7217_vm1, %v5904_v9, %v3549_v40  ;;  %v3551_v45 = vrot.slane %v3549_v40, 4  ;;  %v5905_v56 = vrot.slane %v3424_v63, 9  ;;  %v2725_v51 = vld [vmem:[#allocation2 + $0xa4] sm:$0x1]  ;;  %v2727_v57 = vld [vmem:[#allocation2 + $0xac] sm:$0xf] }
  0xd6   : > { %v1309_v39 = vor.u32 %v1308_v46, %v1304_v55  ;;  %v3546_v27 = vsel %vm7217_vm1, %v3544_v12, %v3545_v2  ;;  %v3556_v20 = vrot.slane %v2721_v4, 5  ;;  %v3559_v21 = vrot.slane %v2722_v11, 5  ;;  %v2730_v46 = vld [vmem:[#allocation2 + $0xb8] sm:$0xf]  ;;  %v249_v42 = vld [vmem:[#allocation2 + $0xc0] sm:$0x1] }
  0xd7   : > { %v1300_v60 = vrot.slane %v1299_v62, 4  ;;  %v5920_v47 = vcombine.low %v3543_v50, %v3546_v27  ;;  %v3553_v19 = vsel %vm7217_vm1, %v3551_v45, %v3552_v0  ;;  %v5906_v43 = vrot.slane %v3425_v16, 9  ;;  %v3426_v29 = vld [vmem:[#allocation2 + $0xa8] sm:$0xe]  ;;  %v305_v2 = vld [vmem:[#allocation2 + $0xc8] sm:$0x1] }
  0xd8   : > { %v1310_v23 = vrot.slane %v1309_v39, 4  ;;  %v5921_v63 = vcombine.low %v3550_v41, %v3553_v19  ;;  %v3557_v28 = vsel %vm7217_vm1, %v5905_v56, %v3556_v20  ;;  %v3563_v4 = vrot.slane %v2724_v26, 5  ;;  %v344_v9 = vld [vmem:[%s7038_s27 + $0x78] sm:$0xf]  ;;  %v7688_v0 = vld [vmem:[#allocation2 + $0x1c] sm:$0xf] }
  0xd9   : > { %v1305_v34 = vsel %vm7085_vm13, %v1300_v60, %v1304_v55  ;;  %v3558_v55 = vrot.slane %v3556_v20, 4  ;;  %6405 = vmatmul.mubr.msk.bf16.gmra.mrb[16].mxu0 %vm1366_vm12, %v5920_v47  ;;  %v3566_v62 = vrot.slane %v2725_v51, 5  ;;  %v3570_v39 = vrot.slane %v2727_v57, 5  ;;  %v3427_v60 = vld [vmem:[#allocation2 + $0xb4] sm:$0xe] }
  0xda   : > { %v1315_v37 = vsel %vm7085_vm13, %v1310_v23, %v1314_v59  ;;  %v2728_v59 = vld [vmem:[#allocation2 + $0xb0] sm:$0x1]  ;;  %6408 = vmatprep.mubr.msk.bf16.mxu0 %vm1366_vm12, %v5921_v63  ;;  %v3564_v40 = vsel %vm7217_vm1, %v5906_v43, %v3563_v4  ;;  %v3565_v11 = vrot.slane %v3563_v4, 4  ;;  %v3577_v50 = vrot.slane %v2730_v46, 5  ;;  %v6850_v12 = vld [vmem:[#allocation2 + $0x18] sm:$0xf] }
  0xdb   : > { %v5730_v54 = vcombine.low %v1305_v34, %v1315_v37  ;;  %v3560_v31 = vsel %vm7217_vm1, %v3558_v55, %v3559_v21  ;;  %v5749_v16 = vcombine.low %v6850_v12, %v7688_v0  ;;  %v5907_v41 = vrot.slane %v3426_v29, 9  ;;  %v2731_v56 = vld [vmem:[#allocation2 + $0xbc] sm:$0x1]  ;;  %v6852_v63 = vld [vmem:[#allocation2 + $0x10] sm:$0xf] }
  0xdc   : > { %v5922_v23 = vcombine.low %v3557_v28, %v3560_v31  ;;  %v3573_v45 = vrot.slane %v2728_v59, 5  ;;  %v345_v34 = vld [vmem:[%s7038_s27 + $0x7c] sm:$0xf]  ;;  %v3567_v27 = vsel %vm7217_vm1, %v3565_v11, %v3566_v62  ;;  %v306_v20 = vsel %vm6992_vm6, 0, %v305_v2  ;;  %v6853_v46 = vld [vmem:[%s8882_s1 + $0x4] sm:$0x3] }
  0xdd   : > { %6247 = vmatmul.mubr.msk.bf16.gmra.mrb[28].mxu1 %vm1366_vm12, %v5730_v54  ;;  %v604_v21 = vshrl.u32 %v344_v9, 16  ;;  %v5923_v26 = vcombine.low %v3564_v40, %v3567_v27  ;;  %v3572_v51 = vrot.slane %v3570_v39, 4  ;;  %v5908_v37 = vrot.slane %v3427_v60, 9  ;;  %307 = vst [vmem:[#allocation2 + $0xc8] sm:$0x1] %v306_v20 }
  0xde   : > { %6252 = vmatprep.mubr.msk.bf16.mxu1 %vm1366_vm12, %v5747_v7  ;;  %v250_v7 = vsel %vm6985_vm3, 0, %v249_v42  ;;  %v607_v47 = vshll.u32 %v344_v9, 16  ;;  %v3579_v19 = vrot.slane %v3577_v50, 4  ;;  %v3580_v43 = vrot.slane %v2731_v56, 5  ;;  %v1873_v4 = vld [vmem:[#allocation2 + $0xc] sm:$0xe] }
  0xdf   : > { %251 = vst [vmem:[#allocation2 + $0xc0] sm:$0x1] %v250_v7  ;;  %v606_v57 = vrot.slane %v604_v21, 7  ;;  %v612_v54 = vshrl.u32 %v345_v34, 16  ;;  %v1932_v55 = vrot.slane %v6852_v63, 5  ;;  %v2134_v42 = vsel %vm1415_vm0, %v6853_v46, 0 }
  0xe0   : > { %v615_v28 = vshll.u32 %v345_v34, 16  ;;  %v3571_v62 = vsel %vm7217_vm1, %v5907_v41, %v3570_v39  ;;  %v7708_v31 = vld [vmem:[%s8882_s1 + $0x6] sm:$0x3]  ;;  %v6854_v2 = vld [vmem:[#allocation2 + $0x14] sm:$0x1]  ;;  %v3574_v40 = vsel %vm7217_vm1, %v3572_v51, %v3573_v45  ;;  %v3578_v39 = vsel %vm7217_vm1, %v5908_v37, %v3577_v50 }
  0xe1   : > { %6409 = vmatmul.mubr.msk.bf16.gmra.mrb[20].mxu0 %vm1366_vm12, %v5922_v23  ;;  %v610_v59 = vrot.slane %v606_v57, 4  ;;  %v614_v29 = vrot.slane %v612_v54, 7  ;;  %v1935_v9 = vrot.slane %v6854_v2, 5  ;;  %v609_v11 = vor.u32 %v607_v47, %v606_v57  ;;  %v7724_v41 = vld [vmem:[#allocation2 + $0x28] sm:$0xf] }
  0xe2   : > { %6412 = vmatprep.mubr.msk.bf16.mxu0 %vm1366_vm12, %v5923_v26  ;;  %v3581_v60 = vsel %vm7217_vm1, %v3579_v19, %v3580_v43  ;;  %v5780_v44 = vrot.slane %v1873_v4, 9  ;;  %v1934_v48 = vrot.slane %v1932_v55, 4  ;;  %v5924_v50 = vcombine.low %v3571_v62, %v3574_v40  ;;  %v7742_v51 = vld [vmem:[#allocation2 + $0x34] sm:$0xf]  ;;  %v252_v19 = vld [vmem:[#allocation2 + $0xcc] sm:$0x1] }
  0xe3   : > { %v617_v12 = vor.u32 %v615_v28, %v614_v29  ;;  %v619_v23 = vrot.slane %v614_v29, 4  ;;  %v5925_v7 = vcombine.low %v3578_v39, %v3581_v60  ;;  %v5751_v37 = vcombine.low %v6857_v49, %v7742_v51  ;;  %v6859_v63 = vld [vmem:[#allocation2 + $0x3c] sm:$0xf]  ;;  %v6861_v62 = vld [vmem:[#allocation2 + $0x48] sm:$0xf] }
  0xe4   : > { %v781_v34 = vld [vmem:[#allocation2 + $0xc8] sm:$0x1]  ;;  %v7731_v27 = vsel %vm7217_vm1, %v5780_v44, %v1932_v55  ;;  %v7740_v26 = vsel %vm7217_vm1, %v1934_v48, %v1935_v9  ;;  %v2961_v43 = vshll.u32 %v7644_v38, 16  ;;  %v2965_v57 = vshrl.u32 %v7644_v38, 16  ;;  %v7753_v55 = vld [vmem:[#allocation2 + $0x40] sm:$0xf] }
  0xe5   : > { %6253 = vmatmul.mubr.msk.bf16.vlgmr.msra.gmra.mrb[0].mxu1 %vm1366_vm12, %v5748_v17  ;;  %v6855_v17 = vld [vmem:[#allocation2 + $0x24] sm:$0xf]  ;;  %v618_v56 = vsel %vm7057_vm11, %v610_v59, %v617_v12  ;;  %v782_v21 = vsel %vm6985_vm3, %v619_v23, %v781_v34  ;;  %v5752_v46 = vcombine.low %v6859_v63, %v7753_v55  ;;  %v7756_v59 = vld [vmem:[#allocation2 + $0x4c] sm:$0xf]  ;;  %v253_v60 = vsel %vm6985_vm3, 0, %v252_v19  ;;  %v6815_v23 = vld [vmem:[#allocation2 + $0x18] sm:$0xff]  }
  0xe6   : > { %6285 = vmatpush3.bf16.msra.mxu1 %v2134_v42  ;;  %6256 = vmatprep.mubr.msk.bf16.mxu1 %vm1366_vm12, %v5749_v16  ;;  %v5750_v45 = vcombine.low %v6855_v17, %v7724_v41  ;;  %v777_v16 = vld [vmem:[#allocation2 + $0xc0] sm:$0xf]  ;;  %780 = vst.msk [vmem:[#allocation2 + $0xc4] sm:$0xf] %vm669_vm5, %v618_v56  ;;  %783 = vst [vmem:[#allocation2 + $0xc8] sm:$0x1] %v782_v21  ;;  %v5753_v29 = vcombine.low %v6861_v62, %v7756_v59 }
  0xe7   : > { %6783 = vmatprep.subr.msk.bf16.mxu1 %vm1415_vm0, %v7708_v31  ;;  %v778_v20 = vsel %vm7031_vm8, %v609_v11, %v777_v16  ;;  %v7759_v39 = vrot.slane %v2961_v43, 5  ;;  %v2967_v38 = vrot.slane %v2965_v57, 4  ;;  %254 = vst [vmem:[#allocation2 + $0xcc] sm:$0x1] %v253_v60  ;;  %v2971_v17 = vshll.u32 %v7650_v22, 16  ;;  %v6816_v19 = vld [vmem:[#allocation2 + $0x24] sm:$0xff]  }
  0xe8   : > { %779 = vst [vmem:[#allocation2 + $0xc0] sm:$0xf] %v778_v20  ;;  %v6864_v16 = vld [vmem:[#allocation2 + $0x54] sm:$0xf]  ;;  %v7772_v34 = vld [vmem:[#allocation2 + $0x58] sm:$0xf] }
  0xe9   : > { %6413 = vmatmul.mubr.msk.bf16.gmra.mrb[24].mxu0 %vm1366_vm12, %v5924_v50  ;;  %8918 = vst [vmem:[#allocation4_spill] sm:$0xff] %v7759_v39  ;;  %v2968_v48 = vor.u32 %v2967_v38, %v7759_v39  ;;  %v6863_v50 = vld [vmem:[#allocation2 + $0x8] sm:$0x1]  ;;  %v1925_v20 = vrot.slane %v7659_v6, 5  ;;  %v1874_v21 = vld [vmem:[#allocation2 + $0x18] sm:$0xe] }
  0xea   : > { %6416 = vmatprep.mubr.msk.bf16.mxu0 %vm1366_vm12, %v5925_v7  ;;  %v1928_v56 = vrot.slane %v6863_v50, 5  ;;  %v5754_v7 = vcombine.low %v6864_v16, %v7772_v34  ;;  %v6866_v49 = vld [vmem:[#allocation2 + $0x60] sm:$0xf]  ;;  %v1939_v43 = vrot.slane %v7688_v0, 5  ;;  %v1875_v57 = vld [vmem:[#allocation2 + $0x24] sm:$0xe] }
  0xeb   : > { %v1946_v63 = vrot.slane %v7724_v41, 5  ;;  %v6869_v6 = vld [vmem:[#allocation2 + $0x6c] sm:$0xf]  ;;  %v1876_v62 = vld [vmem:[#allocation2 + $0x30] sm:$0xe]  ;;  %v5781_v60 = vrot.slane %v1874_v21, 9 }
  0xec   : > { %v6870_v0 = vld [vmem:[%s8882_s1 + $0xe] sm:$0x3]  ;;  %v6872_v50 = vld [vmem:[#allocation2 + $0x2c] sm:$0x1]  ;;  %v6876_v21 = vld [vmem:[#allocation2 + $0x5c] sm:$0x1] }
  0xed   : > { %6257 = vmatmul.mubr.msk.bf16.gmra.mrb[4].mxu1 %vm1366_vm12, %v5750_v45  ;;  %v2733_v54 = vld [vmem:[#allocation2 + $0xc4] sm:$0xf]  ;;  %v2734_v42 = vld [vmem:[#allocation2 + $0xc8] sm:$0x1]  ;;  %v1872_v45 = vld [vmem:[#allocation2] sm:$0xe] }
  0xee   : > { %6260 = vmatprep.mubr.msk.bf16.mxu1 %vm1366_vm12, %v5751_v37  ;;  %v3584_v4 = vrot.slane %v2733_v54, 5  ;;  %v3587_v9 = vrot.slane %v2734_v42, 5  ;;  %v7777_v37 = vld [vmem:[#allocation2 + $0x64] sm:$0xf]  ;;  %v6817_v54 = vld [vmem:[#allocation2 + $0x30] sm:$0xff]   ;;  %v7784_v42 = vrot.slane %v2971_v17, 5 }
  0xef   : > { %v3428_v28 = vld [vmem:[#allocation2 + $0xc0] sm:$0xe]  ;;  %v5755_v22 = vcombine.low %v6866_v49, %v7777_v37  ;;  %v5779_v41 = vrot.slane %v1872_v45, 9  ;;  %v1948_v17 = vrot.slane %v1946_v63, 4  ;;  %v1949_v16 = vrot.slane %v6872_v50, 5  ;;  %v6820_v39 = vld [vmem:[#allocation2 + $0x54] sm:$0xff]  }
  0xf0   : > { %v5909_v2 = vrot.slane %v3428_v28, 9  ;;  %v3586_v40 = vrot.slane %v3584_v4, 4  ;;  %8920 = vst [vmem:[#allocation6_spill] sm:$0xff] %v7784_v42  ;;  %v7786_v28 = vld [vmem:[#allocation2 + $0x70] sm:$0xf]  ;;  %v1953_v45 = vrot.slane %v7742_v51, 5 }
  0xf1   : > { %v1878_v51 = vld [vmem:[#allocation2 + $0x48] sm:$0xe]  ;;  %v6874_v50 = vld [vmem:[#allocation2 + $0x44] sm:$0x1]  ;;  %v1881_v47 = vld [vmem:[#allocation2 + $0x6c] sm:$0xe] }
  0xf2   : > { %v3585_v11 = vsel %vm7217_vm1, %v5909_v2, %v3584_v4  ;;  %v3588_v12 = vsel %vm7217_vm1, %v3586_v40, %v3587_v9  ;;  %v5756_v4 = vcombine.low %v6869_v6, %v7786_v28  ;;  %v4773_v2 = vsel %vm1415_vm0, %v6870_v0, 0  ;;  %v1877_v40 = vld [vmem:[#allocation2 + $0x3c] sm:$0xe]  ;;  %v4242_v6 = vld [vmem:[#allocation2 + $0x18] sm:$0xf] }
  0xf3   : > { %v5926_v44 = vcombine.low %v3585_v11, %v3588_v12  ;;  %v1927_v9 = vrot.slane %v1925_v20, 4  ;;  %v5757_v11 = vcombine.low %v7494_v35, %v7488_v36  ;;  %v1941_v12 = vrot.slane %v1939_v43, 4  ;;  %v4246_v49 = vld [vmem:[#allocation2 + $0x28] sm:$0xf] }
  0xf4   : > { %v7827_v0 = vsel %vm7217_vm1, %v5781_v60, %v1939_v43  ;;  %v1955_v43 = vrot.slane %v1953_v45, 4  ;;  %v5785_v60 = vrot.slane %v1878_v51, 9  ;;  %vm5573_vm2 = vcmask 64512  }
  0xf5   : > { %6261 = vmatmul.mubr.msk.bf16.gmra.mrb[8].mxu1 %vm1366_vm12, %v5752_v46  ;;  %6417 = vmatmul.mubr.msk.bf16.gmra.mrb[28].mxu0 %vm1366_vm12, %v5926_v44  ;;  %v7782_v46 = vrot.slane %v2968_v48, 4  ;;  %v5782_v48 = vrot.slane %v1875_v57, 9  ;;  %v5783_v57 = vrot.slane %v1876_v62, 9  ;;  %v1960_v62 = vrot.slane %v7753_v55, 5  ;;  %v1879_v55 = vld [vmem:[#allocation2 + $0x54] sm:$0xe] }
  0xf6   : > { %6264 = vmatprep.mubr.msk.bf16.mxu1 %vm1366_vm12, %v5753_v29  ;;  %6422 = vmatprep.mubr.msk.bf16.mxu0 %vm1366_vm12, %v6815_v23  ;;  %v836_v29 = vld [vmem:[#allocation2 + $0xcc] sm:$0xf]  ;;  %v6871_v23 = vld [vmem:[#allocation2 + $0x20] sm:$0x1] }
  0xf7   : > { %8919 = vst [vmem:[#allocation5_spill] sm:$0xff] %v7782_v46  ;;  %v837_v38 = vsel %vm7031_vm8, 0, %v836_v29  ;;  %v1942_v44 = vrot.slane %v6871_v23, 5  ;;  %v6818_v29 = vld [vmem:[#allocation2 + $0x3c] sm:$0xff]   ;;  %v5784_v23 = vrot.slane %v1877_v40, 9  ;;  %v7848_v40 = vsel %vm1415_vm0, %v7708_v31, 0 }
  0xf8   : > { %838 = vst [vmem:[#allocation2 + $0xcc] sm:$0xf] %v837_v38  ;;  %v4245_v31 = vld [vmem:[#allocation2 + $0x24] sm:$0xf] }
  0xf9   : > { %v4318_v35 = vshll.u32 %v4245_v31, 16 }
  0xfd   : > { %6265 = vmatmul.mubr.msk.bf16.gmra.mrb[12].mxu1 %vm1366_vm12, %v5754_v7  ;;  %6423 = vmatmul.mubr.msk.bf16.vlgmr.msra.gmra.mrb[0].mxu0 %vm1366_vm12, %v6816_v19  ;;  %v7823_v19 = vsel %vm7217_vm1, %v1927_v9, %v1928_v56  ;;  %v7837_v56 = vsel %vm7217_vm1, %v5782_v48, %v1946_v63  ;;  %v4291_v48 = vshrl.u32 %v4242_v6, 16  ;;  %v1977_v7 = vrot.slane %v6876_v21, 5 }
  0xfe   : > { %6268 = vmatprep.mubr.msk.bf16.mxu1 %vm1366_vm12, %v5755_v22  ;;  %6455 = vmatpush3.bf16.msra.mxu0 %v4773_v2  ;;  %v7819_v22 = vsel %vm7217_vm1, %v5779_v41, %v1925_v20  ;;  %v6873_v2 = vld [vmem:[#allocation2 + $0x38] sm:$0x1]  ;;  %v7841_v20 = vsel %vm7217_vm1, %v1948_v17, %v1949_v16  ;;  %v6819_v41 = vld [vmem:[#allocation2 + $0x48] sm:$0xff]   ;;  %v4294_v17 = vshll.u32 %v4242_v6, 16  ;;  %v1963_v16 = vrot.slane %v6874_v50, 5 }
  0xff   : > { %6426 = vmatprep.mubr.msk.bf16.mxu0 %vm1366_vm12, %v6817_v54  ;;  %v7831_v54 = vsel %vm7217_vm1, %v1941_v12, %v1942_v44  ;;  %v1956_v38 = vrot.slane %v6873_v2, 5  ;;  %6789 = vmatprep.subr.msk.bf16.mxu0 %vm1415_vm0, %v7803_v24  ;;  %v1967_v12 = vrot.slane %v7756_v59, 5  ;;  %v7856_v44 = vsel %vm7217_vm1, %v5783_v57, %v1953_v45  ;;  %v6875_v59 = vld [vmem:[#allocation2 + $0x50] sm:$0x1]  ;;  %v4243_v2 = vld [vmem:[#allocation2 + $0x1c] sm:$0xf] }
 0x100   : > { %v1970_v51 = vrot.slane %v6875_v59, 5  ;;  %v7868_v45 = vsel %vm7217_vm1, %v5784_v23, %v1960_v62  ;;  %v1962_v57 = vrot.slane %v1960_v62, 4  ;;  %v1981_v6 = vrot.slane %v7777_v37, 5 }
 0x101   : > { %v7864_v63 = vsel %vm7217_vm1, %v1955_v43, %v1956_v38  ;;  %v7874_v50 = vsel %vm7217_vm1, %v5785_v60, %v1967_v12  ;;  %v5786_v59 = vrot.slane %v1879_v55, 9  ;;  %v1988_v38 = vrot.slane %v7786_v28, 5  ;;  %v6878_v28 = vld [vmem:[#allocation2 + $0x74] sm:$0x1] }
 0x102   : > { %v4293_v23 = vrot.slane %v4291_v48, 4  ;;  %v4296_v43 = vrot.slane %v4294_v17, 5  ;;  %v4300_v62 = vshll.u32 %v4243_v2, 16  ;;  %v4304_v9 = vshrl.u32 %v4243_v2, 16  ;;  %v6821_v2 = vld [vmem:[#allocation2 + $0x60] sm:$0xff]  }
 0x103   : > { %v1983_v60 = vrot.slane %v1981_v6, 4  ;;  %v5788_v55 = vrot.slane %v1881_v47, 9  ;;  %v1990_v46 = vrot.slane %v1988_v38, 4  ;;  %v1991_v42 = vrot.slane %v6878_v28, 5 }
 0x104   : > { %v4328_v48 = vshrl.u32 %v4246_v49, 16  ;;  %v8921_v17 = vcombine.low %v7504_v58, %v7507_v13  ;;  %v7884_v21 = vsel %vm7217_vm1, %v1962_v57, %v1963_v16  ;;  %v4306_v47 = vrot.slane %v4304_v9, 4 }
 0x105   : > { %6269 = vmatmul.mubr.msk.bf16.gmra.mrb[16].mxu1 %vm1366_vm12, %v5756_v4  ;;  %v1974_v4 = vrot.slane %v7772_v34, 5  ;;  %6427 = vmatmul.mubr.msk.bf16.gmra.mrb[4].mxu0 %vm1366_vm12, %v6818_v29  ;;  %v1969_v34 = vrot.slane %v1967_v12, 4  ;;  %v4315_v29 = vshrl.u32 %v4245_v31, 16  ;;  %v1984_v12 = vrot.slane %v6877_v3, 5  ;;  %v4244_v31 = vld [vmem:[#allocation2 + $0x20] sm:$0x1] }
 0x106   : > { %6272 = vmatprep.mubr.msk.bf16.mxu1 %vm1366_vm12, %v5757_v11  ;;  %v1880_v11 = vld [vmem:[#allocation2 + $0x60] sm:$0xe]  ;;  %6430 = vmatprep.mubr.msk.bf16.mxu0 %vm1366_vm12, %v6819_v41  ;;  %v4324_v41 = vshll.u32 %v4246_v49, 16  ;;  %v7886_v3 = vrot.slane %v4300_v62, 5  ;;  %v8922_v28 = vcombine.low %v7544_v18, %v7564_v53  ;;  %v4320_v16 = vrot.slane %v4318_v35, 5 }
 0x107   : > { %v1976_v37 = vrot.slane %v1974_v4, 4  ;;  %v5787_v36 = vrot.slane %v1880_v11, 9  ;;  %v4297_v11 = vor.u32 %v4296_v43, %v4293_v23  ;;  %v7894_v58 = vsel %vm7217_vm1, %v1969_v34, %v1970_v51  ;;  %v1882_v43 = vld [vmem:[#allocation2 + $0x78] sm:$0xe]  ;;  %v6879_v62 = vld [vmem:[#allocation2 + $0x7c] sm:$0xf] }
 0x108   : > { %v7898_v13 = vsel %vm7217_vm1, %v5786_v59, %v1974_v4  ;;  %v4317_v49 = vrot.slane %v4315_v29, 4  ;;  %v7910_v18 = vsel %vm7217_vm1, %v1983_v60, %v1984_v12  ;;  %v7914_v53 = vsel %vm7217_vm1, %v5788_v55, %v1988_v38  ;;  %v4247_v38 = vld [vmem:[#allocation2 + $0x2c] sm:$0x1]  ;;  %v1883_v12 = vld [vmem:[#allocation2 + $0x84] sm:$0xe] }
 0x109   : > { %v7902_v57 = vsel %vm7217_vm1, %v1976_v37, %v1977_v7  ;;  %v7906_v9 = vsel %vm7217_vm1, %v5787_v36, %v1981_v6  ;;  %v7919_v35 = vsel %vm7217_vm1, %v1990_v46, %v1991_v42  ;;  %v4310_v7 = vshll.u32 %v4244_v31, 16  ;;  %v4248_v36 = vld [vmem:[#allocation2 + $0x30] sm:$0xf]  ;;  %v4251_v29 = vld [vmem:[#allocation2 + $0x3c] sm:$0xf]  ;;  %v6824_v6 = vld [vmem:[#allocation2 + $0x84] sm:$0xff]  }
 0x10a   : > { %v7921_v51 = vrot.slane %v4324_v41, 5  ;;  %v4330_v4 = vrot.slane %v4328_v48, 4  ;;  %v7928_v59 = vrot.slane %v4297_v11, 4  ;;  %v4321_v23 = vor.u32 %v4320_v16, %v4317_v49  ;;  %v6822_v48 = vld [vmem:[#allocation2 + $0x6c] sm:$0xff]   ;;  %v6880_v11 = vld [vmem:[#allocation2 + $0x88] sm:$0xf] }
 0x10b   : > { %v1995_v37 = vrot.slane %v6879_v62, 5  ;;  %v4339_v55 = vshrl.u32 %v4248_v36, 16  ;;  %v4342_v41 = vshll.u32 %v4248_v36, 16  ;;  %v4334_v31 = vshll.u32 %v4247_v38, 16  ;;  %v6823_v16 = vld [vmem:[#allocation2 + $0x78] sm:$0xff]  }
 0x10c   : > { %v8924_v49 = vcombine.low %v7578_v30, %v7573_v61  ;;  %v4303_v36 = vsel %vm7085_vm13, %v7928_v59, %v7886_v3  ;;  %v8925_v38 = vcombine.low %v7604_v14, %v7606_v25  ;;  %v4322_v61 = vrot.slane %v4321_v23, 4 }
 0x10d   : > { %6273 = vmatmul.mubr.msk.bf16.gmra.mrb[20].mxu1 %vm1366_vm12, %v8921_v17  ;;  %6431 = vmatmul.mubr.msk.bf16.gmra.mrb[8].mxu0 %vm1366_vm12, %v6820_v39  ;;  %v4307_v39 = vor.u32 %v4306_v47, %v7886_v3  ;;  %v4312_v17 = vrot.slane %v4310_v7, 5  ;;  %v2002_v47 = vrot.slane %v6880_v11, 5  ;;  %v7952_v7 = vsel %vm1415_vm0, %v7803_v24, 0  ;;  %v6881_v11 = vld [vmem:[#allocation2 + $0x80] sm:$0x1] }
 0x10e   : > { %6276 = vmatprep.mubr.msk.bf16.mxu1 %vm1366_vm12, %v8922_v28  ;;  %6434 = vmatprep.mubr.msk.bf16.mxu0 %vm1366_vm12, %v6821_v2  ;;  %v4331_v2 = vor.u32 %v4330_v4, %v7921_v51  ;;  %v7940_v28 = vld [vmem:[#allocation2 + $0x34] sm:$0xf]  ;;  %v5789_v4 = vrot.slane %v1882_v43, 9  ;;  %v1997_v30 = vrot.slane %v1995_v37, 4  ;;  %v5790_v60 = vrot.slane %v1883_v12, 9 }
 0x10f   : > { %8923 = vst [vmem:[#allocation7_spill] sm:$0xff] %v7940_v28  ;;  %v4308_v62 = vrot.slane %v4307_v39, 4  ;;  %v4341_v42 = vrot.slane %v4339_v55, 4  ;;  %v4344_v46 = vrot.slane %v4342_v41, 5  ;;  %v4348_v3 = vshll.u32 %v7940_v28, 16 }
 0x110   : > { %v4352_v59 = vshrl.u32 %v7940_v28, 16  ;;  %v7960_v24 = vld [vmem:[#allocation2 + $0x40] sm:$0xf]  ;;  %v4332_v39 = vrot.slane %v4331_v2, 4  ;;  %v4336_v14 = vrot.slane %v4334_v31, 5  ;;  %v2004_v43 = vrot.slane %v2002_v47, 4 }
 0x111   : > { %8926 = vst [vmem:[#allocation8_spill] sm:$0xff] %v7960_v24  ;;  %v4313_v12 = vsel %vm7085_vm13, %v4308_v62, %v4312_v17  ;;  %v7968_v55 = vsel %vm7217_vm1, %v5789_v4, %v1995_v37  ;;  %v7970_v41 = vld [vmem:[#allocation2 + $0x38] sm:$0x1]  ;;  %v4363_v34 = vshrl.u32 %v4251_v29, 16  ;;  %v4327_v2 = vsel %vm7085_vm13, %v4322_v61, %v7921_v51  ;;  %v4254_v37 = vld [vmem:[#allocation2 + $0x48] sm:$0xf] }
 0x112   : > { %8927 = vst [vmem:[#allocation9_spill] sm:$0xff] %v7970_v41  ;;  %v7979_v31 = vsel %vm7217_vm1, %v5790_v60, %v2002_v47  ;;  %v4372_v17 = vshll.u32 %v7960_v24, 16  ;;  %v4345_v4 = vor.u32 %v4344_v46, %v4341_v42  ;;  %v4337_v51 = vsel %vm7085_vm13, %v4332_v39, %v4336_v14  ;;  %v6825_v42 = vld [vmem:[#allocation2 + $0x90] sm:$0xff]  }
 0x113   : > { %v4358_v47 = vshll.u32 %v7970_v41, 16  ;;  %v8931_v46 = vcombine.low %v7638_v15, %v7640_v32  ;;  %v8932_v39 = vcombine.low %v7819_v22, %v7823_v19  ;;  %v8007_v14 = vcombine.low %v4303_v36, %v4313_v12  ;;  %v4257_v22 = vld [vmem:[#allocation2 + $0x54] sm:$0xf]  ;;  %v8026_v41 = vld [vmem:[#allocation2 + $0x58] sm:$0xf] }
 0x114   : > { %v8019_v19 = vcombine.low %v4327_v2, %v4337_v51  ;;  %8933 = vst [vmem:[#allocation13_spill] sm:$0xff] %v8026_v41  ;;  %v1885_v2 = vld [vmem:[#allocation2 + $0x9c] sm:$0xe]  ;;  %v4411_v51 = vshrl.u32 %v4257_v22, 16  ;;  %v6885_v36 = vld [vmem:[#allocation2 + $0xa0] sm:$0xf] }
 0x115   : > { %6277 = vmatmul.mubr.msk.bf16.gmra.mrb[24].mxu1 %vm1366_vm12, %v8924_v49  ;;  %v1998_v49 = vrot.slane %v6881_v11, 5  ;;  %6435 = vmatmul.mubr.msk.bf16.gmra.mrb[12].mxu0 %vm1366_vm12, %v6822_v48  ;;  %v7972_v11 = vld [vmem:[#allocation2 + $0x44] sm:$0x1]  ;;  %v4366_v48 = vshll.u32 %v4251_v29, 16  ;;  %v4354_v29 = vrot.slane %v4352_v59, 4  ;;  %v4390_v59 = vshll.u32 %v4254_v37, 16 }
 0x116   : > { %6280 = vmatprep.mubr.msk.bf16.mxu1 %vm1366_vm12, %v8925_v38  ;;  %v6882_v38 = vld [vmem:[#allocation2 + $0x8c] sm:$0x1]  ;;  %6438 = vmatprep.mubr.msk.bf16.mxu0 %vm1366_vm12, %v6823_v16  ;;  %8928 = vst [vmem:[#allocation10_spill] sm:$0xff] %v7972_v11  ;;  %v4376_v16 = vshrl.u32 %v7960_v24, 16  ;;  %v4382_v61 = vshll.u32 %v7972_v11, 16  ;;  %v4360_v12 = vrot.slane %v4358_v47, 5 }
 0x117   : > { %v2005_v23 = vrot.slane %v6882_v38, 5  ;;  %v7985_v62 = vsel %vm7217_vm1, %v1997_v30, %v1998_v49  ;;  %v7987_v38 = vrot.slane %v4348_v3, 5  ;;  %v7997_v24 = vld [vmem:[#allocation2 + $0x4c] sm:$0xf]  ;;  %v4365_v30 = vrot.slane %v4363_v34, 4 }
 0x118   : > { %8930 = vst [vmem:[#allocation12_spill] sm:$0xff] %v7997_v24  ;;  %v4368_v49 = vrot.slane %v4366_v48, 5  ;;  %v4387_v3 = vshrl.u32 %v4254_v37, 16  ;;  %v4378_v15 = vrot.slane %v4376_v16, 4  ;;  %v1884_v11 = vld [vmem:[#allocation2 + $0x90] sm:$0xe] }
 0x119   : > { %v7993_v60 = vsel %vm7217_vm1, %v2004_v43, %v2005_v23  ;;  %v8011_v23 = vrot.slane %v4372_v17, 5  ;;  %v4355_v34 = vor.u32 %v4354_v29, %v7987_v38  ;;  %v4396_v48 = vshll.u32 %v7997_v24, 16 }
 0x11a   : > { %8929 = vst [vmem:[#allocation11_spill] sm:$0xff] %v7993_v60  ;;  %v4400_v37 = vshrl.u32 %v7997_v24, 16  ;;  %v8023_v17 = vrot.slane %v4382_v61, 5  ;;  %v4369_v16 = vor.u32 %v4368_v49, %v4365_v30  ;;  %v4392_v43 = vrot.slane %v4390_v59, 5  ;;  %v6884_v59 = vld [vmem:[#allocation2 + $0x98] sm:$0x1] }
 0x11b   : > { %v4379_v28 = vor.u32 %v4378_v15, %v8011_v23  ;;  %v4414_v24 = vshll.u32 %v4257_v22, 16  ;;  %v4356_v61 = vrot.slane %v4355_v34, 4  ;;  %v8035_v30 = vrot.slane %v4396_v48, 5 }
 0x11c   : > { %v4402_v49 = vrot.slane %v4400_v37, 4  ;;  %v2016_v15 = vrot.slane %v6885_v36, 5  ;;  %v4424_v22 = vshrl.u32 %v8026_v41, 16  ;;  %v8934_v60 = vcombine.low %v7731_v27, %v7740_v26  ;;  %v8053_v27 = vld [vmem:[#allocation2 + $0x5c] sm:$0x1] }
 0x11d   : > { %6281 = vmatmul.mubr.msk.bf16.gmra.mrb[28].mxu1 %vm1366_vm12, %v8931_v46  ;;  %v8013_v46 = vrot.slane %v4345_v4, 4  ;;  %6439 = vmatmul.mubr.msk.bf16.gmra.mrb[16].mxu0 %vm1366_vm12, %v6824_v6  ;;  %v6883_v4 = vld [vmem:[#allocation2 + $0x94] sm:$0xf]  ;;  %v5791_v6 = vrot.slane %v1884_v11, 9  ;;  %v4420_v11 = vshll.u32 %v8026_v41, 16  ;;  %v5792_v48 = vrot.slane %v1885_v2, 9 }
 0x11e   : > { %6286 = vmatprep.mubr.msk.bf16.mxu1 %vm1366_vm12, %v8932_v39  ;;  %6442 = vmatprep.mubr.msk.bf16.mxu0 %vm1366_vm12, %v6825_v42  ;;  %v2009_v29 = vrot.slane %v6883_v4, 5  ;;  %v4389_v39 = vrot.slane %v4387_v3, 4  ;;  %v8033_v42 = vld [vmem:[#allocation2 + $0x50] sm:$0x1]  ;;  %v6826_v3 = vld [vmem:[#allocation2 + $0x9c] sm:$0xff]   ;;  %v2012_v4 = vrot.slane %v6884_v59, 5  ;;  %v8935_v36 = vcombine.low %v7827_v0, %v7831_v54 }
 0x11f   : > { %v4351_v47 = vsel %vm7085_vm13, %v8013_v46, %v7987_v38  ;;  %v6827_v38 = vld [vmem:[#allocation2 + $0xa8] sm:$0xff]   ;;  %v8043_v46 = vrot.slane %v4369_v16, 4  ;;  %v8050_v59 = vrot.slane %v4379_v28, 4  ;;  %v4406_v41 = vshll.u32 %v8033_v42, 16 }
 0x120   : > { %v2011_v34 = vrot.slane %v2009_v29, 4  ;;  %v4393_v37 = vor.u32 %v4392_v43, %v4389_v39  ;;  %v4413_v26 = vrot.slane %v4411_v51, 4  ;;  %v4361_v16 = vsel %vm7085_vm13, %v4356_v61, %v4360_v12  ;;  %v6886_v54 = vld [vmem:[%s8882_s1 + $0x8] sm:$0x3] }
 0x121   : > { %v8059_v43 = vsel %vm7217_vm1, %v5791_v6, %v2009_v29  ;;  %v2023_v0 = vrot.slane %v7606_v25, 5  ;;  %v2018_v28 = vrot.slane %v2016_v15, 4  ;;  %v8068_v12 = vrot.slane %v4420_v11, 5  ;;  %v1886_v29 = vld [vmem:[#allocation2 + $0xa8] sm:$0xe] }
 0x122   : > { %v4426_v2 = vrot.slane %v4424_v22, 4  ;;  %v4375_v25 = vsel %vm7085_vm13, %v8043_v46, %v8011_v23  ;;  %v8077_v6 = vsel %vm7217_vm1, %v2011_v34, %v2012_v4  ;;  %v4394_v51 = vrot.slane %v4393_v37, 4  ;;  %v8087_v34 = vld [vmem:[#allocation2 + $0x64] sm:$0xf]  ;;  %v6828_v37 = vld [vmem:[#allocation2 + $0xb4] sm:$0xff]  }
 0x123   : > { %v4430_v61 = vshll.u32 %v8053_v27, 16  ;;  %v4408_v11 = vrot.slane %v4406_v41, 5  ;;  %v5793_v23 = vrot.slane %v1886_v29, 9  ;;  %v2025_v46 = vrot.slane %v2023_v0, 4 }
 0x124   : > { %v2026_v4 = vrot.slane %v7613_v1, 5  ;;  %v4427_v41 = vor.u32 %v4426_v2, %v8068_v12  ;;  %v8939_v1 = vcombine.low %v7837_v56, %v7841_v20  ;;  %v4444_v20 = vshll.u32 %v8087_v34, 16 }
 0x125   : > { %6287 = vmatmul.mubr.msk.bf16.vlgmr.msra.gmra.mrb[0].mxu1 %vm1366_vm12, %v8934_v60  ;;  %v4416_v60 = vrot.slane %v4414_v24, 5  ;;  %6443 = vmatmul.mubr.msk.bf16.gmra.mrb[20].mxu0 %vm1366_vm12, %v6826_v3  ;;  %v6887_v24 = vld [vmem:[#allocation2 + $0xa4] sm:$0x1]  ;;  %v4385_v3 = vsel %vm7085_vm13, %v8050_v59, %v8023_v17  ;;  %v2030_v17 = vrot.slane %v7640_v32, 5  ;;  %v8099_v59 = vld [vmem:[#allocation2 + $0x68] sm:$0x1]  ;;  %v8940_v32 = vcombine.low %v7856_v44, %v7864_v63 }
 0x126   : > { %6319 = vmatpush3.bf16.msra.mxu1 %v7848_v40  ;;  %6290 = vmatprep.mubr.msk.bf16.mxu1 %vm1366_vm12, %v8935_v36  ;;  %v4403_v40 = vor.u32 %v4402_v49, %v8035_v30  ;;  %v2019_v39 = vrot.slane %v6887_v24, 5  ;;  %v8080_v49 = vcombine.low %v4351_v47, %v4361_v16  ;;  %v4260_v36 = vld [vmem:[#allocation2 + $0x60] sm:$0xf]  ;;  %v8091_v47 = vsel %vm7217_vm1, %v5792_v48, %v2016_v15 }
 0x127   : > { %6785 = vmatprep.subr.msk.bf16.mxu1 %vm1415_vm0, %v6886_v54  ;;  %6446 = vmatprep.mubr.msk.bf16.mxu0 %vm1366_vm12, %v6827_v38  ;;  %v4417_v22 = vor.u32 %v4416_v60, %v4413_v26  ;;  %v1887_v38 = vld [vmem:[#allocation2 + $0xb4] sm:$0xe]  ;;  %8936 = vst [vmem:[#allocation14_spill] sm:$0xff] %v8091_v47  ;;  %8938 = vst [vmem:[#allocation16_spill] sm:$0xff] %v8099_v59  ;;  %v6829_v26 = vld [vmem:[#allocation2 + $0xc0] sm:$0xff]   ;;  %v4399_v15 = vsel %vm7085_vm13, %v4394_v51, %v8035_v30  ;;  %v8108_v48 = vrot.slane %v4430_v61, 5 }
 0x128   : > { %v4404_v54 = vrot.slane %v4403_v40, 4  ;;  %v8095_v16 = vsel %vm7217_vm1, %v2018_v28, %v2019_v39  ;;  %v4435_v60 = vshrl.u32 %v4260_v36, 16  ;;  %v4438_v40 = vshll.u32 %v4260_v36, 16  ;;  %v4263_v28 = vld [vmem:[#allocation2 + $0x6c] sm:$0xf] }
 0x129   : > { %8937 = vst [vmem:[#allocation15_spill] sm:$0xff] %v8095_v16  ;;  %v8114_v24 = vrot.slane %v4417_v22, 4  ;;  %v5794_v56 = vrot.slane %v1887_v38, 9  ;;  %v4448_v39 = vshrl.u32 %v8087_v34, 16  ;;  %v8122_v2 = vsel %vm7217_vm1, %v5793_v23, %v2023_v0  ;;  %v4275_v16 = vld [vmem:[#allocation2 + $0x9c] sm:$0xf] }
 0x12a   : > { %v4409_v30 = vsel %vm7085_vm13, %v4404_v54, %v4408_v11  ;;  %8941 = vst [vmem:[#allocation17_spill] sm:$0xff] %v8122_v2  ;;  %v8126_v29 = vsel %vm7217_vm1, %v2025_v46, %v2026_v4  ;;  %v2033_v63 = vrot.slane %v7652_v52, 5  ;;  %v8130_v44 = vrot.slane %v4427_v41, 4  ;;  %v8144_v4 = vld [vmem:[#allocation2 + $0x70] sm:$0xf] }
 0x12b   : > { %8942 = vst [vmem:[#allocation18_spill] sm:$0xff] %v8126_v29  ;;  %v2032_v51 = vrot.slane %v2030_v17, 4  ;;  %v4454_v61 = vshll.u32 %v8099_v59, 16  ;;  %v4459_v22 = vshrl.u32 %v4263_v28, 16  ;;  %v4437_v11 = vrot.slane %v4435_v60, 4  ;;  %8943 = vst [vmem:[#allocation19_spill] sm:$0xff] %v8144_v4 }
 0x12c   : > { %v4440_v38 = vrot.slane %v4438_v40, 5  ;;  %v4462_v36 = vshll.u32 %v4263_v28, 16  ;;  %v8136_v54 = vcombine.low %v4375_v25, %v4385_v3  ;;  %v8140_v23 = vrot.slane %v4444_v20, 5  ;;  %v8160_v60 = vld [vmem:[#allocation2 + $0x7c] sm:$0xf]  ;;  %v6830_v28 = vld [vmem:[#allocation2 + $0xcc] sm:$0xff]  }
 0x12d   : > { %6291 = vmatmul.mubr.msk.bf16.gmra.mrb[4].mxu1 %vm1366_vm12, %v8939_v1  ;;  %6447 = vmatmul.mubr.msk.bf16.gmra.mrb[24].mxu0 %vm1366_vm12, %v6828_v37  ;;  %v8142_v46 = vrot.slane %v4448_v39, 4  ;;  %v8146_v37 = vld [vmem:[#allocation2 + $0x74] sm:$0x1]  ;;  %v8148_v41 = vcombine.low %v4399_v15, %v4409_v30  ;;  %v8158_v3 = vsel %vm7217_vm1, %v5794_v56, %v2030_v17  ;;  %8945 = vst [vmem:[#allocation21_spill] sm:$0xff] %v8160_v60  ;;  %v4269_v40 = vld [vmem:[#allocation2 + $0x84] sm:$0xf] }
 0x12e   : > { %6294 = vmatprep.mubr.msk.bf16.mxu1 %vm1366_vm12, %v8940_v32  ;;  %6450 = vmatprep.mubr.msk.bf16.mxu0 %vm1366_vm12, %v6829_v26  ;;  %8944 = vst [vmem:[#allocation20_spill] sm:$0xff] %v8146_v37  ;;  %v4266_v26 = vld [vmem:[#allocation2 + $0x78] sm:$0xf]  ;;  %v8168_v32 = vsel %vm7217_vm1, %v2032_v51, %v2033_v63  ;;  %v8170_v20 = vrot.slane %v4454_v61, 5  ;;  %v4461_v39 = vrot.slane %v4459_v22, 4  ;;  %v8947_v17 = vcombine.low %v7868_v45, %v7884_v21 }
 0x12f   : > { %v8172_v30 = vld [vmem:[#allocation2 + $0x88] sm:$0xf]  ;;  %v4441_v56 = vor.u32 %v4440_v38, %v4437_v11  ;;  %v4464_v25 = vrot.slane %v4462_v36, 5  ;;  %v4468_v52 = vshll.u32 %v8144_v4, 16  ;;  %v4472_v0 = vshrl.u32 %v8144_v4, 16 }
 0x130   : > { %8946 = vst [vmem:[#allocation22_spill] sm:$0xff] %v8172_v30  ;;  %v4272_v1 = vld [vmem:[#allocation2 + $0x90] sm:$0xf]  ;;  %v8948_v63 = vcombine.low %v7874_v50, %v7894_v58  ;;  %v4451_v51 = vor.u32 %v8142_v46, %v8140_v23  ;;  %v4478_v61 = vshll.u32 %v8146_v37, 16  ;;  %v4483_v45 = vshrl.u32 %v4266_v26, 16 }
 0x131   : > { %v4486_v21 = vshll.u32 %v4266_v26, 16  ;;  %v8187_v22 = vld [vmem:[#allocation2 + $0x94] sm:$0xf]  ;;  %v4492_v11 = vshll.u32 %v8160_v60, 16  ;;  %v4496_v38 = vshrl.u32 %v8160_v60, 16  ;;  %v4507_v36 = vshrl.u32 %v4269_v40, 16 }
 0x132   : > { %8949 = vst [vmem:[#allocation23_spill] sm:$0xff] %v8187_v22  ;;  %v4516_v50 = vshll.u32 %v8172_v30, 16  ;;  %v4520_v58 = vshrl.u32 %v8172_v30, 16  ;;  %v4534_v46 = vshll.u32 %v4272_v1, 16  ;;  %v8196_v26 = vrot.slane %v4441_v56, 4 }
 0x133   : > { %v4465_v15 = vor.u32 %v4464_v25, %v4461_v39  ;;  %v4540_v29 = vshll.u32 %v8187_v22, 16  ;;  %v4544_v60 = vshrl.u32 %v8187_v22, 16  ;;  %v8200_v2 = vrot.slane %v4468_v52, 5  ;;  %v8202_v47 = vld [vmem:[#allocation2 + $0x80] sm:$0x1] }
 0x134   : > { %v4488_v37 = vrot.slane %v4486_v21, 5  ;;  %v8204_v30 = vrot.slane %v4492_v11, 5  ;;  %v4509_v4 = vrot.slane %v4507_v36, 4  ;;  %v8206_v56 = vld [vmem:[#allocation2 + $0x8c] sm:$0x1]  ;;  %v8208_v25 = vrot.slane %v4516_v50, 5 }
 0x135   : > { %6295 = vmatmul.mubr.msk.bf16.gmra.mrb[8].mxu1 %vm1366_vm12, %v8947_v17  ;;  %v4510_v17 = vshll.u32 %v4269_v40, 16  ;;  %6451 = vmatmul.mubr.msk.bf16.gmra.mrb[28].mxu0 %vm1366_vm12, %v6830_v28  ;;  %v4474_v40 = vrot.slane %v4472_v0, 4  ;;  %v4485_v28 = vrot.slane %v4483_v45, 4  ;;  %v4522_v39 = vrot.slane %v4520_v58, 4  ;;  %v8214_v52 = vld [vmem:[#allocation2 + $0x98] sm:$0x1] }
 0x136   : > { %6298 = vmatprep.mubr.msk.bf16.mxu1 %vm1366_vm12, %v8948_v63  ;;  %v4531_v63 = vshrl.u32 %v4272_v1, 16  ;;  %6456 = vmatprep.mubr.msk.bf16.mxu0 %vm1366_vm12, %v8007_v14  ;;  %v4498_v1 = vrot.slane %v4496_v38, 4  ;;  %v4536_v22 = vrot.slane %v4534_v46, 5  ;;  %v8950_v0 = vcombine.low %v7898_v13, %v7902_v57  ;;  %v308_v46 = vld [vmem:[#allocation2 + $0xd4] sm:$0x1] }
 0x137   : > { %v4512_v14 = vrot.slane %v4510_v17, 5  ;;  %v8216_v45 = vrot.slane %v4540_v29, 5  ;;  %v4546_v21 = vrot.slane %v4544_v60, 4  ;;  %v4555_v11 = vshrl.u32 %v4275_v16, 16 }
 0x138   : > { %v4533_v59 = vrot.slane %v4531_v63, 4  ;;  %v4558_v38 = vshll.u32 %v4275_v16, 16  ;;  %v8951_v36 = vcombine.low %v7906_v9, %v7910_v18  ;;  %v8222_v17 = vrot.slane %v4451_v51, 4  ;;  %v8231_v16 = vld [vmem:[#allocation2 + $0xa0] sm:$0xf] }
 0x139   : > { %v8224_v50 = vrot.slane %v4465_v15, 4  ;;  %v4475_v13 = vor.u32 %v4474_v40, %v8200_v2  ;;  %v8227_v57 = vrot.slane %v4478_v61, 5  ;;  %v4489_v58 = vor.u32 %v4488_v37, %v4485_v28  ;;  %8952 = vst [vmem:[#allocation24_spill] sm:$0xff] %v8231_v16  ;;  %v4278_v40 = vld [vmem:[#allocation2 + $0xa8] sm:$0xf] }
 0x13a   : > { %v4499_v29 = vor.u32 %v4498_v1, %v8204_v30  ;;  %v4502_v60 = vshll.u32 %v8202_v47, 16  ;;  %v4513_v63 = vor.u32 %v4512_v14, %v4509_v4  ;;  %v4447_v9 = vsel %vm7085_vm13, %v8196_v26, %v8140_v23 }
 0x13b   : > { %v4523_v18 = vor.u32 %v4522_v39, %v8208_v25  ;;  %v4526_v37 = vshll.u32 %v8206_v56, 16  ;;  %v4550_v15 = vshll.u32 %v8214_v52, 16  ;;  %v4537_v4 = vor.u32 %v4536_v22, %v4533_v59 }
 0x13c   : > { %v4547_v51 = vor.u32 %v4546_v21, %v8216_v45  ;;  %v4560_v61 = vrot.slane %v4558_v38, 5  ;;  %v4476_v28 = vrot.slane %v4475_v13, 4  ;;  %v4564_v23 = vshll.u32 %v8231_v16, 16 }
 0x13d   : > { %6299 = vmatmul.mubr.msk.bf16.gmra.mrb[12].mxu1 %vm1366_vm12, %v8950_v0  ;;  %6457 = vmatmul.mubr.msk.bf16.vlgmr.msra.gmra.mrb[0].mxu0 %vm1366_vm12, %v8019_v19  ;;  %v4557_v19 = vrot.slane %v4555_v11, 4  ;;  %v4568_v26 = vshrl.u32 %v8231_v16, 16  ;;  %v309_v1 = vsel %vm6992_vm6, 0, %v308_v46  ;;  %v4490_v14 = vrot.slane %v4489_v58, 4  ;;  %v8254_v16 = vld [vmem:[#allocation2 + $0xa4] sm:$0x1] }
 0x13e   : > { %6302 = vmatprep.mubr.msk.bf16.mxu1 %vm1366_vm12, %v8951_v36  ;;  %6489 = vmatpush3.bf16.msra.mxu0 %v7952_v7  ;;  %v4500_v39 = vrot.slane %v4499_v29, 4  ;;  %v4504_v7 = vrot.slane %v4502_v60, 5  ;;  %v4514_v0 = vrot.slane %v4513_v63, 4  ;;  %310 = vst [vmem:[#allocation2 + $0xd4] sm:$0x1] %v309_v1  ;;  %v4528_v59 = vrot.slane %v4526_v37, 5 }
 0x13f   : > { %6460 = vmatprep.mubr.msk.bf16.mxu0 %vm1366_vm12, %v8080_v49  ;;  %v4524_v49 = vrot.slane %v4523_v18, 4  ;;  %v4579_v22 = vshrl.u32 %v4278_v40, 16  ;;  %v4582_v21 = vshll.u32 %v4278_v40, 16  ;;  %v8953_v11 = vcombine.low %v7914_v53, %v7919_v35  ;;  %v8270_v63 = vld [vmem:[#allocation2 + $0xac] sm:$0xf] }
 0x140   : > { %v4538_v38 = vrot.slane %v4537_v4, 4  ;;  %v4548_v36 = vrot.slane %v4547_v51, 4  ;;  %v4552_v13 = vrot.slane %v4550_v15, 5  ;;  %v4561_v8 = vor.u32 %v4560_v61, %v4557_v19  ;;  %v8311_v19 = vld [vmem:[#allocation2 + $0xb0] sm:$0x1] }
 0x141   : > { %v8954_v58 = vcombine.low %v7968_v55, %v7985_v62  ;;  %v4457_v29 = vsel %vm7085_vm13, %v8222_v17, %v8170_v20  ;;  %v4471_v53 = vsel %vm7085_vm13, %v8224_v50, %v8200_v2  ;;  %v8268_v35 = vrot.slane %v4564_v23, 5  ;;  %v4281_v61 = vld [vmem:[#allocation2 + $0xb4] sm:$0xf] }
 0x142   : > { %v4570_v60 = vrot.slane %v4568_v26, 4  ;;  %v4481_v55 = vsel %vm7085_vm13, %v4476_v28, %v8227_v57  ;;  %v4495_v62 = vsel %vm7085_vm13, %v4490_v14, %v8204_v30  ;;  %v4505_v20 = vsel %vm7085_vm13, %v4500_v39, %v4504_v7  ;;  %v4973_v14 = vld [vmem:[#allocation2 + $0x54] sm:$0xe]  ;;  %v8957_v39 = vld [vmem:[#allocation11_spill] sm:$0xff] }
 0x143   : > { %v4519_v2 = vsel %vm7085_vm13, %v4514_v0, %v8208_v25  ;;  %v4529_v17 = vsel %vm7085_vm13, %v4524_v49, %v4528_v59  ;;  %v4574_v50 = vshll.u32 %v8254_v16, 16  ;;  %v4581_v57 = vrot.slane %v4579_v22, 4  ;;  %v8337_v59 = vld [vmem:[#allocation2 + $0xb8] sm:$0xf] }
 0x144   : > { %v4584_v46 = vrot.slane %v4582_v21, 5  ;;  %v4543_v30 = vsel %vm7085_vm13, %v4538_v38, %v8216_v45  ;;  %v4553_v25 = vsel %vm7085_vm13, %v4548_v36, %v4552_v13  ;;  %v8295_v18 = vrot.slane %v4561_v8, 4  ;;  %v8960_v36 = vld [vmem:[#allocation12_spill] sm:$0xff] }
 0x145   : > { %6303 = vmatmul.mubr.msk.bf16.gmra.mrb[16].mxu1 %vm1366_vm12, %v8953_v11  ;;  %6461 = vmatmul.mubr.msk.bf16.gmra.mrb[4].mxu0 %vm1366_vm12, %v8136_v54  ;;  %v4588_v54 = vshll.u32 %v8270_v63, 16  ;;  %v8955_v37 = vsel %vm7085_vm13, %v8130_v44, %v8108_v48  ;;  %v5811_v45 = vcombine.low %v8158_v3, %v8168_v32  ;;  %v5983_v4 = vcombine.low %v4447_v9, %v4457_v29  ;;  %v840_v40 = vld [vmem:[#allocation2 + $0xd4] sm:$0x1] }
 0x146   : > { %6306 = vmatprep.mubr.msk.bf16.mxu1 %vm1366_vm12, %v8954_v58  ;;  %6464 = vmatprep.mubr.msk.bf16.mxu0 %vm1366_vm12, %v8148_v41  ;;  %v8956_v41 = vsel %vm7085_vm13, %v8114_v24, %v8068_v12  ;;  %v4571_v51 = vor.u32 %v4570_v60, %v8268_v35  ;;  %v8313_v28 = vcombine.low %v4471_v53, %v4481_v55  ;;  %v4592_v48 = vshrl.u32 %v8270_v63, 16  ;;  %v4972_v24 = vld [vmem:[#allocation2 + $0x48] sm:$0xe]  ;;  %v4974_v55 = vld [vmem:[#allocation2 + $0x60] sm:$0xe] }
 0x147   : > { %v5982_v15 = vcombine.low %v8956_v41, %v8955_v37  ;;  %v8315_v23 = vcombine.low %v4495_v62, %v4505_v20  ;;  %v841_v12 = vsel %vm6985_vm3, 0, %v840_v40  ;;  %v8320_v44 = vcombine.low %v4519_v2, %v4529_v17  ;;  %v8961_v53 = vld [vmem:[#allocation13_spill] sm:$0xff]  ;;  %v4284_v40 = vld [vmem:[#allocation2 + $0xc0] sm:$0xf] }
 0x148   : > { %v8322_v26 = vcombine.low %v4543_v30, %v4553_v25  ;;  %v8324_v9 = vrot.slane %v4574_v50, 5  ;;  %v4585_v1 = vor.u32 %v4584_v46, %v4581_v57  ;;  %842 = vst [vmem:[#allocation2 + $0xd4] sm:$0x1] %v841_v12  ;;  %v8958_v7 = vcombine.low %v7979_v31, %v8957_v39  ;;  %v4975_v2 = vld [vmem:[#allocation2 + $0x6c] sm:$0xe] }
 0x149   : > { %v4567_v5 = vsel %vm7085_vm13, %v8295_v18, %v8268_v35  ;;  %v8334_v0 = vrot.slane %v4588_v54, 5  ;;  %v4598_v49 = vshll.u32 %v8311_v19, 16  ;;  %v4603_v22 = vshrl.u32 %v4281_v61, 16  ;;  %v8962_v54 = vld [vmem:[#allocation16_spill] sm:$0xff]  ;;  %v8391_v39 = vld [vmem:[#allocation2 + $0xbc] sm:$0x1] }
 0x14a   : > { %v8959_v21 = vcombine.low %v8059_v43, %v8077_v6  ;;  %v8343_v31 = vrot.slane %v4571_v51, 4  ;;  %v4606_v11 = vshll.u32 %v4281_v61, 16  ;;  %v6013_v38 = vrot.slane %v4972_v24, 9  ;;  %v8963_v51 = vld [vmem:[#allocation19_spill] sm:$0xff]  ;;  %v8964_v24 = vld [vmem:[#allocation14_spill] sm:$0xff] }
 0x14b   : > { %v5062_v13 = vrot.slane %v8960_v36, 5  ;;  %v8346_v8 = vrot.slane %v4592_v48, 4  ;;  %v5065_v58 = vrot.slane %v8033_v42, 5  ;;  %v6014_v29 = vrot.slane %v4973_v14, 9  ;;  %v8968_v36 = vld [vmem:[#allocation17_spill] sm:$0xff]  ;;  %v8977_v18 = vld [vmem:[#allocation23_spill] sm:$0xff] }
 0x14c   : > { %v5069_v60 = vrot.slane %v8961_v53, 5  ;;  %v8351_v62 = vrot.slane %v4585_v1, 4  ;;  %v4612_v43 = vshll.u32 %v8337_v59, 16  ;;  %v8359_v17 = vrot.slane %v4603_v22, 4  ;;  %v8965_v1 = vld [vmem:[#allocation15_spill] sm:$0xff] }
 0x14d   : > { %6307 = vmatmul.mubr.msk.bf16.gmra.mrb[20].mxu1 %vm1366_vm12, %v8958_v7  ;;  %6465 = vmatmul.mubr.msk.bf16.gmra.mrb[8].mxu0 %vm1366_vm12, %v5982_v15  ;;  %v8356_v6 = vsel %vm7217_vm1, %v6013_v38, %v5062_v13  ;;  %v5064_v20 = vrot.slane %v5062_v13, 4  ;;  %v5072_v57 = vrot.slane %v8053_v27, 5  ;;  %v6015_v30 = vrot.slane %v4974_v55, 9  ;;  %v8969_v13 = vld [vmem:[#allocation18_spill] sm:$0xff]  ;;  %v8411_v55 = vld [vmem:[#allocation2 + $0xc4] sm:$0xf] }
 0x14e   : > { %6310 = vmatprep.mubr.msk.bf16.mxu1 %vm1366_vm12, %v8959_v21  ;;  %6468 = vmatprep.mubr.msk.bf16.mxu0 %vm1366_vm12, %v5983_v4  ;;  %v8363_v42 = vsel %vm7217_vm1, %v6014_v29, %v5069_v60  ;;  %v5071_v50 = vrot.slane %v5069_v60, 4  ;;  %v5076_v25 = vrot.slane %v8087_v34, 5  ;;  %v5079_v37 = vrot.slane %v8962_v54, 5 }
 0x14f   : > { %v8368_v46 = vsel %vm7217_vm1, %v5064_v20, %v5065_v58  ;;  %v6016_v4 = vrot.slane %v4975_v2, 9  ;;  %v5083_v61 = vrot.slane %v8963_v51, 5  ;;  %v8379_v27 = vrot.slane %v4606_v11, 5  ;;  %v8967_v11 = vld [vmem:[#allocation20_spill] sm:$0xff]  ;;  %v2714_v2 = vld [vmem:[#allocation2 + $0x78] sm:$0xf] }
 0x150   : > { %v6030_v41 = vcombine.low %v8356_v6, %v8368_v46  ;;  %v8376_v15 = vsel %vm7217_vm1, %v5071_v50, %v5072_v57  ;;  %v8385_v34 = vsel %vm7217_vm1, %v6015_v30, %v5076_v25  ;;  %v5078_v12 = vrot.slane %v5076_v25, 4  ;;  %v2720_v6 = vld [vmem:[#allocation2 + $0x90] sm:$0xf] }
 0x151   : > { %v6031_v48 = vcombine.low %v8363_v42, %v8376_v15  ;;  %v8966_v14 = vcombine.low %v8964_v24, %v8965_v1  ;;  %v4616_v7 = vshrl.u32 %v8337_v59, 16  ;;  %v8396_v22 = vsel %vm7217_vm1, %v6016_v4, %v5083_v61  ;;  %v6831_v24 = vld [vmem:[#allocation2 + $0xc] sm:$0xff]   ;;  %v6895_v15 = vld [vmem:[#allocation2 + $0x94] sm:$0xf] }
 0x152   : > { %v5085_v21 = vrot.slane %v5083_v61, 4  ;;  %v5086_v38 = vrot.slane %v8967_v11, 5  ;;  %v8970_v58 = vcombine.low %v8968_v36, %v8969_v13  ;;  %v4577_v29 = vsel %vm7085_vm13, %v8343_v31, %v8324_v9  ;;  %v8971_v1 = vld [vmem:[#allocation6_spill] sm:$0xff]  ;;  %v8973_v36 = vld [vmem:[#allocation21_spill] sm:$0xff] }
 0x153   : > { %v4595_v53 = vor.u32 %v8346_v8, %v8334_v0  ;;  %v8409_v60 = vrot.slane %v4598_v49, 5  ;;  %v8415_v20 = vsel %vm7217_vm1, %v5078_v12, %v5079_v37  ;;  %v8417_v50 = vrot.slane %v4612_v43, 5  ;;  %v4976_v8 = vld [vmem:[#allocation2 + $0x78] sm:$0xe]  ;;  %v4977_v12 = vld [vmem:[#allocation2 + $0x84] sm:$0xe] }
 0x154   : > { %v4627_v57 = vshrl.u32 %v4284_v40, 16  ;;  %v6032_v30 = vcombine.low %v8385_v34, %v8415_v20  ;;  %v8423_v25 = vsel %vm7217_vm1, %v5085_v21, %v5086_v38  ;;  %v4591_v49 = vsel %vm7085_vm13, %v8351_v62, %v8334_v0  ;;  %v4287_v37 = vld [vmem:[#allocation2 + $0xcc] sm:$0xf] }
 0x155   : > { %6311 = vmatmul.mubr.msk.bf16.gmra.mrb[24].mxu1 %vm1366_vm12, %v8966_v14  ;;  %6469 = vmatmul.mubr.msk.bf16.gmra.mrb[12].mxu0 %vm1366_vm12, %v8313_v28  ;;  %v4622_v43 = vshll.u32 %v8391_v39, 16  ;;  %v4630_v54 = vshll.u32 %v4284_v40, 16  ;;  %v4609_v4 = vor.u32 %v8379_v27, %v8359_v17  ;;  %v4618_v51 = vrot.slane %v4616_v7, 4  ;;  %v8972_v40 = vld [vmem:[#allocation5_spill] sm:$0xff] }
 0x156   : > { %6314 = vmatprep.mubr.msk.bf16.mxu1 %vm1366_vm12, %v8970_v58  ;;  %6472 = vmatprep.mubr.msk.bf16.mxu0 %vm1366_vm12, %v8315_v23  ;;  %v4636_v28 = vshll.u32 %v8411_v55, 16  ;;  %v2952_v61 = vshrl.u32 %v2714_v2, 16  ;;  %v4640_v0 = vshrl.u32 %v8411_v55, 16  ;;  %v2955_v62 = vshll.u32 %v2714_v2, 16 }
 0x157   : > { %v2974_v14 = vsel %vm7085_vm13, %v8972_v40, %v8971_v1  ;;  %v6017_v21 = vrot.slane %v4976_v8, 9  ;;  %v4596_v11 = vrot.slane %v4595_v53, 4  ;;  %v4629_v23 = vrot.slane %v4627_v57, 4  ;;  %v8974_v8 = vld [vmem:[#allocation22_spill] sm:$0xff]  ;;  %v6832_v40 = vld [vmem:[#allocation2 + $0x18] sm:$0xff]  }
 0x158   : > { %v2954_v38 = vrot.slane %v2952_v61, 4  ;;  %v5090_v17 = vrot.slane %v8973_v36, 5  ;;  %v4632_v27 = vrot.slane %v4630_v54, 5  ;;  %v2957_v7 = vrot.slane %v2955_v62, 5 }
 0x159   : > { %v5093_v13 = vrot.slane %v8202_v47, 5  ;;  %v6018_v58 = vrot.slane %v4977_v12, 9  ;;  %v4619_v2 = vor.u32 %v4618_v51, %v8417_v50  ;;  %v5097_v61 = vrot.slane %v8974_v8, 5  ;;  %v8459_v12 = vld [vmem:[#allocation2 + $0xd0] sm:$0xf] }
 0x15a   : > { %v8453_v53 = vsel %vm7217_vm1, %v6017_v21, %v5090_v17  ;;  %v5092_v57 = vrot.slane %v5090_v17, 4  ;;  %v8457_v54 = vrot.slane %v4636_v28, 5  ;;  %v4642_v47 = vrot.slane %v4640_v0, 4  ;;  %v8465_v51 = vld [vmem:[#allocation2 + $0xc8] sm:$0x1] }
 0x15b   : > { %v2958_v3 = vor.u32 %v2957_v7, %v2954_v38  ;;  %v5100_v32 = vrot.slane %v8206_v56, 5  ;;  %v8473_v28 = vsel %vm7217_vm1, %v6018_v58, %v5097_v61  ;;  %v4633_v0 = vor.u32 %v4632_v27, %v4629_v23  ;;  %v8975_v27 = vld [vmem:[#allocation4_spill] sm:$0xff]  ;;  %v4978_v8 = vld [vmem:[#allocation2 + $0x90] sm:$0xe] }
 0x15c   : > { %v8469_v62 = vsel %vm7217_vm1, %v5092_v57, %v5093_v13  ;;  %v4651_v56 = vshrl.u32 %v4287_v37, 16  ;;  %v4654_v21 = vshll.u32 %v4287_v37, 16  ;;  %v4664_v38 = vshrl.u32 %v8459_v12, 16 }
 0x15d   : > { %6315 = vmatmul.mubr.msk.bf16.gmra.mrb[28].mxu1 %vm1366_vm12, %v5811_v45  ;;  %v4601_v45 = vsel %vm7085_vm13, %v4596_v11, %v8409_v60  ;;  %6473 = vmatmul.mubr.msk.bf16.gmra.mrb[16].mxu0 %vm1366_vm12, %v8320_v44  ;;  %v2959_v1 = vrot.slane %v2958_v3, 4  ;;  %v6034_v60 = vcombine.low %v8453_v53, %v8469_v62  ;;  %v4660_v11 = vshll.u32 %v8459_v12, 16  ;;  %v6833_v44 = vld [vmem:[#allocation2 + $0x24] sm:$0xff]  }
 0x15e   : > { %6320 = vmatprep.mubr.msk.bf16.mxu1 %vm1366_vm12, %v6831_v24  ;;  %v5099_v24 = vrot.slane %v5097_v61, 4  ;;  %6476 = vmatprep.mubr.msk.bf16.mxu0 %vm1366_vm12, %v8322_v26  ;;  %v4643_v23 = vor.u32 %v4642_v47, %v8457_v54  ;;  %v4646_v17 = vshll.u32 %v8465_v51, 16  ;;  %v4610_v37 = vrot.slane %v4609_v4, 4 }
 0x15f   : > { %v2964_v7 = vsel %vm7085_vm13, %v2959_v1, %v8975_v27  ;;  %v4620_v13 = vrot.slane %v4619_v2, 4  ;;  %v4624_v58 = vrot.slane %v4622_v43, 5  ;;  %v5988_v61 = vcombine.low %v4567_v5, %v4577_v29  ;;  %v8511_v1 = vld [vmem:[#allocation2 + $0xd4] sm:$0x1] }
 0x160   : > { %v8485_v36 = vsel %vm7217_vm1, %v5099_v24, %v5100_v32  ;;  %v8494_v57 = vcombine.low %v2964_v7, %v2974_v14  ;;  %v5989_v47 = vcombine.low %v4591_v49, %v4601_v45  ;;  %v4634_v3 = vrot.slane %v4633_v0, 4  ;;  %v4979_v32 = vld [vmem:[#allocation2 + $0x9c] sm:$0xe] }
 0x161   : > { %v6035_v26 = vcombine.low %v8473_v28, %v8485_v36  ;;  %v4653_v4 = vrot.slane %v4651_v56, 4  ;;  %v4656_v43 = vrot.slane %v4654_v21, 5  ;;  %v8507_v14 = vrot.slane %v4660_v11, 5  ;;  %v8976_v24 = vld [vmem:[#allocation3_spill] sm:$0xff]  ;;  %v6834_v21 = vld [vmem:[#allocation2 + $0x30] sm:$0xff]  }
 0x162   : > { %v4666_v2 = vrot.slane %v4664_v38, 4  ;;  %v4644_v9 = vrot.slane %v4643_v23, 4  ;;  %v4648_v31 = vrot.slane %v4646_v17, 5  ;;  %v6019_v35 = vrot.slane %v4978_v8, 9  ;;  %v6835_v23 = vld [vmem:[#allocation2 + $0x3c] sm:$0xff]  }
 0x163   : > { %v5104_v5 = vrot.slane %v8977_v18, 5  ;;  %v4615_v29 = vsel %vm7085_vm13, %v4610_v37, %v8417_v50  ;;  %v4625_v49 = vsel %vm7085_vm13, %v4620_v13, %v4624_v58  ;;  %v4639_v45 = vsel %vm7085_vm13, %v4634_v3, %v8457_v54  ;;  %v6888_v17 = vld [vmem:[#allocation2 + $0x1c] sm:$0xf]  ;;  %v4968_v13 = vld [vmem:[#allocation2 + $0x18] sm:$0xe] }
 0x164   : > { %v4657_v50 = vor.u32 %v4656_v43, %v4653_v4  ;;  %v4667_v11 = vor.u32 %v4666_v2, %v8507_v14  ;;  %v4670_v38 = vshll.u32 %v8511_v1, 16  ;;  %v4649_v54 = vsel %vm7085_vm13, %v4644_v9, %v4648_v31  ;;  %v6889_v31 = vld [vmem:[#allocation2 + $0x20] sm:$0x1]  ;;  %v6890_v18 = vld [vmem:[#allocation2 + $0x28] sm:$0xf] }
 0x165   : > { %6321 = vmatmul.mubr.msk.bf16.vlgmr.msra.gmra.mrb[0].mxu1 %vm1366_vm12, %v6832_v40  ;;  %6477 = vmatmul.mubr.msk.bf16.gmra.mrb[20].mxu0 %vm1366_vm12, %v5988_v61  ;;  %v8525_v0 = vsel %vm7217_vm1, %v6019_v35, %v5104_v5  ;;  %v5106_v56 = vrot.slane %v5104_v5, 4  ;;  %v5107_v40 = vrot.slane %v8214_v52, 5  ;;  %v5034_v27 = vrot.slane %v6888_v17, 5  ;;  %v8978_v52 = vld [vmem:[#allocation24_spill] sm:$0xff] }
 0x166   : > { %6523 = vmatpush3.bf16.msra.mxu1 %v8976_v24  ;;  %6324 = vmatprep.mubr.msk.bf16.mxu1 %vm1366_vm12, %v6833_v44  ;;  %v6020_v44 = vrot.slane %v4979_v32, 9  ;;  %v5111_v37 = vrot.slane %v8978_v52, 5  ;;  %v5114_v8 = vrot.slane %v8254_v16, 5  ;;  %v5990_v61 = vcombine.low %v4615_v29, %v4625_v49  ;;  %v4980_v49 = vld [vmem:[#allocation2 + $0xa8] sm:$0xe] }
 0x167   : > { %6480 = vmatprep.mubr.msk.bf16.mxu0 %vm1366_vm12, %v5989_v47  ;;  %v8535_v7 = vsel %vm7217_vm1, %v5106_v56, %v5107_v40  ;;  %v5991_v4 = vcombine.low %v4639_v45, %v4649_v54  ;;  %v4658_v43 = vrot.slane %v4657_v50, 4  ;;  %v4668_v2 = vrot.slane %v4667_v11, 4  ;;  %v4969_v45 = vld [vmem:[#allocation2 + $0x24] sm:$0xe]  ;;  %v6836_v56 = vld [vmem:[#allocation2 + $0x48] sm:$0xff]   ;;  %v6837_v11 = vld [vmem:[#allocation2 + $0x54] sm:$0xff]  }
 0x168   : > { %v6036_v58 = vcombine.low %v8525_v0, %v8535_v7  ;;  %v8543_v47 = vsel %vm7217_vm1, %v6020_v44, %v5111_v37  ;;  %v5113_v3 = vrot.slane %v5111_v37, 4  ;;  %v4672_v32 = vrot.slane %v4670_v38, 5  ;;  %v4981_v50 = vld [vmem:[#allocation2 + $0xb4] sm:$0xe]  ;;  %v8979_v54 = vld [vmem:[#allocation7_spill] sm:$0xff] }
 0x169   : > { %v6009_v24 = vrot.slane %v4968_v13, 9  ;;  %v5036_v9 = vrot.slane %v5034_v27, 4  ;;  %v5037_v35 = vrot.slane %v6889_v31, 5  ;;  %v5041_v5 = vrot.slane %v6890_v18, 5  ;;  %v8980_v31 = vld [vmem:[#allocation9_spill] sm:$0xff] }
 0x16a   : > { %v8549_v16 = vsel %vm7217_vm1, %v5113_v3, %v5114_v8  ;;  %v4663_v40 = vsel %vm7085_vm13, %v4658_v43, %v8507_v14  ;;  %v5048_v17 = vrot.slane %v8979_v54, 5  ;;  %v6021_v52 = vrot.slane %v4980_v49, 9  ;;  %v2732_v36 = vld [vmem:[#allocation2 + $0xc0] sm:$0xf]  ;;  %v6902_v0 = vld [vmem:[#allocation2 + $0xb0] sm:$0x1] }
 0x16b   : > { %v6037_v29 = vcombine.low %v8543_v47, %v8549_v16  ;;  %v5035_v38 = vsel %vm7217_vm1, %v6009_v24, %v5034_v27  ;;  %v5038_v44 = vsel %vm7217_vm1, %v5036_v9, %v5037_v35  ;;  %v6010_v37 = vrot.slane %v4969_v45, 9 }
 0x16c   : > { %v5043_v13 = vrot.slane %v5041_v5, 4  ;;  %v5118_v8 = vrot.slane %v8270_v63, 5  ;;  %v6022_v43 = vrot.slane %v4981_v50, 9  ;;  %v6026_v27 = vcombine.low %v5035_v38, %v5038_v44  ;;  %v8981_v50 = vld [vmem:[#allocation8_spill] sm:$0xff]  ;;  %v6839_v38 = vld [vmem:[#allocation2 + $0x6c] sm:$0xff]  }
 0x16d   : > { %6325 = vmatmul.mubr.msk.bf16.gmra.mrb[4].mxu1 %vm1366_vm12, %v6834_v21  ;;  %6481 = vmatmul.mubr.msk.bf16.gmra.mrb[24].mxu0 %vm1366_vm12, %v5990_v61  ;;  %v4673_v21 = vsel %vm7085_vm13, %v4668_v2, %v4672_v32  ;;  %v6891_v61 = vld [vmem:[#allocation2 + $0x2c] sm:$0x1]  ;;  %v5050_v9 = vrot.slane %v5048_v17, 4  ;;  %v5051_v63 = vrot.slane %v8980_v31, 5  ;;  %v5125_v35 = vrot.slane %v8337_v59, 5  ;;  %v6840_v31 = vld [vmem:[#allocation2 + $0x78] sm:$0xff]  }
 0x16e   : > { %6328 = vmatprep.mubr.msk.bf16.mxu1 %vm1366_vm12, %v6835_v23  ;;  %6484 = vmatprep.mubr.msk.bf16.mxu0 %vm1366_vm12, %v5991_v4  ;;  %v4970_v23 = vld [vmem:[#allocation2 + $0x30] sm:$0xe]  ;;  %v5992_v14 = vcombine.low %v4663_v40, %v4673_v21  ;;  %v5044_v3 = vrot.slane %v6891_v61, 5  ;;  %v5121_v4 = vrot.slane %v8311_v19, 5  ;;  %v8570_v32 = vsel %vm7217_vm1, %v6021_v52, %v5118_v8  ;;  %v6838_v40 = vld [vmem:[#allocation2 + $0x60] sm:$0xff]  }
 0x16f   : > { %v6011_v2 = vrot.slane %v4970_v23, 9  ;;  %v5120_v24 = vrot.slane %v5118_v8, 4  ;;  %v5128_v18 = vrot.slane %v8391_v39, 5  ;;  %v8585_v45 = vsel %vm7217_vm1, %v6022_v43, %v5125_v35  ;;  %v4971_v21 = vld [vmem:[#allocation2 + $0x3c] sm:$0xe]  ;;  %v8982_v61 = vld [vmem:[#allocation10_spill] sm:$0xff] }
 0x170   : > { %v5042_v59 = vsel %vm7217_vm1, %v6010_v37, %v5041_v5  ;;  %v5045_v39 = vsel %vm7217_vm1, %v5043_v13, %v5044_v3  ;;  %v5052_v23 = vsel %vm7217_vm1, %v5050_v9, %v5051_v63  ;;  %v4982_v52 = vld [vmem:[#allocation2 + $0xc0] sm:$0xe]  ;;  %v6012_v13 = vrot.slane %v4971_v21, 9 }
 0x171   : > { %v8578_v19 = vsel %vm7217_vm1, %v5120_v24, %v5121_v4  ;;  %v5049_v44 = vsel %vm7217_vm1, %v6011_v2, %v5048_v17  ;;  %v6027_v37 = vcombine.low %v5042_v59, %v5045_v39  ;;  %v5058_v3 = vrot.slane %v8982_v61, 5  ;;  %v4983_v17 = vld [vmem:[#allocation2 + $0xcc] sm:$0xe] }
 0x172   : > { %v6038_v49 = vcombine.low %v8570_v32, %v8578_v19  ;;  %v6028_v8 = vcombine.low %v5049_v44, %v5052_v23  ;;  %v6023_v4 = vrot.slane %v4982_v52, 9  ;;  %v5132_v43 = vrot.slane %v8411_v55, 5  ;;  %v2711_v2 = vld [vmem:[#allocation2 + $0x6c] sm:$0xf]  ;;  %v6905_v19 = vld [vmem:[#allocation2 + $0xc8] sm:$0x1] }
 0x173   : > { %v5135_v24 = vrot.slane %v8465_v51, 5  ;;  %v6024_v9 = vrot.slane %v4983_v17, 9  ;;  %v2928_v59 = vshrl.u32 %v2711_v2, 16  ;;  %v2931_v39 = vshll.u32 %v2711_v2, 16  ;;  %v2717_v17 = vld [vmem:[#allocation2 + $0x84] sm:$0xf] }
 0x174   : > { %v5134_v55 = vrot.slane %v5132_v43, 4  ;;  %v2976_v2 = vshrl.u32 %v2717_v17, 16  ;;  %v3067_v7 = vshll.u32 %v6902_v0, 16 }
 0x175   : > { %6329 = vmatmul.mubr.msk.bf16.gmra.mrb[8].mxu1 %vm1366_vm12, %v6836_v56  ;;  %6485 = vmatmul.mubr.msk.bf16.gmra.mrb[28].mxu0 %vm1366_vm12, %v5992_v14  ;;  %v5127_v56 = vrot.slane %v5125_v35, 4  ;;  %v8616_v35 = vsel %vm7217_vm1, %v6023_v4, %v5132_v43  ;;  %v2930_v52 = vrot.slane %v2928_v59, 4  ;;  %v6893_v43 = vld [vmem:[#allocation2 + $0x74] sm:$0x1]  ;;  %v2723_v59 = vld [vmem:[#allocation2 + $0x9c] sm:$0xf] }
 0x176   : > { %6332 = vmatprep.mubr.msk.bf16.mxu1 %vm1366_vm12, %v6837_v11  ;;  %6490 = vmatprep.mubr.msk.bf16.mxu0 %vm1366_vm12, %v6026_v27  ;;  %v5055_v11 = vrot.slane %v8981_v50, 5  ;;  %v8622_v51 = vsel %vm7217_vm1, %v5134_v55, %v5135_v24  ;;  %v2979_v24 = vshll.u32 %v2717_v17, 16  ;;  %v3024_v34 = vshrl.u32 %v2723_v59, 16 }
 0x177   : > { %v8599_v54 = vsel %vm7217_vm1, %v5127_v56, %v5128_v18  ;;  %v5139_v18 = vrot.slane %v8459_v12, 5  ;;  %v6841_v56 = vld [vmem:[#allocation2 + $0x84] sm:$0xff]   ;;  %v6040_v50 = vcombine.low %v8616_v35, %v8622_v51  ;;  %v6892_v12 = vld [vmem:[#allocation2 + $0x70] sm:$0xf]  ;;  %v3027_v20 = vshll.u32 %v2723_v59, 16 }
 0x178   : > { %v6039_v5 = vcombine.low %v8585_v45, %v8599_v54  ;;  %v5057_v14 = vrot.slane %v5055_v11, 4  ;;  %v5056_v27 = vsel %vm7217_vm1, %v6012_v13, %v5055_v11  ;;  %v2937_v44 = vshll.u32 %v6892_v12, 16 }
 0x179   : > { %v8628_v11 = vsel %vm7217_vm1, %v6024_v9, %v5139_v18  ;;  %v6894_v9 = vld [vmem:[#allocation2 + $0x88] sm:$0xf] }
 0x17a   : > { %v5059_v63 = vsel %vm7217_vm1, %v5057_v14, %v5058_v3  ;;  %v2939_v14 = vrot.slane %v2937_v44, 5  ;;  %v6843_v3 = vld [vmem:[#allocation2 + $0x9c] sm:$0xff]   ;;  %v3003_v44 = vshll.u32 %v2720_v6, 16 }
 0x17b   : > { %v6029_v21 = vcombine.low %v5056_v27, %v5059_v63  ;;  %v2947_v27 = vshll.u32 %v6893_v43, 16  ;;  %v2989_v63 = vshrl.u32 %v6894_v9, 16  ;;  %v8983_v43 = vcombine.low %v8396_v22, %v8423_v25 }
 0x17d   : > { %6333 = vmatmul.mubr.msk.bf16.gmra.mrb[12].mxu1 %vm1366_vm12, %v6838_v40  ;;  %6491 = vmatmul.mubr.msk.bf16.vlgmr.msra.gmra.mrb[0].mxu0 %vm1366_vm12, %v6027_v37  ;;  %v5142_v40 = vrot.slane %v8511_v1, 5  ;;  %v2941_v1 = vshrl.u32 %v6892_v12, 16  ;;  %v2933_v37 = vrot.slane %v2931_v39, 5  ;;  %v6845_v39 = vld [vmem:[#allocation2 + $0xb4] sm:$0xff]   ;;  %v2991_v12 = vrot.slane %v2989_v63, 4 }
 0x17e   : > { %6336 = vmatprep.mubr.msk.bf16.mxu1 %vm1366_vm12, %v6839_v38  ;;  %6494 = vmatprep.mubr.msk.bf16.mxu0 %vm1366_vm12, %v6028_v8  ;;  %v5141_v38 = vrot.slane %v5139_v18, 4  ;;  %v6842_v8 = vld [vmem:[#allocation2 + $0x90] sm:$0xff]   ;;  %v2949_v18 = vrot.slane %v2947_v27, 5 }
 0x17f   : > { %v2943_v61 = vrot.slane %v2941_v1, 4  ;;  %v2934_v10 = vor.u32 %v2933_v37, %v2930_v52  ;;  %v3013_v1 = vshrl.u32 %v6895_v15, 16  ;;  %v6896_v52 = vld [vmem:[#allocation2 + $0x8c] sm:$0x1] }
 0x180   : > { %v8634_v23 = vsel %vm7217_vm1, %v5141_v38, %v5142_v40  ;;  %v3000_v40 = vshrl.u32 %v2720_v6, 16  ;;  %v2995_v37 = vshll.u32 %v6896_v52, 16 }
 0x181   : > { %v6041_v13 = vcombine.low %v8628_v11, %v8634_v23  ;;  %v2944_v4 = vor.u32 %v2943_v61, %v2939_v14  ;;  %v2935_v46 = vrot.slane %v2934_v10, 4 }
 0x182   : > { %v3002_v10 = vrot.slane %v3000_v40, 4  ;;  %v2997_v6 = vrot.slane %v2995_v37, 5 }
 0x183   : > { %v2945_v55 = vrot.slane %v2944_v4, 4  ;;  %v2940_v42 = vsel %vm7085_vm13, %v2935_v46, %v2939_v14  ;;  %v3005_v4 = vrot.slane %v3003_v44, 5 }
 0x185   : > { %6337 = vmatmul.mubr.msk.bf16.gmra.mrb[16].mxu1 %vm1366_vm12, %v6840_v31  ;;  %6495 = vmatmul.mubr.msk.bf16.gmra.mrb[4].mxu0 %vm1366_vm12, %v6029_v21  ;;  %v2985_v31 = vshll.u32 %v6894_v9, 16  ;;  %v2981_v21 = vrot.slane %v2979_v24, 5  ;;  %v3026_v24 = vrot.slane %v3024_v34, 4  ;;  %v3029_v9 = vrot.slane %v3027_v20, 5 }
 0x186   : > { %6340 = vmatprep.mubr.msk.bf16.mxu1 %vm1366_vm12, %v6841_v56  ;;  %6498 = vmatprep.mubr.msk.bf16.mxu0 %vm1366_vm12, %v6030_v41  ;;  %v6844_v41 = vld [vmem:[#allocation2 + $0xa8] sm:$0xff]   ;;  %v2978_v56 = vrot.slane %v2976_v2, 4  ;;  %v3015_v2 = vrot.slane %v3013_v1, 4 }
 0x187   : > { %v8653_v38 = vrot.slane %v2985_v31, 5  ;;  %v6846_v31 = vld [vmem:[#allocation2 + $0xc0] sm:$0xff]  }
 0x188   : > { %v2982_v17 = vor.u32 %v2981_v21, %v2978_v56  ;;  %v6898_v56 = vld [vmem:[#allocation2 + $0x98] sm:$0x1]  ;;  %v6899_v21 = vld [vmem:[#allocation2 + $0xa4] sm:$0x1] }
 0x189   : > { %v2992_v14 = vor.u32 %v2991_v12, %v8653_v38  ;;  %v3019_v40 = vshll.u32 %v6898_v56, 16  ;;  %v3043_v12 = vshll.u32 %v6899_v21, 16  ;;  %v6903_v56 = vld [vmem:[#allocation2 + $0xc4] sm:$0xf] }
 0x18a   : > { %v2983_v22 = vrot.slane %v2982_v17, 4 }
 0x18b   : > { %v2993_v25 = vrot.slane %v2992_v14, 4 }
 0x18c   : > { %v2988_v1 = vsel %vm7085_vm13, %v2983_v22, %v8653_v38 }
 0x18d   : > { %6341 = vmatmul.mubr.msk.bf16.gmra.mrb[20].mxu1 %vm1366_vm12, %v6842_v8  ;;  %6499 = vmatmul.mubr.msk.bf16.gmra.mrb[8].mxu0 %vm1366_vm12, %v6031_v48  ;;  %v3009_v48 = vshll.u32 %v6895_v15, 16  ;;  %v6897_v8 = vld [vmem:[#allocation2 + $0xa0] sm:$0xf]  ;;  %v2998_v34 = vsel %vm7085_vm13, %v2993_v25, %v2997_v6 }
 0x18e   : > { %6344 = vmatprep.mubr.msk.bf16.mxu1 %vm1366_vm12, %v6843_v3  ;;  %6502 = vmatprep.mubr.msk.bf16.mxu0 %vm1366_vm12, %v6032_v30  ;;  %v2950_v30 = vsel %vm7085_vm13, %v2945_v55, %v2949_v18  ;;  %v3033_v61 = vshll.u32 %v6897_v8, 16  ;;  %v3037_v3 = vshrl.u32 %v6897_v8, 16  ;;  %v2726_v55 = vld [vmem:[#allocation2 + $0xa8] sm:$0xf]  ;;  %v3006_v18 = vor.u32 %v3005_v4, %v3002_v10  ;;  %v6901_v8 = vld [vmem:[#allocation2 + $0xb8] sm:$0xf] }
 0x18f   : > { %v8666_v27 = vrot.slane %v3009_v48, 5  ;;  %v5870_v63 = vcombine.low %v2940_v42, %v2950_v30  ;;  %v3048_v44 = vshrl.u32 %v2726_v55, 16  ;;  %v2729_v42 = vld [vmem:[#allocation2 + $0xb4] sm:$0xf]  ;;  %v3051_v62 = vshll.u32 %v2726_v55, 16 }
 0x190   : > { %v8672_v46 = vrot.slane %v3033_v61, 5  ;;  %v3007_v20 = vrot.slane %v3006_v18, 4  ;;  %v3021_v30 = vrot.slane %v3019_v40, 5  ;;  %v3072_v52 = vshrl.u32 %v2729_v42, 16 }
 0x191   : > { %v3016_v59 = vor.u32 %v3015_v2, %v8666_v27  ;;  %v3075_v37 = vshll.u32 %v2729_v42, 16  ;;  %v3081_v61 = vshll.u32 %v6901_v8, 16  ;;  %v3045_v10 = vrot.slane %v3043_v12, 5  ;;  %v6904_v12 = vld [vmem:[#allocation2 + $0xbc] sm:$0x1] }
 0x192   : > { %v3050_v4 = vrot.slane %v3048_v44, 4  ;;  %v3099_v18 = vshll.u32 %v2732_v36, 16  ;;  %v3105_v40 = vshll.u32 %v6903_v56, 16 }
 0x193   : > { %v3017_v17 = vrot.slane %v3016_v59, 4  ;;  %v3083_v6 = vrot.slane %v3081_v61, 5  ;;  %v3109_v59 = vshrl.u32 %v6903_v56, 16 }
 0x195   : > { %6345 = vmatmul.mubr.msk.bf16.gmra.mrb[24].mxu1 %vm1366_vm12, %v6844_v41  ;;  %6503 = vmatmul.mubr.msk.bf16.gmra.mrb[12].mxu0 %vm1366_vm12, %v8983_v43  ;;  %v3039_v41 = vrot.slane %v3037_v3, 4  ;;  %v3085_v3 = vshrl.u32 %v6901_v8, 16  ;;  %v3053_v43 = vrot.slane %v3051_v62, 5  ;;  %v3069_v62 = vrot.slane %v3067_v7, 5 }
 0x196   : > { %6348 = vmatprep.mubr.msk.bf16.mxu1 %vm1366_vm12, %v6845_v39  ;;  %6506 = vmatprep.mubr.msk.bf16.mxu0 %vm1366_vm12, %v6034_v60  ;;  %v3030_v39 = vor.u32 %v3029_v9, %v3026_v24  ;;  %v6900_v60 = vld [vmem:[#allocation2 + $0xac] sm:$0xf]  ;;  %v5872_v9 = vcombine.low %v2988_v1, %v2998_v34  ;;  %v3111_v1 = vrot.slane %v3109_v59, 4 }
 0x197   : > { %v3040_v53 = vor.u32 %v3039_v41, %v8672_v46  ;;  %v3057_v15 = vshll.u32 %v6900_v60, 16  ;;  %v3061_v48 = vshrl.u32 %v6900_v60, 16  ;;  %v3087_v28 = vrot.slane %v3085_v3, 4 }
 0x198   : > { %v3031_v14 = vrot.slane %v3030_v39, 4  ;;  %v3022_v41 = vsel %vm7085_vm13, %v3017_v17, %v3021_v30  ;;  %v3054_v22 = vor.u32 %v3053_v43, %v3050_v4 }
 0x199   : > { %v3041_v38 = vrot.slane %v3040_v53, 4  ;;  %v3059_v2 = vrot.slane %v3057_v15, 5  ;;  %v3063_v24 = vrot.slane %v3061_v48, 4  ;;  %v3088_v21 = vor.u32 %v3087_v28, %v3083_v6  ;;  %v8760_v28 = vld [vmem:[%s8883_s2] ss:$0 sm:$0xff] }
 0x19a   : > { %v3055_v42 = vrot.slane %v3054_v22, 4  ;;  %v3101_v15 = vrot.slane %v3099_v18, 5  ;;  %v3107_v48 = vrot.slane %v3105_v40, 5 }
 0x19b   : > { %v3046_v55 = vsel %vm7085_vm13, %v3041_v38, %v3045_v10  ;;  %v3064_v25 = vor.u32 %v3063_v24, %v3059_v2 }
 0x19c   : > { %v3060_v47 = vsel %vm7085_vm13, %v3055_v42, %v3059_v2  ;;  %v3112_v32 = vor.u32 %v3111_v1, %v3107_v48 }
 0x19d   : > { %6349 = vmatmul.mubr.msk.bf16.gmra.mrb[28].mxu1 %vm1366_vm12, %v6846_v31  ;;  %6507 = vmatmul.mubr.msk.bf16.gmra.mrb[16].mxu0 %vm1366_vm12, %v6035_v26  ;;  %v3074_v31 = vrot.slane %v3072_v52, 4  ;;  %v3012_v26 = vsel %vm7085_vm13, %v3007_v20, %v8666_v27  ;;  %v3096_v27 = vshrl.u32 %v2732_v36, 16  ;;  %v3065_v53 = vrot.slane %v3064_v25, 4 }
 0x19e   : > { %6370 = vmatprep.mubr.msk.bf16.mxu1 %vm1366_vm12, %v5870_v63  ;;  %6510 = vmatprep.mubr.msk.bf16.mxu0 %vm1366_vm12, %v6036_v58  ;;  %v3077_v63 = vrot.slane %v3075_v37, 5  ;;  %v3036_v58 = vsel %vm7085_vm13, %v3031_v14, %v8672_v46  ;;  %v5873_v44 = vcombine.low %v3012_v26, %v3022_v41  ;;  %v3089_v20 = vrot.slane %v3088_v21, 4 }
 0x19f   : > { %v5874_v46 = vcombine.low %v3036_v58, %v3046_v55  ;;  %v3098_v60 = vrot.slane %v3096_v27, 4  ;;  %v3070_v16 = vsel %vm7085_vm13, %v3065_v53, %v3069_v62  ;;  %v3113_v17 = vrot.slane %v3112_v32, 4 }
 0x1a0   : > { %v3078_v39 = vor.u32 %v3077_v63, %v3074_v31  ;;  %v5875_v8 = vcombine.low %v3060_v47, %v3070_v16 }
 0x1a2   : > { %v3079_v34 = vrot.slane %v3078_v39, 4 }
 0x1a4   : > { %v3084_v52 = vsel %vm7085_vm13, %v3079_v34, %v3083_v6 }
 0x1a5   : > { %6371 = vmatmul.mubr.msk.bf16.vlgmr.msra.gmra.mrb[16].mxu1 %vm1366_vm12, %v8494_v57  ;;  %v3091_v57 = vshll.u32 %v6904_v12, 16  ;;  %6511 = vmatmul.mubr.msk.bf16.gmra.mrb[20].mxu0 %vm1366_vm12, %v6037_v29  ;;  %v3102_v29 = vor.u32 %v3101_v15, %v3098_v60 }
 0x1a6   : > { %6374 = vmatprep.mubr.msk.bf16.mxu1 %vm1366_vm12, %v5872_v9  ;;  %6514 = vmatprep.mubr.msk.bf16.mxu0 %vm1366_vm12, %v6038_v49  ;;  %v3115_v49 = vshll.u32 %v6905_v19, 16 }
 0x1a7   : > { %v3093_v30 = vrot.slane %v3091_v57, 5  ;;  %v3103_v3 = vrot.slane %v3102_v29, 4 }
 0x1a8   : > { %v3117_v14 = vrot.slane %v3115_v49, 5 }
 0x1a9   : > { %v3094_v37 = vsel %vm7085_vm13, %v3089_v20, %v3093_v30  ;;  %v3108_v10 = vsel %vm7085_vm13, %v3103_v3, %v3107_v48 }
 0x1aa   : > { %v5876_v61 = vcombine.low %v3084_v52, %v3094_v37  ;;  %v3118_v45 = vsel %vm7085_vm13, %v3113_v17, %v3117_v14 }
 0x1ab   : > { %v5877_v54 = vcombine.low %v3108_v10, %v3118_v45 }
 0x1ad   : > { %6375 = vmatmul.mubr.msk.bf16.gmra.mrb[20].mxu1 %vm1366_vm12, %v5873_v44  ;;  %6515 = vmatmul.mubr.msk.bf16.gmra.mrb[24].mxu0 %vm1366_vm12, %v6039_v5 }
 0x1ae   : > { %6378 = vmatprep.mubr.msk.bf16.mxu1 %vm1366_vm12, %v5874_v46  ;;  %6518 = vmatprep.mubr.msk.bf16.mxu0 %vm1366_vm12, %v6040_v50 }
 0x1b5   : > { %6379 = vmatmul.mubr.msk.bf16.gmra.mrb[24].mxu1 %vm1366_vm12, %v5875_v8  ;;  %6519 = vmatmul.mubr.msk.bf16.gmra.mrb[28].mxu0 %vm1366_vm12, %v6041_v13 }
 0x1b6   : > { %6382 = vmatprep.mubr.msk.bf16.mxu1 %vm1366_vm12, %v5876_v61 }
 0x1bd   : > { %6383 = vmatmul.mubr.msk.bf16.gmra.mrb[28].mxu1 %vm1366_vm12, %v5877_v54 }
 0x238   : > { %v6322_v5 = vpop.f32.mrb[0].mxu1 }
 0x239   : > { %v2528_v35 = vpop.f32.mrb[1].mxu1 }
 0x23a   : > { %v6323_v51 = vpop.f32.mrb[2].mxu1 }
 0x23b   : > { %v2531_v50 = vpop.f32.mrb[3].mxu1 }
 0x240   : > { %v6326_v4 = vpop.f32.mrb[4].mxu1 }
 0x241   : > { %v2544_v38 = vpop.f32.mrb[5].mxu1 }
 0x242   : > { %v6327_v43 = vpop.f32.mrb[6].mxu1 }
 0x243   : > { %v2547_v2 = vpop.f32.mrb[7].mxu1 }
 0x248   : > { %v8741_v24 = vpop.f32.mrb[8].mxu1 }
 0x249   : > { %v8743_v33 = vpop.f32.mrb[9].mxu1 }
 0x24a   : > { %v8745_v9 = vpop.f32.mrb[10].mxu1 }
 0x24b   : > { %v8747_v11 = vpop.f32.mrb[11].mxu1 }
 0x250   : > { %v8749_v23 = vpop.f32.mrb[12].mxu1  ;;  %v6492_v6 = vpop.f32.mrb[0].mxu0 }
 0x251   : > { %v8751_v13 = vpop.f32.mrb[13].mxu1  ;;  %v6524_v36 = vadd.f32 %v6492_v6, %v6322_v5  ;;  %v5279_v26 = vpop.f32.mrb[1].mxu0 }
 0x252   : > { %v8753_v31 = vpop.f32.mrb[14].mxu1  ;;  %v6525_v41 = vadd.f32 %v5279_v26, %v2528_v35  ;;  %v6493_v0 = vpop.f32.mrb[2].mxu0 }
 0x253   : > { %v8755_v63 = vpop.f32.mrb[15].mxu1  ;;  %v5447_v7 = vadd.f32 %v6524_v36, %v8760_v28  ;;  %v6526_v58 = vadd.f32 %v6493_v0, %v6323_v51  ;;  %v5282_v55 = vpop.f32.mrb[3].mxu0 }
 0x254   : > { %v5445_v22 = vadd.f32 %v6525_v41, %v8760_v28  ;;  %v6527_v25 = vadd.f32 %v5282_v55, %v2531_v50 }
 0x255   : > { %vm5479_vm0 = vcmp.ge.f32.partialorder %v5447_v7, 0.0  ;;  %v5511_v27 = vmul.f32 0.2, %v5447_v7  ;;  %v5448_v18 = vadd.f32 %v6526_v58, %v8760_v28 }
 0x256   : > { %vm5477_vm3 = vcmp.ge.f32.partialorder %v5445_v22, 0.0  ;;  %v5509_v56 = vmul.f32 0.2, %v5445_v22  ;;  %v5446_v40 = vadd.f32 %v6527_v25, %v8760_v28 }
 0x257   : > { %v5543_v59 = vsel %vm5479_vm0, %v5447_v7, %v5511_v27  ;;  %vm5480_vm4 = vcmp.ge.f32.partialorder %v5448_v18, 0.0  ;;  %v5512_v39 = vmul.f32 0.2, %v5448_v18 }
 0x258   : > { %5576 = vst.msk [vmem:[%s8768_s26 + $0x10] sm:$0xff] %vm5573_vm2, %v5543_v59  ;;  %v5541_v21 = vsel %vm5477_vm3, %v5445_v22, %v5509_v56  ;;  %vm5478_vm5 = vcmp.ge.f32.partialorder %v5446_v40, 0.0  ;;  %v5510_v12 = vmul.f32 0.2, %v5446_v40  ;;  %v6496_v57 = vpop.f32.mrb[4].mxu0 }
 0x259   : > { %5574 = vst.msk [vmem:[%s8768_s26] sm:$0xff] %vm5573_vm2, %v5541_v21  ;;  %v5544_v44 = vsel %vm5480_vm4, %v5448_v18, %v5512_v39  ;;  %v6528_v46 = vadd.f32 %v6496_v57, %v6326_v4  ;;  %v5295_v42 = vpop.f32.mrb[5].mxu0 }
 0x25a   : > { %5577 = vst.msk [vmem:[%s8768_s26 + $0x18] sm:$0xff] %vm5573_vm2, %v5544_v44  ;;  %v5542_v53 = vsel %vm5478_vm5, %v5446_v40, %v5510_v12  ;;  %v6529_v62 = vadd.f32 %v5295_v42, %v2544_v38  ;;  %v6497_v60 = vpop.f32.mrb[6].mxu0 }
 0x25b   : > { %5575 = vst.msk [vmem:[%s8768_s26 + $0x8] sm:$0xff] %vm5573_vm2, %v5542_v53  ;;  %v5451_v15 = vadd.f32 %v6528_v46, %v8760_v28  ;;  %v6530_v48 = vadd.f32 %v6497_v60, %v6327_v43  ;;  %v5298_v1 = vpop.f32.mrb[7].mxu0 }
 0x25c   : > { %v5449_v34 = vadd.f32 %v6529_v62, %v8760_v28  ;;  %v6531_v20 = vadd.f32 %v5298_v1, %v2547_v2 }
 0x25d   : > { %vm5483_vm6 = vcmp.ge.f32.partialorder %v5451_v15, 0.0  ;;  %v5515_v30 = vmul.f32 0.2, %v5451_v15  ;;  %v5452_v47 = vadd.f32 %v6530_v48, %v8760_v28 }
 0x25e   : > { %vm5481_vm7 = vcmp.ge.f32.partialorder %v5449_v34, 0.0  ;;  %v5513_v16 = vmul.f32 0.2, %v5449_v34  ;;  %v5450_v29 = vadd.f32 %v6531_v20, %v8760_v28 }
 0x25f   : > { %v5547_v32 = vsel %vm5483_vm6, %v5451_v15, %v5515_v30  ;;  %vm5484_vm8 = vcmp.ge.f32.partialorder %v5452_v47, 0.0  ;;  %v5516_v19 = vmul.f32 0.2, %v5452_v47 }
 0x260   : > { %5580 = vst.msk [vmem:[%s8768_s26 + $0x30] sm:$0xff] %vm5573_vm2, %v5547_v32  ;;  %v5545_v49 = vsel %vm5481_vm7, %v5449_v34, %v5513_v16  ;;  %vm5482_vm9 = vcmp.ge.f32.partialorder %v5450_v29, 0.0  ;;  %v5514_v52 = vmul.f32 0.2, %v5450_v29  ;;  %v6500_v37 = vpop.f32.mrb[8].mxu0 }
 0x261   : > { %5578 = vst.msk [vmem:[%s8768_s26 + $0x20] sm:$0xff] %vm5573_vm2, %v5545_v49  ;;  %v5548_v8 = vsel %vm5484_vm8, %v5452_v47, %v5516_v19  ;;  %v6532_v61 = vadd.f32 %v6500_v37, %v8741_v24  ;;  %v5311_v3 = vpop.f32.mrb[9].mxu0 }
 0x262   : > { %5581 = vst.msk [vmem:[%s8768_s26 + $0x38] sm:$0xff] %vm5573_vm2, %v5548_v8  ;;  %v5546_v17 = vsel %vm5482_vm9, %v5450_v29, %v5514_v52  ;;  %v6533_v14 = vadd.f32 %v5311_v3, %v8743_v33  ;;  %v6501_v10 = vpop.f32.mrb[10].mxu0 }
 0x263   : > { %5579 = vst.msk [vmem:[%s8768_s26 + $0x28] sm:$0xff] %vm5573_vm2, %v5546_v17  ;;  %v5455_v45 = vadd.f32 %v6532_v61, %v8760_v28  ;;  %v6534_v54 = vadd.f32 %v6501_v10, %v8745_v9  ;;  %v5314_v5 = vpop.f32.mrb[11].mxu0 }
 0x264   : > { %v5453_v35 = vadd.f32 %v6533_v14, %v8760_v28  ;;  %v6535_v51 = vadd.f32 %v5314_v5, %v8747_v11 }
 0x265   : > { %vm5487_vm10 = vcmp.ge.f32.partialorder %v5455_v45, 0.0  ;;  %v5519_v50 = vmul.f32 0.2, %v5455_v45  ;;  %v5456_v4 = vadd.f32 %v6534_v54, %v8760_v28 }
 0x266   : > { %vm5485_vm11 = vcmp.ge.f32.partialorder %v5453_v35, 0.0  ;;  %v5517_v38 = vmul.f32 0.2, %v5453_v35  ;;  %v5454_v43 = vadd.f32 %v6535_v51, %v8760_v28 }
 0x267   : > { %v5551_v2 = vsel %vm5487_vm10, %v5455_v45, %v5519_v50  ;;  %vm5488_vm12 = vcmp.ge.f32.partialorder %v5456_v4, 0.0  ;;  %v5520_v24 = vmul.f32 0.2, %v5456_v4 }
 0x268   : > { %5584 = vst.msk [vmem:[%s8768_s26 + $0x50] sm:$0xff] %vm5573_vm2, %v5551_v2  ;;  %v5549_v33 = vsel %vm5485_vm11, %v5453_v35, %v5517_v38  ;;  %vm5486_vm13 = vcmp.ge.f32.partialorder %v5454_v43, 0.0  ;;  %v5518_v9 = vmul.f32 0.2, %v5454_v43  ;;  %v6504_v6 = vpop.f32.mrb[12].mxu0 }
 0x269   : > { %5582 = vst.msk [vmem:[%s8768_s26 + $0x40] sm:$0xff] %vm5573_vm2, %v5549_v33  ;;  %v5552_v11 = vsel %vm5488_vm12, %v5456_v4, %v5520_v24  ;;  %v6536_v36 = vadd.f32 %v6504_v6, %v8749_v23  ;;  %v5327_v26 = vpop.f32.mrb[13].mxu0 }
 0x26a   : > { %5585 = vst.msk [vmem:[%s8768_s26 + $0x58] sm:$0xff] %vm5573_vm2, %v5552_v11  ;;  %v5550_v41 = vsel %vm5486_vm13, %v5454_v43, %v5518_v9  ;;  %v6537_v0 = vadd.f32 %v5327_v26, %v8751_v13  ;;  %v6505_v7 = vpop.f32.mrb[14].mxu0 }
 0x26b   : > { %5583 = vst.msk [vmem:[%s8768_s26 + $0x48] sm:$0xff] %vm5573_vm2, %v5550_v41  ;;  %v5459_v58 = vadd.f32 %v6536_v36, %v8760_v28  ;;  %v6538_v55 = vadd.f32 %v6505_v7, %v8753_v31  ;;  %v5330_v22 = vpop.f32.mrb[15].mxu0 }
 0x26c   : > { %v5457_v25 = vadd.f32 %v6537_v0, %v8760_v28  ;;  %v6539_v23 = vadd.f32 %v5330_v22, %v8755_v63 }
 0x26d   : > { %vm5491_vm14 = vcmp.ge.f32.partialorder %v5459_v58, 0.0  ;;  %v5523_v27 = vmul.f32 0.2, %v5459_v58  ;;  %v5460_v18 = vadd.f32 %v6538_v55, %v8760_v28 }
 0x26e   : > { %vm5489_vm15 = vcmp.ge.f32.partialorder %v5457_v25, 0.0  ;;  %v5521_v13 = vmul.f32 0.2, %v5457_v25  ;;  %v5458_v56 = vadd.f32 %v6539_v23, %v8760_v28 }
 0x26f   : > { %v5555_v40 = vsel %vm5491_vm14, %v5459_v58, %v5523_v27  ;;  %vm5492_vm1 = vcmp.ge.f32.partialorder %v5460_v18, 0.0  ;;  %v5524_v59 = vmul.f32 0.2, %v5460_v18 }
 0x270   : > { %5588 = vst.msk [vmem:[%s8768_s26 + $0x70] sm:$0xff] %vm5573_vm2, %v5555_v40  ;;  %v5553_v31 = vsel %vm5489_vm15, %v5457_v25, %v5521_v13  ;;  %vm5490_vm0 = vcmp.ge.f32.partialorder %v5458_v56, 0.0  ;;  %v5522_v39 = vmul.f32 0.2, %v5458_v56  ;;  %v6508_v21 = vpop.f32.mrb[16].mxu0 }
 0x271   : > { %5586 = vst.msk [vmem:[%s8768_s26 + $0x60] sm:$0xff] %vm5573_vm2, %v5553_v31  ;;  %v5556_v63 = vsel %vm5492_vm1, %v5460_v18, %v5524_v59  ;;  %v5343_v12 = vpop.f32.mrb[17].mxu0 }
 0x272   : > { %5589 = vst.msk [vmem:[%s8768_s26 + $0x78] sm:$0xff] %vm5573_vm2, %v5556_v63  ;;  %v5554_v57 = vsel %vm5490_vm0, %v5458_v56, %v5522_v39  ;;  %v6509_v44 = vpop.f32.mrb[18].mxu0 }
 0x273   : > { %5587 = vst.msk [vmem:[%s8768_s26 + $0x68] sm:$0xff] %vm5573_vm2, %v5554_v57  ;;  %v5346_v46 = vpop.f32.mrb[19].mxu0 }
 0x278   : > { %v6372_v42 = vpop.f32.mrb[16].mxu1  ;;  %v6512_v20 = vpop.f32.mrb[20].mxu0 }
 0x279   : > { %v3318_v53 = vpop.f32.mrb[17].mxu1  ;;  %v6540_v62 = vadd.f32 %v6508_v21, %v6372_v42  ;;  %v5359_v16 = vpop.f32.mrb[21].mxu0 }
 0x27a   : > { %v6373_v60 = vpop.f32.mrb[18].mxu1  ;;  %v6541_v15 = vadd.f32 %v5343_v12, %v3318_v53  ;;  %v6513_v19 = vpop.f32.mrb[22].mxu0 }
 0x27b   : > { %v5463_v48 = vadd.f32 %v6540_v62, %v8760_v28  ;;  %v3321_v1 = vpop.f32.mrb[19].mxu1  ;;  %v6542_v34 = vadd.f32 %v6509_v44, %v6373_v60  ;;  %v5362_v37 = vpop.f32.mrb[23].mxu0 }
 0x27c   : > { %v5461_v30 = vadd.f32 %v6541_v15, %v8760_v28  ;;  %v6543_v47 = vadd.f32 %v5346_v46, %v3321_v1 }
 0x27d   : > { %vm5495_vm3 = vcmp.ge.f32.partialorder %v5463_v48, 0.0  ;;  %v5527_v29 = vmul.f32 0.2, %v5463_v48  ;;  %v5464_v32 = vadd.f32 %v6542_v34, %v8760_v28 }
 0x27e   : > { %vm5493_vm4 = vcmp.ge.f32.partialorder %v5461_v30, 0.0  ;;  %v5525_v49 = vmul.f32 0.2, %v5461_v30  ;;  %v5462_v52 = vadd.f32 %v6543_v47, %v8760_v28 }
 0x27f   : > { %v5559_v8 = vsel %vm5495_vm3, %v5463_v48, %v5527_v29  ;;  %vm5496_vm5 = vcmp.ge.f32.partialorder %v5464_v32, 0.0  ;;  %v5528_v61 = vmul.f32 0.2, %v5464_v32 }
 0x280   : > { %5592 = vst.msk [vmem:[%s8768_s26 + $0x90] sm:$0xff] %vm5573_vm2, %v5559_v8  ;;  %v5557_v3 = vsel %vm5493_vm4, %v5461_v30, %v5525_v49  ;;  %vm5494_vm6 = vcmp.ge.f32.partialorder %v5462_v52, 0.0  ;;  %v5526_v17 = vmul.f32 0.2, %v5462_v52  ;;  %v6376_v14 = vpop.f32.mrb[20].mxu1  ;;  %v6516_v43 = vpop.f32.mrb[24].mxu0 }
 0x281   : > { %5590 = vst.msk [vmem:[%s8768_s26 + $0x80] sm:$0xff] %vm5573_vm2, %v5557_v3  ;;  %v5560_v10 = vsel %vm5496_vm5, %v5464_v32, %v5528_v61  ;;  %v3334_v45 = vpop.f32.mrb[21].mxu1  ;;  %v6544_v54 = vadd.f32 %v6512_v20, %v6376_v14  ;;  %v5375_v33 = vpop.f32.mrb[25].mxu0 }
 0x282   : > { %5593 = vst.msk [vmem:[%s8768_s26 + $0x98] sm:$0xff] %vm5573_vm2, %v5560_v10  ;;  %v5558_v5 = vsel %vm5494_vm6, %v5462_v52, %v5526_v17  ;;  %v6377_v35 = vpop.f32.mrb[22].mxu1  ;;  %v6545_v51 = vadd.f32 %v5359_v16, %v3334_v45  ;;  %v6517_v11 = vpop.f32.mrb[26].mxu0 }
 0x283   : > { %5591 = vst.msk [vmem:[%s8768_s26 + $0x88] sm:$0xff] %vm5573_vm2, %v5558_v5  ;;  %v5467_v50 = vadd.f32 %v6544_v54, %v8760_v28  ;;  %v3337_v4 = vpop.f32.mrb[23].mxu1  ;;  %v6546_v38 = vadd.f32 %v6513_v19, %v6377_v35  ;;  %v5378_v41 = vpop.f32.mrb[27].mxu0 }
 0x284   : > { %v5465_v2 = vadd.f32 %v6545_v51, %v8760_v28  ;;  %v6547_v24 = vadd.f32 %v5362_v37, %v3337_v4 }
 0x285   : > { %vm5499_vm7 = vcmp.ge.f32.partialorder %v5467_v50, 0.0  ;;  %v5531_v9 = vmul.f32 0.2, %v5467_v50  ;;  %v5468_v6 = vadd.f32 %v6546_v38, %v8760_v28 }
 0x286   : > { %vm5497_vm8 = vcmp.ge.f32.partialorder %v5465_v2, 0.0  ;;  %v5529_v36 = vmul.f32 0.2, %v5465_v2  ;;  %v5466_v26 = vadd.f32 %v6547_v24, %v8760_v28 }
 0x287   : > { %v5563_v0 = vsel %vm5499_vm7, %v5467_v50, %v5531_v9  ;;  %vm5500_vm9 = vcmp.ge.f32.partialorder %v5468_v6, 0.0  ;;  %v5532_v7 = vmul.f32 0.2, %v5468_v6 }
 0x288   : > { %5596 = vst.msk [vmem:[%s8768_s26 + $0xb0] sm:$0xff] %vm5573_vm2, %v5563_v0  ;;  %v5561_v58 = vsel %vm5497_vm8, %v5465_v2, %v5529_v36  ;;  %vm5498_vm10 = vcmp.ge.f32.partialorder %v5466_v26, 0.0  ;;  %v5530_v55 = vmul.f32 0.2, %v5466_v26  ;;  %v6380_v22 = vpop.f32.mrb[24].mxu1  ;;  %v6520_v39 = vpop.f32.mrb[28].mxu0 }
 0x289   : > { %5594 = vst.msk [vmem:[%s8768_s26 + $0xa0] sm:$0xff] %vm5573_vm2, %v5561_v58  ;;  %v5564_v25 = vsel %vm5500_vm9, %v5468_v6, %v5532_v7  ;;  %v3350_v23 = vpop.f32.mrb[25].mxu1  ;;  %v6548_v27 = vadd.f32 %v6516_v43, %v6380_v22  ;;  %v5391_v12 = vpop.f32.mrb[29].mxu0 }
 0x28a   : > { %5597 = vst.msk [vmem:[%s8768_s26 + $0xb8] sm:$0xff] %vm5573_vm2, %v5564_v25  ;;  %v5562_v18 = vsel %vm5498_vm10, %v5466_v26, %v5530_v55  ;;  %v6381_v13 = vpop.f32.mrb[26].mxu1  ;;  %v6549_v56 = vadd.f32 %v5375_v33, %v3350_v23  ;;  %v6521_v46 = vpop.f32.mrb[30].mxu0 }
 0x28b   : > { %5595 = vst.msk [vmem:[%s8768_s26 + $0xa8] sm:$0xff] %vm5573_vm2, %v5562_v18  ;;  %v5471_v40 = vadd.f32 %v6548_v27, %v8760_v28  ;;  %v3353_v59 = vpop.f32.mrb[27].mxu1  ;;  %v6550_v31 = vadd.f32 %v6517_v11, %v6381_v13  ;;  %v5394_v62 = vpop.f32.mrb[31].mxu0 }
 0x28c   : > { %v5469_v21 = vadd.f32 %v6549_v56, %v8760_v28  ;;  %v6551_v63 = vadd.f32 %v5378_v41, %v3353_v59 }
 0x28d   : > { %vm5503_vm11 = vcmp.ge.f32.partialorder %v5471_v40, 0.0  ;;  %v5535_v57 = vmul.f32 0.2, %v5471_v40  ;;  %v5472_v44 = vadd.f32 %v6550_v31, %v8760_v28 }
 0x28e   : > { %vm5501_vm12 = vcmp.ge.f32.partialorder %v5469_v21, 0.0  ;;  %v5533_v42 = vmul.f32 0.2, %v5469_v21  ;;  %v5470_v53 = vadd.f32 %v6551_v63, %v8760_v28 }
 0x28f   : > { %v5567_v60 = vsel %vm5503_vm11, %v5471_v40, %v5535_v57  ;;  %vm5504_vm13 = vcmp.ge.f32.partialorder %v5472_v44, 0.0  ;;  %v5536_v15 = vmul.f32 0.2, %v5472_v44 }
 0x290   : > { %5600 = vst.msk [vmem:[%s8768_s26 + $0xd0] sm:$0xff] %vm5573_vm2, %v5567_v60  ;;  %v5565_v48 = vsel %vm5501_vm12, %v5469_v21, %v5533_v42  ;;  %vm5502_vm14 = vcmp.ge.f32.partialorder %v5470_v53, 0.0  ;;  %v5534_v1 = vmul.f32 0.2, %v5470_v53  ;;  %v6384_v34 = vpop.f32.mrb[28].mxu1 }
 0x291   : > { %5598 = vst.msk [vmem:[%s8768_s26 + $0xc0] sm:$0xff] %vm5573_vm2, %v5565_v48  ;;  %v5568_v20 = vsel %vm5504_vm13, %v5472_v44, %v5536_v15  ;;  %v3366_v30 = vpop.f32.mrb[29].mxu1  ;;  %v6552_v47 = vadd.f32 %v6520_v39, %v6384_v34 }
 0x292   : > { %5601 = vst.msk [vmem:[%s8768_s26 + $0xd8] sm:$0xff] %vm5573_vm2, %v5568_v20  ;;  %v5566_v16 = vsel %vm5502_vm14, %v5470_v53, %v5534_v1  ;;  %v6385_v29 = vpop.f32.mrb[30].mxu1  ;;  %v6553_v32 = vadd.f32 %v5391_v12, %v3366_v30 }
 0x293   : > { %5599 = vst.msk [vmem:[%s8768_s26 + $0xc8] sm:$0xff] %vm5573_vm2, %v5566_v16  ;;  %v5475_v19 = vadd.f32 %v6552_v47, %v8760_v28  ;;  %v3369_v49 = vpop.f32.mrb[31].mxu1  ;;  %v6554_v52 = vadd.f32 %v6521_v46, %v6385_v29 }
 0x294   : > { %v5473_v37 = vadd.f32 %v6553_v32, %v8760_v28  ;;  %v6555_v8 = vadd.f32 %v5394_v62, %v3369_v49 }
 0x295   : > { %vm5507_vm15 = vcmp.ge.f32.partialorder %v5475_v19, 0.0  ;;  %v5539_v61 = vmul.f32 0.2, %v5475_v19  ;;  %v5476_v3 = vadd.f32 %v6554_v52, %v8760_v28 }
 0x296   : > { %vm5505_vm1 = vcmp.ge.f32.partialorder %v5473_v37, 0.0  ;;  %v5537_v17 = vmul.f32 0.2, %v5473_v37  ;;  %v5474_v14 = vadd.f32 %v6555_v8, %v8760_v28 }
 0x297   : > { %v5571_v10 = vsel %vm5507_vm15, %v5475_v19, %v5539_v61  ;;  %vm5508_vm0 = vcmp.ge.f32.partialorder %v5476_v3, 0.0  ;;  %v5540_v45 = vmul.f32 0.2, %v5476_v3 }
 0x298   : > { %5604 = vst.msk [vmem:[%s8768_s26 + $0xf0] sm:$0xff] %vm5573_vm2, %v5571_v10  ;;  %v5569_v54 = vsel %vm5505_vm1, %v5473_v37, %v5537_v17  ;;  %vm5506_vm3 = vcmp.ge.f32.partialorder %v5474_v14, 0.0  ;;  %v5538_v5 = vmul.f32 0.2, %v5474_v14 }
 0x299   : > { %5602 = vst.msk [vmem:[%s8768_s26 + $0xe0] sm:$0xff] %vm5573_vm2, %v5569_v54  ;;  %v5572_v35 = vsel %vm5508_vm0, %v5476_v3, %v5540_v45 }
 0x29a   : > { %5605 = vst.msk [vmem:[%s8768_s26 + $0xf8] sm:$0xff] %vm5573_vm2, %v5572_v35  ;;  %v5570_v51 = vsel %vm5506_vm3, %v5474_v14, %v5538_v5 }
 0x29b   : > { %5603 = vst.msk [vmem:[%s8768_s26 + $0xe8] sm:$0xff] %vm5573_vm2, %v5570_v51 }
 0x29c PF: > { %s13_s14 = sadd.s32 1, %s6928_s14   ;;  %s8984_s12 = smov %s6924_s13 }
 0x29d   : > { %p10_p5 = scmp.ge.s32.totalorder %s13_s14, 4   ;;  %s8985_s13 = smov %s8987_s15 }
 0x29f   :  { %12 = sbr.rel (!%p10_p5) target bundleno = 2 (0x2), region = 93 }

</bundles_post_ra>
